<compile_context>
chip_gen: v5e
topology: v5e:2x2
jax: 0.10.0
libtpu: 0.0.40
codegen_flags: <defaults>
</compile_context>

<pallas_src>
import functools

import numpy as np
import jax
import jax.numpy as jnp
from jax.experimental import pallas as pl
from jax.experimental.pallas import tpu as pltpu

# ----------------------- configuration (small, self-consistent) ---------------
INPUT_SHAPE = [16, 16, 16, 1]      # (D, H, W, C) like the PyTorch ctor arg
FILTERS = [8, 16, 32]
NUM_CLUSTERS = 10
NUM_FEATURES = 32
NEG_SLOPE = 0.01
ALPHA = 1.0
ACTIVATIONS = False                # PyTorch default
BATCH = 2

S3 = (INPUT_SHAPE[0] // 2 // 2 - 1) // 2            # spatial side after conv3
LIN_FEATURES = S3 * S3 * S3 * FILTERS[2]
OUT_PAD3 = 1 if INPUT_SHAPE[0] // 2 // 2 % 2 == 0 else 0
OUT_PAD2 = 1 if INPUT_SHAPE[0] // 2 % 2 == 0 else 0
OUT_PAD1 = 1 if INPUT_SHAPE[0] % 2 == 0 else 0

VMEM_CAP_BYTES = 48 * 1024 * 1024   # below v7x's 64 MiB physical VMEM


def _round_up(x, m):
    return (x + m - 1) // m * m


# ------------------------------ Pallas kernels --------------------------------
def _apply_act(v, act, neg_slope):
    if act == "leaky":
        return jnp.where(v >= 0.0, v, neg_slope * v)
    if act == "sigmoid":
        return jax.nn.sigmoid(v)
    if act == "tanh":
        return jnp.tanh(v)
    return v


def _mm_kernel(x_ref, w_ref, b_ref, o_ref, *scratch, act, neg_slope, nk):
    """Fused matmul + bias + activation.

    nk == 1 : no accumulator, dot+bias+act written straight to o_ref.
    nk  > 1 : K-tiled reduction with f32 VMEM accumulator; the final partial
              product is folded into the epilogue (no extra acc round trip).
    Input tiles are cast to bf16 in registers (MXU bf16 path) if needed."""
    x = x_ref[...]
    if x.dtype != jnp.bfloat16:
        x = x.astype(jnp.bfloat16)
    partial = jnp.dot(x, w_ref[...], preferred_element_type=jnp.float32)

    if nk == 1:
        res = _apply_act(partial + b_ref[...], act, neg_slope)
        o_ref[...] = res.astype(o_ref.dtype)
    else:
        acc_ref = scratch[0]
        k = pl.program_id(1)

        @pl.when(k == 0)
        def _():
            acc_ref[...] = partial

        @pl.when(jnp.logical_and(k > 0, k < nk - 1))
        def _():
            acc_ref[...] += partial

        @pl.when(k == nk - 1)
        def _():
            res = _apply_act(acc_ref[...] + partial + b_ref[...], act, neg_slope)
            o_ref[...] = res.astype(o_ref.dtype)


def _emb_cluster_kernel(x_ref, w_ref, b_ref, cw_ref, cwsq_ref, emb_ref, q_ref,
                        *, alpha):
    """Embedding linear fused with the ClusterlingLayer soft-assignment.

    emb = x @ W + b  (bf16 MXU, f32 accum), then Student-t assignment via the
    ||x||^2 + ||w||^2 - 2 x.w formulation.  Padded cluster columns carry a
    huge ||w||^2 so their q contribution ~0; row normalization is exact."""
    x = x_ref[...].astype(jnp.bfloat16)
    emb = jnp.dot(x, w_ref[...], preferred_element_type=jnp.float32) + b_ref[...]
    emb_ref[...] = emb

    xw = jnp.dot(emb, cw_ref[...], preferred_element_type=jnp.float32)   # (M, Kc)
    x2 = jnp.sum(emb * emb, axis=1, keepdims=True)                        # (M, 1)
    dist = jnp.maximum(x2 - 2.0 * xw + cwsq_ref[...], 0.0)
    q = pl.reciprocal(1.0 + dist / alpha, approx=True)                    # EUP
    exponent = (alpha + 1.0) / 2.0
    if exponent != 1.0:
        q = q ** exponent
    q_ref[...] = q / jnp.sum(q, axis=1, keepdims=True)                    # exact


# ------------------------- prepped-weight matmul wrapper -----------------------
def _vmem_limit(tm, tk, n_pad, x_bytes):
    def tile_bytes(r, c, nb):
        return _round_up(r, 8) * _round_up(c, 128) * nb
    est = 2 * (tile_bytes(tm, tk, x_bytes) + tile_bytes(tk, n_pad, 2)
               + tile_bytes(1, n_pad, 4) + tile_bytes(tm, n_pad, 4))
    est += tile_bytes(tm, n_pad, 4)
    return min(VMEM_CAP_BYTES, max(8 * 1024 * 1024, 2 * est))


def prep_mm(w_mat, b):
    """Cast to bf16 and pad a (K, N) weight matrix + bias once, at init time."""
    K, N = w_mat.shape
    TK = 512 if K > 512 else _round_up(K, 128)
    K_pad = _round_up(K, TK)
    N_pad = _round_up(N, 128)
    w_p = jnp.asarray(w_mat, jnp.bfloat16)
    if (K_pad, N_pad) != (K, N):
        w_p = jnp.pad(w_p, ((0, K_pad - K), (0, N_pad - N)))
    b_p = jnp.asarray(b, jnp.float32)
    if N_pad != N:
        b_p = jnp.pad(b_p, (0, N_pad - N))
    return {"w": w_p, "b": b_p.reshape(1, N_pad), "k": K, "n": N, "tk": TK}


def matmul_prepped(x, pw, act="none", out_dtype=jnp.bfloat16, neg_slope=NEG_SLOPE):
    """x:(M,K) @ prepped weight (K_pad,N_pad) + bias with fused activation."""
    M, K = x.shape
    assert K == pw["k"]
    w_p, b_p = pw["w"], pw["b"]
    K_pad, N_pad = w_p.shape
    TK = pw["tk"]
    nk = K_pad // TK

    # >=2 tiles on the parallel M axis for mid/large layers (v7x dual TC).
    if M >= 64:
        TM = min(512, _round_up((M + 1) // 2, 16))
    else:
        TM = _round_up(M, 8)
    M_pad = _round_up(M, TM)

    x_p = x
    if (M_pad, K_pad) != (M, K):
        x_p = jnp.pad(x_p, ((0, M_pad - M), (0, K_pad - K)))

    x_bytes = 2 if x_p.dtype == jnp.bfloat16 else 4
    vmem_limit = _vmem_limit(TM, TK, N_pad, x_bytes)

    scratch = [pltpu.VMEM((TM, N_pad), jnp.float32)] if nk > 1 else []
    kernel = functools.partial(_mm_kernel, act=act, neg_slope=neg_slope, nk=nk)
    out = pl.pallas_call(
        kernel,
        out_shape=jax.ShapeDtypeStruct((M_pad, N_pad), out_dtype),
        grid=(M_pad // TM, nk),
        in_specs=[
            pl.BlockSpec((TM, TK), lambda i, k: (i, k)),
            pl.BlockSpec((TK, N_pad), lambda i, k: (k, 0)),
            pl.BlockSpec((1, N_pad), lambda i, k: (0, 0)),
        ],
        out_specs=pl.BlockSpec((TM, N_pad), lambda i, k: (i, 0)),
        scratch_shapes=scratch,
        compiler_params=pltpu.CompilerParams(
            dimension_semantics=("parallel", "arbitrary"),
            vmem_limit_bytes=vmem_limit),
    )(x_p, w_p, b_p)

    if (M_pad, N_pad) != (M, pw["n"]):
        out = out[:M, :pw["n"]]
    return out


# --------------------------- conv / deconv layer prep --------------------------
def prep_conv(w, b):
    """Conv3d weight (Cout,Cin,k,k,k) -> matmul-ready (k^3*Cin, Cout)."""
    cout, cin, k, _, _ = w.shape
    w_mat = jnp.transpose(w, (2, 3, 4, 1, 0)).reshape(k ** 3 * cin, cout)
    return {"mm": prep_mm(w_mat, b), "k": int(k)}


def prep_deconv(w_t, b, k, s, pad, out_pad, d_in):
    """Stride-phase (sub-pixel) fold of a ConvTranspose3d.

    The s^3 output phases share one stride-1 patch window of size win^3 over
    the (undilated) input; per-phase sub-kernels are scattered (zero-padded)
    into a single (win^3*Cin, s^3*Cout) weight matrix so the whole layer is
    one lane-dense matmul."""
    cin, cout = int(w_t.shape[0]), int(w_t.shape[1])
    do = (d_in - 1) * s - 2 * pad + k + out_pad
    # TODO(synk): fall back to zero-dilated formulation when do % s != 0
    # (cannot happen for the output_padding rule used by this module).
    assert do % s == 0
    m = do // s

    phases = []
    for phi in range(s):
        r = (phi + pad) % s
        t_cnt = max(0, (k - r + s - 1) // s)
        q = (phi + pad - r) // s
        phases.append((r, t_cnt, q))
    lo = min(q - (t - 1) for (_, t, q) in phases if t > 0)
    hi = max(q for (_, t, q) in phases if t > 0)
    win = hi - lo + 1
    pad_l = max(0, -lo)
    pad_r = max(0, (m - 1) + hi - (d_in - 1))
    base = lo + pad_l          # start offset of the patch window in padded coords

    w_np = np.asarray(w_t, np.float32)
    wmat = np.zeros((win, win, win, cin, s, s, s, cout), np.float32)
    for pd, (rd, td_cnt, qd) in enumerate(phases):
        for ph, (rh, th_cnt, qh) in enumerate(phases):
            for pw_, (rw, tw_cnt, qw) in enumerate(phases):
                for td in range(td_cnt):
                    ud, jd = qd - td - lo, rd + s * td
                    for th in range(th_cnt):
                        uh, jh = qh - th - lo, rh + s * th
                        for tw in range(tw_cnt):
                            uw, jw = qw - tw - lo, rw + s * tw
                            wmat[ud, uh, uw, :, pd, ph, pw_, :] = w_np[:, :, jd, jh, jw]
    wmat = wmat.reshape(win ** 3 * cin, s ** 3 * cout)
    b_fold = jnp.tile(jnp.asarray(b, jnp.float32), s ** 3)   # co fastest on N
    return {"mm": prep_mm(jnp.asarray(wmat), b_fold), "win": win, "base": base,
            "pad_l": pad_l, "pad_r": pad_r, "m": m, "s": s, "cout": cout, "do": do}


def prep_cluster(clu_w, emb_n_pad):
    kc, f = clu_w.shape
    kc_pad = _round_up(kc, 128)
    cw = jnp.zeros((emb_n_pad, kc_pad), jnp.float32)
    cw = cw.at[:f, :kc].set(jnp.asarray(clu_w, jnp.float32).T)
    cwsq = jnp.full((1, kc_pad), 1e30, jnp.float32)   # huge -> padded q ~ 0
    cwsq = cwsq.at[0, :kc].set(jnp.sum(clu_w * clu_w, axis=1))
    return {"cw": cw, "cwsq": cwsq, "kc": int(kc)}


# --------------------------- layer forward functions ---------------------------
def conv3d_prepped(x, cp, stride, pad, act, out_dtype):
    """x:(B,D,H,W,Cin) NDHWC -> (B,Do,Ho,Wo,Cout) via im2col + fused matmul."""
    B, D, H, Wsp, Cin = x.shape
    k = cp["k"]
    cout = cp["mm"]["n"]
    xp = jnp.pad(x, ((0, 0), (pad, pad), (pad, pad), (pad, pad), (0, 0)))
    Do = (D + 2 * pad - k) // stride + 1
    Ho = (H + 2 * pad - k) // stride + 1
    Wo = (Wsp + 2 * pad - k) // stride + 1
    cols = []
    for kd in range(k):
        for kh in range(k):
            for kw in range(k):
                cols.append(
                    xp[:,
                       kd:kd + (Do - 1) * stride + 1:stride,
                       kh:kh + (Ho - 1) * stride + 1:stride,
                       kw:kw + (Wo - 1) * stride + 1:stride,
                       :])
    # TODO(synk): stream the k^3 taps inside the Pallas kernel via a reduction
    # grid axis (manual strided DMA) to avoid materializing the patch matrix
    # in HBM for the full-size 64^3 configuration.
    patch = jnp.concatenate(cols, axis=-1).reshape(B * Do * Ho * Wo, k ** 3 * Cin)
    out = matmul_prepped(patch, cp["mm"], act=act, out_dtype=out_dtype)
    return out.reshape(B, Do, Ho, Wo, cout)


def deconv3d_prepped(x, dp, act, out_dtype):
    """Stride-phase ConvTranspose3d: one stride-1 im2col + one phase-folded matmul."""
    B, D, H, Wsp, Cin = x.shape
    win, base, m, s, cout = dp["win"], dp["base"], dp["m"], dp["s"], dp["cout"]
    pad_l, pad_r = dp["pad_l"], dp["pad_r"]
    xp = jnp.pad(x, ((0, 0), (pad_l, pad_r), (pad_l, pad_r), (pad_l, pad_r), (0, 0)))
    cols = []
    for ud in range(win):
        for uh in range(win):
            for uw in range(win):
                cols.append(xp[:,
                               base + ud:base + ud + m,
                               base + uh:base + uh + m,
                               base + uw:base + uw + m,
                               :])
    patch = jnp.concatenate(cols, axis=-1).reshape(B * m * m * m, win ** 3 * Cin)
    out = matmul_prepped(patch, dp["mm"], act=act, out_dtype=out_dtype)
    out = out.reshape(B, m, m, m, s, s, s, cout)
    out = out.transpose(0, 1, 4, 2, 5, 3, 6, 7).reshape(B, m * s, m * s, m * s, cout)
    return out


def embed_and_cluster(x, emb_pw, clu_pw, alpha=ALPHA):
    """Fused embedding linear + ClusterlingLayer soft assignment (one pallas_call)."""
    B, K = x.shape
    K_pad, N_pad = emb_pw["w"].shape
    Kc_pad = clu_pw["cw"].shape[1]
    Mp = max(8, _round_up(B, 8))
    x_p = jnp.pad(x.astype(jnp.float32), ((0, Mp - B), (0, K_pad - K)))

    emb_o, q_o = pl.pallas_call(
        functools.partial(_emb_cluster_kernel, alpha=alpha),
        out_shape=(jax.ShapeDtypeStruct((Mp, N_pad), jnp.float32),
                   jax.ShapeDtypeStruct((Mp, Kc_pad), jnp.float32)),
        in_specs=[
            pl.BlockSpec((Mp, K_pad), lambda: (0, 0)),
            pl.BlockSpec((K_pad, N_pad), lambda: (0, 0)),
            pl.BlockSpec((1, N_pad), lambda: (0, 0)),
            pl.BlockSpec((N_pad, Kc_pad), lambda: (0, 0)),
            pl.BlockSpec((1, Kc_pad), lambda: (0, 0)),
        ],
        out_specs=(pl.BlockSpec((Mp, N_pad), lambda: (0, 0)),
                   pl.BlockSpec((Mp, Kc_pad), lambda: (0, 0))),
        compiler_params=pltpu.CompilerParams(
            vmem_limit_bytes=min(VMEM_CAP_BYTES, 16 * 1024 * 1024)),
    )(x_p, emb_pw["w"], emb_pw["b"], clu_pw["cw"], clu_pw["cwsq"])
    return emb_o[:B, :emb_pw["n"]], q_o[:B, :clu_pw["kc"]]


# ------------------------------- parameters -----------------------------------
def _uniform(key, shape, bound):
    return jax.random.uniform(key, shape, jnp.float32, -bound, bound)


def init_params(key):
    ks = jax.random.split(key, 16)
    p = {}

    def conv_init(kw, kb, cout, cin, k):
        bound = 1.0 / (cin * k ** 3) ** 0.5
        return _uniform(kw, (cout, cin, k, k, k), bound), _uniform(kb, (cout,), bound)

    def deconv_init(kw, kb, cin, cout, k):
        bound = 1.0 / (cout * k ** 3) ** 0.5
        return _uniform(kw, (cin, cout, k, k, k), bound), _uniform(kb, (cout,), bound)

    def lin_init(kw, kb, out_f, in_f):
        bound = 1.0 / in_f ** 0.5
        return _uniform(kw, (out_f, in_f), bound), _uniform(kb, (out_f,), bound)

    p["conv1_w"], p["conv1_b"] = conv_init(ks[0], ks[1], FILTERS[0], 1, 5)
    p["conv2_w"], p["conv2_b"] = conv_init(ks[2], ks[3], FILTERS[1], FILTERS[0], 5)
    p["conv3_w"], p["conv3_b"] = conv_init(ks[4], ks[5], FILTERS[2], FILTERS[1], 3)
    p["emb_w"], p["emb_b"] = lin_init(ks[6], ks[7], NUM_FEATURES, LIN_FEATURES)
    p["deemb_w"], p["deemb_b"] = lin_init(ks[8], ks[9], LIN_FEATURES, NUM_FEATURES)
    p["deconv3_w"], p["deconv3_b"] = deconv_init(ks[10], ks[11], FILTERS[2], FILTERS[1], 3)
    p["deconv2_w"], p["deconv2_b"] = deconv_init(ks[12], ks[13], FILTERS[1], FILTERS[0], 5)
    p["deconv1_w"], p["deconv1_b"] = deconv_init(ks[14], ks[15], FILTERS[0], 1, 5)
    # xavier_uniform_ for the clustering weight (num_clusters, num_features)
    xbound = (6.0 / (NUM_FEATURES + NUM_CLUSTERS)) ** 0.5
    p["clu_w"] = _uniform(jax.random.fold_in(key, 99), (NUM_CLUSTERS, NUM_FEATURES), xbound)
    return p


def prepare_params(p):
    """One-time weight prep: reshape / phase-fold / cast bf16 / pad.  Done
    outside jit so no cast/pad glue runs per forward."""
    pp = {}
    pp["conv1"] = prep_conv(p["conv1_w"], p["conv1_b"])
    pp["conv2"] = prep_conv(p["conv2_w"], p["conv2_b"])
    pp["conv3"] = prep_conv(p["conv3_w"], p["conv3_b"])
    pp["emb"] = prep_mm(p["emb_w"].T, p["emb_b"])
    pp["deemb"] = prep_mm(p["deemb_w"].T, p["deemb_b"])
    pp["deconv3"] = prep_deconv(p["deconv3_w"], p["deconv3_b"],
                                k=3, s=2, pad=0, out_pad=OUT_PAD3, d_in=S3)
    pp["deconv2"] = prep_deconv(p["deconv2_w"], p["deconv2_b"],
                                k=5, s=2, pad=2, out_pad=OUT_PAD2,
                                d_in=pp["deconv3"]["do"])
    pp["deconv1"] = prep_deconv(p["deconv1_w"], p["deconv1_b"],
                                k=5, s=2, pad=2, out_pad=OUT_PAD1,
                                d_in=pp["deconv2"]["do"])
    assert pp["deconv1"]["do"] == INPUT_SHAPE[0]
    pp["clu"] = prep_cluster(p["clu_w"], pp["emb"]["w"].shape[1])
    return pp


# --------------------------------- forward ------------------------------------
def cae3_forward(x, pp):
    """x: (B, 1, D, H, W) NCDHW like PyTorch; outputs in PyTorch layouts."""
    act3 = "sigmoid" if ACTIVATIONS else "leaky"
    final_act = "tanh" if ACTIVATIONS else "none"
    B = x.shape[0]

    # NCDHW -> NDHWC, bf16 end-to-end through the trunk.
    h = x.transpose(0, 2, 3, 4, 1).astype(jnp.bfloat16)
    h = conv3d_prepped(h, pp["conv1"], stride=2, pad=2, act="leaky",
                       out_dtype=jnp.bfloat16)
    h = conv3d_prepped(h, pp["conv2"], stride=2, pad=2, act="leaky",
                       out_dtype=jnp.bfloat16)
    h = conv3d_prepped(h, pp["conv3"], stride=2, pad=0, act=act3,
                       out_dtype=jnp.float32)

    # flatten in PyTorch NCDHW order so fcdown1 / embedding semantics match.
    fcdown1 = h.transpose(0, 4, 1, 2, 3).reshape(B, -1)       # (B, lin_features_len)
    emb, clustering_out = embed_and_cluster(fcdown1, pp["emb"], pp["clu"], alpha=ALPHA)
    extra_out = emb

    d = matmul_prepped(emb, pp["deemb"], act="leaky", out_dtype=jnp.bfloat16)
    d = d.reshape(B, FILTERS[2], S3, S3, S3).transpose(0, 2, 3, 4, 1)   # -> NDHWC
    d = deconv3d_prepped(d, pp["deconv3"], act="leaky", out_dtype=jnp.bfloat16)
    d = deconv3d_prepped(d, pp["deconv2"], act="leaky", out_dtype=jnp.bfloat16)
    d = deconv3d_prepped(d, pp["deconv1"], act=final_act, out_dtype=jnp.float32)
    recon = d.transpose(0, 4, 1, 2, 3)               # back to NCDHW (C=1)
    return recon, clustering_out, extra_out, fcdown1


# ----------------------------------- main --------------------------------------
if __name__ == "__main__":
    key = jax.random.PRNGKey(0)
    pkey, xkey = jax.random.split(key)
    params = init_params(pkey)
    prepped = prepare_params(params)            # one-time cast/pad/phase-fold

    x = jax.random.normal(
        xkey,
        (BATCH, INPUT_SHAPE[3], INPUT_SHAPE[0], INPUT_SHAPE[1], INPUT_SHAPE[2]),
        jnp.float32)

    # Prepped params are closed over (static metadata stays Python-static).
    fwd = jax.jit(lambda xx: cae3_forward(xx, prepped))
    recon, clustering_out, extra_out, fcdown1 = fwd(x)
    jax.block_until_ready((recon, clustering_out, extra_out, fcdown1))

    assert recon.shape == (BATCH, 1, INPUT_SHAPE[0], INPUT_SHAPE[1], INPUT_SHAPE[2])
    assert clustering_out.shape == (BATCH, NUM_CLUSTERS)
    assert extra_out.shape == (BATCH, NUM_FEATURES)
    assert fcdown1.shape == (BATCH, LIN_FEATURES)
    assert bool(jnp.all(jnp.abs(jnp.sum(clustering_out, axis=1) - 1.0) < 1e-3))
    print("KERNEL_OK")
</pallas_src>

<mosaic_0001>
module attributes {stable_mosaic.version = 11 : i64} {
  func.func @_mm_kernel(%arg0: i32, %arg1: i32, %arg2: memref<512x128xbf16, #tpu.memory_space<vmem>>, %arg3: memref<128x128xbf16, #tpu.memory_space<vmem>>, %arg4: memref<1x128xf32, #tpu.memory_space<vmem>>, %arg5: memref<512x128xbf16, #tpu.memory_space<vmem>>) attributes {dimension_semantics = [#tpu.dimension_semantics<parallel>, #tpu.dimension_semantics<arbitrary>], iteration_bounds = array<i64: 2, 1>, scalar_prefetch = 0 : i64, scratch_operands = 0 : i64, tpu.core_type = #tpu.core_type<tc>, window_params = [{transform_indices = @transform_0, window_bounds = array<i64: 512, 128>}, {transform_indices = @transform_1, window_bounds = array<i64: 128, 128>}, {pipeline_mode = #tpu.pipeline_mode<synchronous>, transform_indices = @transform_2, window_bounds = array<i64: 1, 128>}, {transform_indices = @transform_3, window_bounds = array<i64: 512, 128>}]} {
    %c0 = arith.constant 0 : index
    %c0_0 = arith.constant 0 : index
    %0 = vector.load %arg2[%c0, %c0_0] : memref<512x128xbf16, #tpu.memory_space<vmem>>, vector<512x128xbf16>
    %c0_1 = arith.constant 0 : index
    %c0_2 = arith.constant 0 : index
    %1 = vector.load %arg3[%c0_1, %c0_2] : memref<128x128xbf16, #tpu.memory_space<vmem>>, vector<128x128xbf16>
    %cst = arith.constant dense<0.000000e+00> : vector<512x128xf32>
    %2 = tpu.matmul %0, %1, %cst {dimension_numbers = #tpu.dot_dimension_numbers<[1], [0], [0], [1], [0, 0, 1, 1], [], []>} : vector<512x128xbf16>, vector<128x128xbf16>, vector<512x128xf32> -> vector<512x128xf32>
    %c0_3 = arith.constant 0 : index
    %c0_4 = arith.constant 0 : index
    %3 = vector.load %arg4[%c0_3, %c0_4] : memref<1x128xf32, #tpu.memory_space<vmem>>, vector<1x128xf32>
    %4 = vector.broadcast %3 : vector<1x128xf32> to vector<512x128xf32>
    %5 = arith.addf %2, %4 : vector<512x128xf32>
    %cst_5 = arith.constant 0.000000e+00 : f32
    %6 = vector.broadcast %cst_5 : f32 to vector<512x128xf32>
    %7 = arith.cmpf oge, %5, %6 : vector<512x128xf32>
    %cst_6 = arith.constant 0.00999999977 : f32
    %8 = vector.broadcast %cst_6 : f32 to vector<512x128xf32>
    %9 = arith.mulf %8, %5 : vector<512x128xf32>
    %10 = arith.select %7, %5, %9 : vector<512x128xi1>, vector<512x128xf32>
    %11 = arith.truncf %10 : vector<512x128xf32> to vector<512x128xbf16>
    %c0_7 = arith.constant 0 : index
    %c0_8 = arith.constant 0 : index
    %12 = vector.load %arg5[%c0_7, %c0_8] : memref<512x128xbf16, #tpu.memory_space<vmem>>, vector<512x128xbf16>
    tpu.vector_store %arg5[%c0_7, %c0_8], %11 {strides = array<i32>} : memref<512x128xbf16, #tpu.memory_space<vmem>>, vector<512x128xbf16>,
    return
  }
  func.func @transform_0(%arg0: i32, %arg1: i32) -> (i32, i32) {
    %c0_i32 = arith.constant 0 : i32
    return %arg0, %arg1 : i32, i32
  }
  func.func @transform_1(%arg0: i32, %arg1: i32) -> (i32, i32) {
    %c0_i32 = arith.constant 0 : i32
    %c0_i32_0 = arith.constant 0 : i32
    return %arg1, %c0_i32 : i32, i32
  }
  func.func @transform_2(%arg0: i32, %arg1: i32) -> (i32, i32) {
    %c0_i32 = arith.constant 0 : i32
    %c0_i32_0 = arith.constant 0 : i32
    %c0_i32_1 = arith.constant 0 : i32
    return %c0_i32, %c0_i32_0 : i32, i32
  }
  func.func @transform_3(%arg0: i32, %arg1: i32) -> (i32, i32) {
    %c0_i32 = arith.constant 0 : i32
    %c0_i32_0 = arith.constant 0 : i32
    return %arg0, %c0_i32 : i32, i32
  }
}

module attributes {stable_mosaic.version = 11 : i64} {
  func.func @_mm_kernel(%arg0: i32, %arg1: i32, %arg2: memref<64x512xbf16, #tpu.memory_space<vmem>>, %arg3: memref<512x128xbf16, #tpu.memory_space<vmem>>, %arg4: memref<1x128xf32, #tpu.memory_space<vmem>>, %arg5: memref<64x128xbf16, #tpu.memory_space<vmem>>, %arg6: memref<64x128xf32, #tpu.memory_space<vmem>>) attributes {dimension_semantics = [#tpu.dimension_semantics<parallel>, #tpu.dimension_semantics<arbitrary>], iteration_bounds = array<i64: 2, 2>, scalar_prefetch = 0 : i64, scratch_operands = 1 : i64, tpu.core_type = #tpu.core_type<tc>, window_params = [{transform_indices = @transform_0, window_bounds = array<i64: 64, 512>}, {transform_indices = @transform_1, window_bounds = array<i64: 512, 128>}, {pipeline_mode = #tpu.pipeline_mode<synchronous>, transform_indices = @transform_2, window_bounds = array<i64: 1, 128>}, {transform_indices = @transform_3, window_bounds = array<i64: 64, 128>}]} {
    %c0 = arith.constant 0 : index
    %c0_0 = arith.constant 0 : index
    %0 = vector.load %arg2[%c0, %c0_0] : memref<64x512xbf16, #tpu.memory_space<vmem>>, vector<64x512xbf16>
    %c0_1 = arith.constant 0 : index
    %c0_2 = arith.constant 0 : index
    %1 = vector.load %arg3[%c0_1, %c0_2] : memref<512x128xbf16, #tpu.memory_space<vmem>>, vector<512x128xbf16>
    %cst = arith.constant dense<0.000000e+00> : vector<64x128xf32>
    %2 = tpu.matmul %0, %1, %cst {dimension_numbers = #tpu.dot_dimension_numbers<[1], [0], [0], [1], [0, 0, 1, 1], [], []>} : vector<64x512xbf16>, vector<512x128xbf16>, vector<64x128xf32> -> vector<64x128xf32>
    %c0_i32 = arith.constant 0 : i32
    %3 = arith.cmpi eq, %arg1, %c0_i32 : i32
    %4 = arith.extui %3 : i1 to i32
    %c0_i32_3 = arith.constant 0 : i32
    %5 = arith.cmpi ne, %4, %c0_i32_3 : i32
    scf.if %5 {
      %c0_8 = arith.constant 0 : index
      %c0_9 = arith.constant 0 : index
      %14 = vector.load %arg6[%c0_8, %c0_9] : memref<64x128xf32, #tpu.memory_space<vmem>>, vector<64x128xf32>
      tpu.vector_store %arg6[%c0_8, %c0_9], %2 {strides = array<i32>} : memref<64x128xf32, #tpu.memory_space<vmem>>, vector<64x128xf32>,
    } else {
    }
    %c0_i32_4 = arith.constant 0 : i32
    %6 = arith.cmpi sgt, %arg1, %c0_i32_4 : i32
    %c1_i32 = arith.constant 1 : i32
    %7 = arith.cmpi slt, %arg1, %c1_i32 : i32
    %8 = arith.andi %6, %7 : i1
    %9 = arith.extui %8 : i1 to i32
    %c0_i32_5 = arith.constant 0 : i32
    %10 = arith.cmpi ne, %9, %c0_i32_5 : i32
    scf.if %10 {
      %c0_8 = arith.constant 0 : index
      %c0_9 = arith.constant 0 : index
      %14 = vector.load %arg6[%c0_8, %c0_9] : memref<64x128xf32, #tpu.memory_space<vmem>>, vector<64x128xf32>
      %15 = arith.addf %14, %2 : vector<64x128xf32>
      %c0_10 = arith.constant 0 : index
      %c0_11 = arith.constant 0 : index
      %16 = vector.load %arg6[%c0_10, %c0_11] : memref<64x128xf32, #tpu.memory_space<vmem>>, vector<64x128xf32>
      tpu.vector_store %arg6[%c0_10, %c0_11], %15 {strides = array<i32>} : memref<64x128xf32, #tpu.memory_space<vmem>>, vector<64x128xf32>,
    } else {
    }
    %c1_i32_6 = arith.constant 1 : i32
    %11 = arith.cmpi eq, %arg1, %c1_i32_6 : i32
    %12 = arith.extui %11 : i1 to i32
    %c0_i32_7 = arith.constant 0 : i32
    %13 = arith.cmpi ne, %12, %c0_i32_7 : i32
    scf.if %13 {
      %c0_8 = arith.constant 0 : index
      %c0_9 = arith.constant 0 : index
      %14 = vector.load %arg6[%c0_8, %c0_9] : memref<64x128xf32, #tpu.memory_space<vmem>>, vector<64x128xf32>
      %15 = arith.addf %14, %2 : vector<64x128xf32>
      %c0_10 = arith.constant 0 : index
      %c0_11 = arith.constant 0 : index
      %16 = vector.load %arg4[%c0_10, %c0_11] : memref<1x128xf32, #tpu.memory_space<vmem>>, vector<1x128xf32>
      %17 = vector.broadcast %16 : vector<1x128xf32> to vector<64x128xf32>
      %18 = arith.addf %15, %17 : vector<64x128xf32>
      %cst_12 = arith.constant 0.000000e+00 : f32
      %19 = vector.broadcast %cst_12 : f32 to vector<64x128xf32>
      %20 = arith.cmpf oge, %18, %19 : vector<64x128xf32>
      %cst_13 = arith.constant 0.00999999977 : f32
      %21 = vector.broadcast %cst_13 : f32 to vector<64x128xf32>
      %22 = arith.mulf %21, %18 : vector<64x128xf32>
      %23 = arith.select %20, %18, %22 : vector<64x128xi1>, vector<64x128xf32>
      %24 = arith.truncf %23 : vector<64x128xf32> to vector<64x128xbf16>
      %c0_14 = arith.constant 0 : index
      %c0_15 = arith.constant 0 : index
      %25 = vector.load %arg5[%c0_14, %c0_15] : memref<64x128xbf16, #tpu.memory_space<vmem>>, vector<64x128xbf16>
      tpu.vector_store %arg5[%c0_14, %c0_15], %24 {strides = array<i32>} : memref<64x128xbf16, #tpu.memory_space<vmem>>, vector<64x128xbf16>,
    } else {
    }
    return
  }
  func.func @transform_0(%arg0: i32, %arg1: i32) -> (i32, i32) {
    %c0_i32 = arith.constant 0 : i32
    return %arg0, %arg1 : i32, i32
  }
  func.func @transform_1(%arg0: i32, %arg1: i32) -> (i32, i32) {
    %c0_i32 = arith.constant 0 : i32
    %c0_i32_0 = arith.constant 0 : i32
    return %arg1, %c0_i32 : i32, i32
  }
  func.func @transform_2(%arg0: i32, %arg1: i32) -> (i32, i32) {
    %c0_i32 = arith.constant 0 : i32
    %c0_i32_0 = arith.constant 0 : i32
    %c0_i32_1 = arith.constant 0 : i32
    return %c0_i32, %c0_i32_0 : i32, i32
  }
  func.func @transform_3(%arg0: i32, %arg1: i32) -> (i32, i32) {
    %c0_i32 = arith.constant 0 : i32
    %c0_i32_0 = arith.constant 0 : i32
    return %arg0, %c0_i32 : i32, i32
  }
}

module attributes {stable_mosaic.version = 11 : i64} {
  func.func @_mm_kernel(%arg0: i32, %arg1: i32, %arg2: memref<8x512xbf16, #tpu.memory_space<vmem>>, %arg3: memref<512x128xbf16, #tpu.memory_space<vmem>>, %arg4: memref<1x128xf32, #tpu.memory_space<vmem>>, %arg5: memref<8x128xf32, #tpu.memory_space<vmem>>) attributes {dimension_semantics = [#tpu.dimension_semantics<parallel>, #tpu.dimension_semantics<arbitrary>], iteration_bounds = array<i64: 1, 1>, scalar_prefetch = 0 : i64, scratch_operands = 0 : i64, tpu.core_type = #tpu.core_type<tc>, window_params = [{transform_indices = @transform_0, window_bounds = array<i64: 8, 512>}, {transform_indices = @transform_1, window_bounds = array<i64: 512, 128>}, {pipeline_mode = #tpu.pipeline_mode<synchronous>, transform_indices = @transform_2, window_bounds = array<i64: 1, 128>}, {transform_indices = @transform_3, window_bounds = array<i64: 8, 128>}]} {
    %c0 = arith.constant 0 : index
    %c0_0 = arith.constant 0 : index
    %0 = vector.load %arg2[%c0, %c0_0] : memref<8x512xbf16, #tpu.memory_space<vmem>>, vector<8x512xbf16>
    %c0_1 = arith.constant 0 : index
    %c0_2 = arith.constant 0 : index
    %1 = vector.load %arg3[%c0_1, %c0_2] : memref<512x128xbf16, #tpu.memory_space<vmem>>, vector<512x128xbf16>
    %cst = arith.constant dense<0.000000e+00> : vector<8x128xf32>
    %2 = tpu.matmul %0, %1, %cst {dimension_numbers = #tpu.dot_dimension_numbers<[1], [0], [0], [1], [0, 0, 1, 1], [], []>} : vector<8x512xbf16>, vector<512x128xbf16>, vector<8x128xf32> -> vector<8x128xf32>
    %c0_3 = arith.constant 0 : index
    %c0_4 = arith.constant 0 : index
    %3 = vector.load %arg4[%c0_3, %c0_4] : memref<1x128xf32, #tpu.memory_space<vmem>>, vector<1x128xf32>
    %4 = vector.broadcast %3 : vector<1x128xf32> to vector<8x128xf32>
    %5 = arith.addf %2, %4 : vector<8x128xf32>
    %cst_5 = arith.constant 0.000000e+00 : f32
    %6 = vector.broadcast %cst_5 : f32 to vector<8x128xf32>
    %7 = arith.cmpf oge, %5, %6 : vector<8x128xf32>
    %cst_6 = arith.constant 0.00999999977 : f32
    %8 = vector.broadcast %cst_6 : f32 to vector<8x128xf32>
    %9 = arith.mulf %8, %5 : vector<8x128xf32>
    %10 = arith.select %7, %5, %9 : vector<8x128xi1>, vector<8x128xf32>
    %c0_7 = arith.constant 0 : index
    %c0_8 = arith.constant 0 : index
    %11 = vector.load %arg5[%c0_7, %c0_8] : memref<8x128xf32, #tpu.memory_space<vmem>>, vector<8x128xf32>
    tpu.vector_store %arg5[%c0_7, %c0_8], %10 {strides = array<i32>} : memref<8x128xf32, #tpu.memory_space<vmem>>, vector<8x128xf32>,
    return
  }
  func.func @transform_0(%arg0: i32, %arg1: i32) -> (i32, i32) {
    %c0_i32 = arith.constant 0 : i32
    return %arg0, %arg1 : i32, i32
  }
  func.func @transform_1(%arg0: i32, %arg1: i32) -> (i32, i32) {
    %c0_i32 = arith.constant 0 : i32
    %c0_i32_0 = arith.constant 0 : i32
    return %arg1, %c0_i32 : i32, i32
  }
  func.func @transform_2(%arg0: i32, %arg1: i32) -> (i32, i32) {
    %c0_i32 = arith.constant 0 : i32
    %c0_i32_0 = arith.constant 0 : i32
    %c0_i32_1 = arith.constant 0 : i32
    return %c0_i32, %c0_i32_0 : i32, i32
  }
  func.func @transform_3(%arg0: i32, %arg1: i32) -> (i32, i32) {
    %c0_i32 = arith.constant 0 : i32
    %c0_i32_0 = arith.constant 0 : i32
    return %arg0, %c0_i32 : i32, i32
  }
}

module attributes {stable_mosaic.version = 11 : i64} {
  func.func @_emb_cluster_kernel(%arg0: memref<8x128xf32, #tpu.memory_space<vmem>>, %arg1: memref<128x128xbf16, #tpu.memory_space<vmem>>, %arg2: memref<1x128xf32, #tpu.memory_space<vmem>>, %arg3: memref<128x128xf32, #tpu.memory_space<vmem>>, %arg4: memref<1x128xf32, #tpu.memory_space<vmem>>, %arg5: memref<8x128xf32, #tpu.memory_space<vmem>>, %arg6: memref<8x128xf32, #tpu.memory_space<vmem>>) attributes {dimension_semantics = [], scalar_prefetch = 0 : i64, scratch_operands = 0 : i64, tpu.core_type = #tpu.core_type<tc>} {
    %c0 = arith.constant 0 : index
    %c0_0 = arith.constant 0 : index
    %0 = vector.load %arg0[%c0, %c0_0] : memref<8x128xf32, #tpu.memory_space<vmem>>, vector<8x128xf32>
    %1 = arith.truncf %0 : vector<8x128xf32> to vector<8x128xbf16>
    %c0_1 = arith.constant 0 : index
    %c0_2 = arith.constant 0 : index
    %2 = vector.load %arg1[%c0_1, %c0_2] : memref<128x128xbf16, #tpu.memory_space<vmem>>, vector<128x128xbf16>
    %cst = arith.constant dense<0.000000e+00> : vector<8x128xf32>
    %3 = tpu.matmul %1, %2, %cst {dimension_numbers = #tpu.dot_dimension_numbers<[1], [0], [0], [1], [0, 0, 1, 1], [], []>} : vector<8x128xbf16>, vector<128x128xbf16>, vector<8x128xf32> -> vector<8x128xf32>
    %c0_3 = arith.constant 0 : index
    %c0_4 = arith.constant 0 : index
    %4 = vector.load %arg2[%c0_3, %c0_4] : memref<1x128xf32, #tpu.memory_space<vmem>>, vector<1x128xf32>
    %5 = vector.broadcast %4 : vector<1x128xf32> to vector<8x128xf32>
    %6 = arith.addf %3, %5 : vector<8x128xf32>
    %c0_5 = arith.constant 0 : index
    %c0_6 = arith.constant 0 : index
    %7 = vector.load %arg5[%c0_5, %c0_6] : memref<8x128xf32, #tpu.memory_space<vmem>>, vector<8x128xf32>
    tpu.vector_store %arg5[%c0_5, %c0_6], %6 {strides = array<i32>} : memref<8x128xf32, #tpu.memory_space<vmem>>, vector<8x128xf32>,
    %c0_7 = arith.constant 0 : index
    %c0_8 = arith.constant 0 : index
    %8 = vector.load %arg3[%c0_7, %c0_8] : memref<128x128xf32, #tpu.memory_space<vmem>>, vector<128x128xf32>
    %cst_9 = arith.constant dense<0.000000e+00> : vector<8x128xf32>
    %9 = tpu.matmul %6, %8, %cst_9 {dimension_numbers = #tpu.dot_dimension_numbers<[1], [0], [0], [1], [0, 0, 1, 1], [], []>} : vector<8x128xf32>, vector<128x128xf32>, vector<8x128xf32> -> vector<8x128xf32>
    %10 = arith.mulf %6, %6 : vector<8x128xf32>
    %cst_10 = arith.constant dense<0.000000e+00> : vector<8xf32>
    %11 = vector.multi_reduction <add>, %10, %cst_10 [1] : vector<8x128xf32> to vector<8xf32>
    %12 = vector.shape_cast %11 : vector<8xf32> to vector<8x1xf32>
    %cst_11 = arith.constant 2.000000e+00 : f32
    %13 = vector.broadcast %cst_11 : f32 to vector<8x128xf32>
    %14 = arith.mulf %13, %9 : vector<8x128xf32>
    %15 = vector.broadcast %12 : vector<8x1xf32> to vector<8x128xf32>
    %16 = arith.subf %15, %14 : vector<8x128xf32>
    %c0_12 = arith.constant 0 : index
    %c0_13 = arith.constant 0 : index
    %17 = vector.load %arg4[%c0_12, %c0_13] : memref<1x128xf32, #tpu.memory_space<vmem>>, vector<1x128xf32>
    %18 = vector.broadcast %17 : vector<1x128xf32> to vector<8x128xf32>
    %19 = arith.addf %16, %18 : vector<8x128xf32>
    %cst_14 = arith.constant 0.000000e+00 : f32
    %20 = vector.broadcast %cst_14 : f32 to vector<8x128xf32>
    %21 = arith.maximumf %19, %20 : vector<8x128xf32>
    %cst_15 = arith.constant 1.000000e+00 : f32
    %22 = vector.broadcast %cst_15 : f32 to vector<8x128xf32>
    %23 = arith.divf %21, %22 : vector<8x128xf32>
    %cst_16 = arith.constant 1.000000e+00 : f32
    %24 = vector.broadcast %cst_16 : f32 to vector<8x128xf32>
    %25 = arith.addf %24, %23 : vector<8x128xf32>
    %26 = tpu.reciprocal %25 {approx = true} : vector<8x128xf32> -> vector<8x128xf32>
    %cst_17 = arith.constant dense<0.000000e+00> : vector<8xf32>
    %27 = vector.multi_reduction <add>, %26, %cst_17 [1] : vector<8x128xf32> to vector<8xf32>
    %28 = vector.shape_cast %27 : vector<8xf32> to vector<8x1xf32>
    %29 = vector.broadcast %28 : vector<8x1xf32> to vector<8x128xf32>
    %30 = arith.divf %26, %29 : vector<8x128xf32>
    %c0_18 = arith.constant 0 : index
    %c0_19 = arith.constant 0 : index
    %31 = vector.load %arg6[%c0_18, %c0_19] : memref<8x128xf32, #tpu.memory_space<vmem>>, vector<8x128xf32>
    tpu.vector_store %arg6[%c0_18, %c0_19], %30 {strides = array<i32>} : memref<8x128xf32, #tpu.memory_space<vmem>>, vector<8x128xf32>,
    return
  }
}

module attributes {stable_mosaic.version = 11 : i64} {
  func.func @_mm_kernel(%arg0: i32, %arg1: i32, %arg2: memref<8x128xf32, #tpu.memory_space<vmem>>, %arg3: memref<128x128xbf16, #tpu.memory_space<vmem>>, %arg4: memref<1x128xf32, #tpu.memory_space<vmem>>, %arg5: memref<8x128xbf16, #tpu.memory_space<vmem>>) attributes {dimension_semantics = [#tpu.dimension_semantics<parallel>, #tpu.dimension_semantics<arbitrary>], iteration_bounds = array<i64: 1, 1>, scalar_prefetch = 0 : i64, scratch_operands = 0 : i64, tpu.core_type = #tpu.core_type<tc>, window_params = [{transform_indices = @transform_0, window_bounds = array<i64: 8, 128>}, {transform_indices = @transform_1, window_bounds = array<i64: 128, 128>}, {pipeline_mode = #tpu.pipeline_mode<synchronous>, transform_indices = @transform_2, window_bounds = array<i64: 1, 128>}, {transform_indices = @transform_3, window_bounds = array<i64: 8, 128>}]} {
    %c0 = arith.constant 0 : index
    %c0_0 = arith.constant 0 : index
    %0 = vector.load %arg2[%c0, %c0_0] : memref<8x128xf32, #tpu.memory_space<vmem>>, vector<8x128xf32>
    %1 = arith.truncf %0 : vector<8x128xf32> to vector<8x128xbf16>
    %c0_1 = arith.constant 0 : index
    %c0_2 = arith.constant 0 : index
    %2 = vector.load %arg3[%c0_1, %c0_2] : memref<128x128xbf16, #tpu.memory_space<vmem>>, vector<128x128xbf16>
    %cst = arith.constant dense<0.000000e+00> : vector<8x128xf32>
    %3 = tpu.matmul %1, %2, %cst {dimension_numbers = #tpu.dot_dimension_numbers<[1], [0], [0], [1], [0, 0, 1, 1], [], []>} : vector<8x128xbf16>, vector<128x128xbf16>, vector<8x128xf32> -> vector<8x128xf32>
    %c0_3 = arith.constant 0 : index
    %c0_4 = arith.constant 0 : index
    %4 = vector.load %arg4[%c0_3, %c0_4] : memref<1x128xf32, #tpu.memory_space<vmem>>, vector<1x128xf32>
    %5 = vector.broadcast %4 : vector<1x128xf32> to vector<8x128xf32>
    %6 = arith.addf %3, %5 : vector<8x128xf32>
    %cst_5 = arith.constant 0.000000e+00 : f32
    %7 = vector.broadcast %cst_5 : f32 to vector<8x128xf32>
    %8 = arith.cmpf oge, %6, %7 : vector<8x128xf32>
    %cst_6 = arith.constant 0.00999999977 : f32
    %9 = vector.broadcast %cst_6 : f32 to vector<8x128xf32>
    %10 = arith.mulf %9, %6 : vector<8x128xf32>
    %11 = arith.select %8, %6, %10 : vector<8x128xi1>, vector<8x128xf32>
    %12 = arith.truncf %11 : vector<8x128xf32> to vector<8x128xbf16>
    %c0_7 = arith.constant 0 : index
    %c0_8 = arith.constant 0 : index
    %13 = vector.load %arg5[%c0_7, %c0_8] : memref<8x128xbf16, #tpu.memory_space<vmem>>, vector<8x128xbf16>
    tpu.vector_store %arg5[%c0_7, %c0_8], %12 {strides = array<i32>} : memref<8x128xbf16, #tpu.memory_space<vmem>>, vector<8x128xbf16>,
    return
  }
  func.func @transform_0(%arg0: i32, %arg1: i32) -> (i32, i32) {
    %c0_i32 = arith.constant 0 : i32
    return %arg0, %arg1 : i32, i32
  }
  func.func @transform_1(%arg0: i32, %arg1: i32) -> (i32, i32) {
    %c0_i32 = arith.constant 0 : i32
    %c0_i32_0 = arith.constant 0 : i32
    return %arg1, %c0_i32 : i32, i32
  }
  func.func @transform_2(%arg0: i32, %arg1: i32) -> (i32, i32) {
    %c0_i32 = arith.constant 0 : i32
    %c0_i32_0 = arith.constant 0 : i32
    %c0_i32_1 = arith.constant 0 : i32
    return %c0_i32, %c0_i32_0 : i32, i32
  }
  func.func @transform_3(%arg0: i32, %arg1: i32) -> (i32, i32) {
    %c0_i32 = arith.constant 0 : i32
    %c0_i32_0 = arith.constant 0 : i32
    return %arg0, %c0_i32 : i32, i32
  }
}

module attributes {stable_mosaic.version = 11 : i64} {
  func.func @_mm_kernel(%arg0: i32, %arg1: i32, %arg2: memref<16x256xbf16, #tpu.memory_space<vmem>>, %arg3: memref<256x128xbf16, #tpu.memory_space<vmem>>, %arg4: memref<1x128xf32, #tpu.memory_space<vmem>>, %arg5: memref<16x128xbf16, #tpu.memory_space<vmem>>) attributes {dimension_semantics = [#tpu.dimension_semantics<parallel>, #tpu.dimension_semantics<arbitrary>], iteration_bounds = array<i64: 1, 1>, scalar_prefetch = 0 : i64, scratch_operands = 0 : i64, tpu.core_type = #tpu.core_type<tc>, window_params = [{transform_indices = @transform_0, window_bounds = array<i64: 16, 256>}, {transform_indices = @transform_1, window_bounds = array<i64: 256, 128>}, {pipeline_mode = #tpu.pipeline_mode<synchronous>, transform_indices = @transform_2, window_bounds = array<i64: 1, 128>}, {transform_indices = @transform_3, window_bounds = array<i64: 16, 128>}]} {
    %c0 = arith.constant 0 : index
    %c0_0 = arith.constant 0 : index
    %0 = vector.load %arg2[%c0, %c0_0] : memref<16x256xbf16, #tpu.memory_space<vmem>>, vector<16x256xbf16>
    %c0_1 = arith.constant 0 : index
    %c0_2 = arith.constant 0 : index
    %1 = vector.load %arg3[%c0_1, %c0_2] : memref<256x128xbf16, #tpu.memory_space<vmem>>, vector<256x128xbf16>
    %cst = arith.constant dense<0.000000e+00> : vector<16x128xf32>
    %2 = tpu.matmul %0, %1, %cst {dimension_numbers = #tpu.dot_dimension_numbers<[1], [0], [0], [1], [0, 0, 1, 1], [], []>} : vector<16x256xbf16>, vector<256x128xbf16>, vector<16x128xf32> -> vector<16x128xf32>
    %c0_3 = arith.constant 0 : index
    %c0_4 = arith.constant 0 : index
    %3 = vector.load %arg4[%c0_3, %c0_4] : memref<1x128xf32, #tpu.memory_space<vmem>>, vector<1x128xf32>
    %4 = vector.broadcast %3 : vector<1x128xf32> to vector<16x128xf32>
    %5 = arith.addf %2, %4 : vector<16x128xf32>
    %cst_5 = arith.constant 0.000000e+00 : f32
    %6 = vector.broadcast %cst_5 : f32 to vector<16x128xf32>
    %7 = arith.cmpf oge, %5, %6 : vector<16x128xf32>
    %cst_6 = arith.constant 0.00999999977 : f32
    %8 = vector.broadcast %cst_6 : f32 to vector<16x128xf32>
    %9 = arith.mulf %8, %5 : vector<16x128xf32>
    %10 = arith.select %7, %5, %9 : vector<16x128xi1>, vector<16x128xf32>
    %11 = arith.truncf %10 : vector<16x128xf32> to vector<16x128xbf16>
    %c0_7 = arith.constant 0 : index
    %c0_8 = arith.constant 0 : index
    %12 = vector.load %arg5[%c0_7, %c0_8] : memref<16x128xbf16, #tpu.memory_space<vmem>>, vector<16x128xbf16>
    tpu.vector_store %arg5[%c0_7, %c0_8], %11 {strides = array<i32>} : memref<16x128xbf16, #tpu.memory_space<vmem>>, vector<16x128xbf16>,
    return
  }
  func.func @transform_0(%arg0: i32, %arg1: i32) -> (i32, i32) {
    %c0_i32 = arith.constant 0 : i32
    return %arg0, %arg1 : i32, i32
  }
  func.func @transform_1(%arg0: i32, %arg1: i32) -> (i32, i32) {
    %c0_i32 = arith.constant 0 : i32
    %c0_i32_0 = arith.constant 0 : i32
    return %arg1, %c0_i32 : i32, i32
  }
  func.func @transform_2(%arg0: i32, %arg1: i32) -> (i32, i32) {
    %c0_i32 = arith.constant 0 : i32
    %c0_i32_0 = arith.constant 0 : i32
    %c0_i32_1 = arith.constant 0 : i32
    return %c0_i32, %c0_i32_0 : i32, i32
  }
  func.func @transform_3(%arg0: i32, %arg1: i32) -> (i32, i32) {
    %c0_i32 = arith.constant 0 : i32
    %c0_i32_0 = arith.constant 0 : i32
    return %arg0, %c0_i32 : i32, i32
  }
}

module attributes {stable_mosaic.version = 11 : i64} {
  func.func @_mm_kernel(%arg0: i32, %arg1: i32, %arg2: memref<64x512xbf16, #tpu.memory_space<vmem>>, %arg3: memref<512x128xbf16, #tpu.memory_space<vmem>>, %arg4: memref<1x128xf32, #tpu.memory_space<vmem>>, %arg5: memref<64x128xbf16, #tpu.memory_space<vmem>>) attributes {dimension_semantics = [#tpu.dimension_semantics<parallel>, #tpu.dimension_semantics<arbitrary>], iteration_bounds = array<i64: 2, 1>, scalar_prefetch = 0 : i64, scratch_operands = 0 : i64, tpu.core_type = #tpu.core_type<tc>, window_params = [{transform_indices = @transform_0, window_bounds = array<i64: 64, 512>}, {transform_indices = @transform_1, window_bounds = array<i64: 512, 128>}, {pipeline_mode = #tpu.pipeline_mode<synchronous>, transform_indices = @transform_2, window_bounds = array<i64: 1, 128>}, {transform_indices = @transform_3, window_bounds = array<i64: 64, 128>}]} {
    %c0 = arith.constant 0 : index
    %c0_0 = arith.constant 0 : index
    %0 = vector.load %arg2[%c0, %c0_0] : memref<64x512xbf16, #tpu.memory_space<vmem>>, vector<64x512xbf16>
    %c0_1 = arith.constant 0 : index
    %c0_2 = arith.constant 0 : index
    %1 = vector.load %arg3[%c0_1, %c0_2] : memref<512x128xbf16, #tpu.memory_space<vmem>>, vector<512x128xbf16>
    %cst = arith.constant dense<0.000000e+00> : vector<64x128xf32>
    %2 = tpu.matmul %0, %1, %cst {dimension_numbers = #tpu.dot_dimension_numbers<[1], [0], [0], [1], [0, 0, 1, 1], [], []>} : vector<64x512xbf16>, vector<512x128xbf16>, vector<64x128xf32> -> vector<64x128xf32>
    %c0_3 = arith.constant 0 : index
    %c0_4 = arith.constant 0 : index
    %3 = vector.load %arg4[%c0_3, %c0_4] : memref<1x128xf32, #tpu.memory_space<vmem>>, vector<1x128xf32>
    %4 = vector.broadcast %3 : vector<1x128xf32> to vector<64x128xf32>
    %5 = arith.addf %2, %4 : vector<64x128xf32>
    %cst_5 = arith.constant 0.000000e+00 : f32
    %6 = vector.broadcast %cst_5 : f32 to vector<64x128xf32>
    %7 = arith.cmpf oge, %5, %6 : vector<64x128xf32>
    %cst_6 = arith.constant 0.00999999977 : f32
    %8 = vector.broadcast %cst_6 : f32 to vector<64x128xf32>
    %9 = arith.mulf %8, %5 : vector<64x128xf32>
    %10 = arith.select %7, %5, %9 : vector<64x128xi1>, vector<64x128xf32>
    %11 = arith.truncf %10 : vector<64x128xf32> to vector<64x128xbf16>
    %c0_7 = arith.constant 0 : index
    %c0_8 = arith.constant 0 : index
    %12 = vector.load %arg5[%c0_7, %c0_8] : memref<64x128xbf16, #tpu.memory_space<vmem>>, vector<64x128xbf16>
    tpu.vector_store %arg5[%c0_7, %c0_8], %11 {strides = array<i32>} : memref<64x128xbf16, #tpu.memory_space<vmem>>, vector<64x128xbf16>,
    return
  }
  func.func @transform_0(%arg0: i32, %arg1: i32) -> (i32, i32) {
    %c0_i32 = arith.constant 0 : i32
    return %arg0, %arg1 : i32, i32
  }
  func.func @transform_1(%arg0: i32, %arg1: i32) -> (i32, i32) {
    %c0_i32 = arith.constant 0 : i32
    %c0_i32_0 = arith.constant 0 : i32
    return %arg1, %c0_i32 : i32, i32
  }
  func.func @transform_2(%arg0: i32, %arg1: i32) -> (i32, i32) {
    %c0_i32 = arith.constant 0 : i32
    %c0_i32_0 = arith.constant 0 : i32
    %c0_i32_1 = arith.constant 0 : i32
    return %c0_i32, %c0_i32_0 : i32, i32
  }
  func.func @transform_3(%arg0: i32, %arg1: i32) -> (i32, i32) {
    %c0_i32 = arith.constant 0 : i32
    %c0_i32_0 = arith.constant 0 : i32
    return %arg0, %c0_i32 : i32, i32
  }
}

module attributes {stable_mosaic.version = 11 : i64} {
  func.func @_mm_kernel(%arg0: i32, %arg1: i32, %arg2: memref<512x256xbf16, #tpu.memory_space<vmem>>, %arg3: memref<256x128xbf16, #tpu.memory_space<vmem>>, %arg4: memref<1x128xf32, #tpu.memory_space<vmem>>, %arg5: memref<512x128xf32, #tpu.memory_space<vmem>>) attributes {dimension_semantics = [#tpu.dimension_semantics<parallel>, #tpu.dimension_semantics<arbitrary>], iteration_bounds = array<i64: 2, 1>, scalar_prefetch = 0 : i64, scratch_operands = 0 : i64, tpu.core_type = #tpu.core_type<tc>, window_params = [{transform_indices = @transform_0, window_bounds = array<i64: 512, 256>}, {transform_indices = @transform_1, window_bounds = array<i64: 256, 128>}, {pipeline_mode = #tpu.pipeline_mode<synchronous>, transform_indices = @transform_2, window_bounds = array<i64: 1, 128>}, {transform_indices = @transform_3, window_bounds = array<i64: 512, 128>}]} {
    %c0 = arith.constant 0 : index
    %c0_0 = arith.constant 0 : index
    %0 = vector.load %arg2[%c0, %c0_0] : memref<512x256xbf16, #tpu.memory_space<vmem>>, vector<512x256xbf16>
    %c0_1 = arith.constant 0 : index
    %c0_2 = arith.constant 0 : index
    %1 = vector.load %arg3[%c0_1, %c0_2] : memref<256x128xbf16, #tpu.memory_space<vmem>>, vector<256x128xbf16>
    %cst = arith.constant dense<0.000000e+00> : vector<512x128xf32>
    %2 = tpu.matmul %0, %1, %cst {dimension_numbers = #tpu.dot_dimension_numbers<[1], [0], [0], [1], [0, 0, 1, 1], [], []>} : vector<512x256xbf16>, vector<256x128xbf16>, vector<512x128xf32> -> vector<512x128xf32>
    %c0_3 = arith.constant 0 : index
    %c0_4 = arith.constant 0 : index
    %3 = vector.load %arg4[%c0_3, %c0_4] : memref<1x128xf32, #tpu.memory_space<vmem>>, vector<1x128xf32>
    %4 = vector.broadcast %3 : vector<1x128xf32> to vector<512x128xf32>
    %5 = arith.addf %2, %4 : vector<512x128xf32>
    %c0_5 = arith.constant 0 : index
    %c0_6 = arith.constant 0 : index
    %6 = vector.load %arg5[%c0_5, %c0_6] : memref<512x128xf32, #tpu.memory_space<vmem>>, vector<512x128xf32>
    tpu.vector_store %arg5[%c0_5, %c0_6], %5 {strides = array<i32>} : memref<512x128xf32, #tpu.memory_space<vmem>>, vector<512x128xf32>,
    return
  }
  func.func @transform_0(%arg0: i32, %arg1: i32) -> (i32, i32) {
    %c0_i32 = arith.constant 0 : i32
    return %arg0, %arg1 : i32, i32
  }
  func.func @transform_1(%arg0: i32, %arg1: i32) -> (i32, i32) {
    %c0_i32 = arith.constant 0 : i32
    %c0_i32_0 = arith.constant 0 : i32
    return %arg1, %c0_i32 : i32, i32
  }
  func.func @transform_2(%arg0: i32, %arg1: i32) -> (i32, i32) {
    %c0_i32 = arith.constant 0 : i32
    %c0_i32_0 = arith.constant 0 : i32
    %c0_i32_1 = arith.constant 0 : i32
    return %c0_i32, %c0_i32_0 : i32, i32
  }
  func.func @transform_3(%arg0: i32, %arg1: i32) -> (i32, i32) {
    %c0_i32 = arith.constant 0 : i32
    %c0_i32_0 = arith.constant 0 : i32
    return %arg0, %c0_i32 : i32, i32
  }
}

</mosaic_0001>

<bundles_post_ra>
// kernel: _lambda_.8
= control target key start
LH: loop header
LB: loop body
LE: loop exit
PB: predicated region body
PF: predicated region fallthrough
CT: control target
= control target key end

     0   :  { %s1611_s12 = smov 0   ;;  %s1613_s13 = smov 0   ;;  %s1815_s0 = inlined_call_operand.vmem [shape: bf16[1024,128], index: 0, kind: input, shape index: {}]   ;;  %s1816_s1 = inlined_call_operand.vmem [shape: bf16[128,128], index: 1, kind: input, shape index: {}]   ;;  %s1817_s2 = inlined_call_operand.vmem [shape: f32[1,128], index: 2, kind: input, shape index: {}]   ;;  %s1818_s3 = inlined_call_operand.vmem [shape: bf16[1024,128], index: 3, kind: output, shape index: {}]  }
   0x1   :  { %s1615_s14 = smov 0  }
   0x2 LB: > { %s25_s15 = sadd.s32 1, %s1585_s13  ;;  %p1120_p0 = scmp.ge.s32.totalorder %s1589_s14, 1  ;;  %s1589_s14 = sphi %s1615_s14, %s13_s14   ;;  %s1585_s13 = sphi %s1613_s13, %s1820_s13   ;;  %s1581_s12 = sphi %s1611_s12, %s1819_s12  }
   0x3   : > { %p27_p1 = scmp.ge.s32.totalorder %s25_s15, 2  ;;  %p166_p2 = scmp.lt.s32.totalorder %s1589_s14, 3 }
   0x5   : > { %s1822_s15 = smov (%p27_p1, %s25_s15), 0  ;;  %p167_p3 = pnand %p1120_p0, %p166_p2 }
   0x6   : > { %s1121_s24 = sshll.u32 (!%p167_p3), %s1581_s12, 6 }
   0x7   : > { %170 = sbr.rel (%p167_p3) target bundleno = 306 (0x132), region = 32  ;;  %p199_p4 = scmp.lt.s32.totalorder (!%p167_p3), %s1121_s24, 127 }
   0xc   : > { %v1326_v0 = vld [vmem:[%s1816_s1 + $0x38] sm:$0xff]  ;;  %v1325_v1 = vld [vmem:[%s1816_s1 + $0x30] sm:$0xff]  ;;  %v1324_v2 = vld [vmem:[%s1816_s1 + $0x28] sm:$0xff]  ;;  %s1824_s24 = smov (!%p199_p4, %s1121_s24), 127 }
   0xd   : > { %543 = vmatpush.bf16.msra.mxu0 %v1326_v0  ;;  %1518 = vmatpush.bf16.msra.mxu1 %v1326_v0  ;;  %v1323_v3 = vld [vmem:[%s1816_s1 + $0x20] sm:$0xff]  ;;  %v1322_v4 = vld [vmem:[%s1816_s1 + $0x18] sm:$0xff]  ;;  %v1321_v5 = vld [vmem:[%s1816_s1 + $0x10] sm:$0xff]  ;;  %s1122_s4 = sshll.u32 %s1824_s24, 2 }
   0xe   : > { %1519 = vmatpush.bf16.msra.mxu2 %v1326_v0  ;;  %1520 = vmatpush.bf16.msra.mxu3 %v1326_v0  ;;  %v1320_v6 = vld [vmem:[%s1816_s1 + $0x8] sm:$0xff]  ;;  %v1319_v7 = vld [vmem:[%s1816_s1] sm:$0xff]  ;;  %s1664_s9 = scalar_lea.vmem %s1815_s0, %s1122_s4  ;;  %s1714_s17 = scalar_lea.vmem %s1818_s3, %s1122_s4 }
   0xf   : > { %v1287_v8 = vld [vmem:[%s1664_s9] sm:$0xff]  ;;  %v1288_v12 = vld [vmem:[%s1664_s9 + $0x8] sm:$0xff]  ;;  %v1289_v16 = vld [vmem:[%s1664_s9 + $0x10] sm:$0xff] }
  0x10   : > { %v1295_v9 = vld [vmem:[%s1664_s9 + $0x40] sm:$0xff]  ;;  %v1296_v13 = vld [vmem:[%s1664_s9 + $0x48] sm:$0xff]  ;;  %v1297_v17 = vld [vmem:[%s1664_s9 + $0x50] sm:$0xff] }
  0x11   : > { %544 = vmatpush.bf16.msra.mxu0 %v1325_v1  ;;  %1521 = vmatpush.bf16.msra.mxu1 %v1325_v1  ;;  %v1303_v10 = vld [vmem:[%s1664_s9 + $0x80] sm:$0xff]  ;;  %v1304_v14 = vld [vmem:[%s1664_s9 + $0x88] sm:$0xff]  ;;  %v1305_v18 = vld [vmem:[%s1664_s9 + $0x90] sm:$0xff] }
  0x12   : > { %1522 = vmatpush.bf16.msra.mxu2 %v1325_v1  ;;  %1523 = vmatpush.bf16.msra.mxu3 %v1325_v1  ;;  %v1311_v11 = vld [vmem:[%s1664_s9 + $0xc0] sm:$0xff]  ;;  %v1312_v15 = vld [vmem:[%s1664_s9 + $0xc8] sm:$0xff]  ;;  %v1313_v19 = vld [vmem:[%s1664_s9 + $0xd0] sm:$0xff] }
  0x13   : > { %v1290_v20 = vld [vmem:[%s1664_s9 + $0x18] sm:$0xff]  ;;  %v1291_v24 = vld [vmem:[%s1664_s9 + $0x20] sm:$0xff]  ;;  %v1292_v28 = vld [vmem:[%s1664_s9 + $0x28] sm:$0xff] }
  0x14   : > { %v1298_v21 = vld [vmem:[%s1664_s9 + $0x58] sm:$0xff]  ;;  %v1299_v25 = vld [vmem:[%s1664_s9 + $0x60] sm:$0xff]  ;;  %v1300_v29 = vld [vmem:[%s1664_s9 + $0x68] sm:$0xff] }
  0x15   : > { %545 = vmatpush.bf16.msra.mxu0 %v1324_v2  ;;  %1524 = vmatpush.bf16.msra.mxu1 %v1324_v2  ;;  %v1306_v22 = vld [vmem:[%s1664_s9 + $0x98] sm:$0xff]  ;;  %v1307_v26 = vld [vmem:[%s1664_s9 + $0xa0] sm:$0xff]  ;;  %v1308_v30 = vld [vmem:[%s1664_s9 + $0xa8] sm:$0xff] }
  0x16   : > { %1525 = vmatpush.bf16.msra.mxu2 %v1324_v2  ;;  %1526 = vmatpush.bf16.msra.mxu3 %v1324_v2  ;;  %v1314_v23 = vld [vmem:[%s1664_s9 + $0xd8] sm:$0xff]  ;;  %v1315_v27 = vld [vmem:[%s1664_s9 + $0xe0] sm:$0xff]  ;;  %v1316_v31 = vld [vmem:[%s1664_s9 + $0xe8] sm:$0xff] }
  0x17   : > { %v1293_v32 = vld [vmem:[%s1664_s9 + $0x30] sm:$0xff]  ;;  %v1294_v36 = vld [vmem:[%s1664_s9 + $0x38] sm:$0xff]  ;;  %v1701_v42 = vld [vmem:[%s1817_s2] ss:$0 sm:$0xff] }
  0x18   : > { %v1301_v33 = vld [vmem:[%s1664_s9 + $0x70] sm:$0xff]  ;;  %v1302_v37 = vld [vmem:[%s1664_s9 + $0x78] sm:$0xff] }
  0x19   : > { %546 = vmatpush.bf16.msra.mxu0 %v1323_v3  ;;  %1527 = vmatpush.bf16.msra.mxu1 %v1323_v3  ;;  %v1309_v34 = vld [vmem:[%s1664_s9 + $0xb0] sm:$0xff]  ;;  %v1310_v38 = vld [vmem:[%s1664_s9 + $0xb8] sm:$0xff] }
  0x1a   : > { %1528 = vmatpush.bf16.msra.mxu2 %v1323_v3  ;;  %1529 = vmatpush.bf16.msra.mxu3 %v1323_v3  ;;  %v1317_v35 = vld [vmem:[%s1664_s9 + $0xf0] sm:$0xff]  ;;  %v1318_v39 = vld [vmem:[%s1664_s9 + $0xf8] sm:$0xff] }
  0x1d   : > { %547 = vmatpush.bf16.msra.mxu0 %v1322_v4  ;;  %1530 = vmatpush.bf16.msra.mxu1 %v1322_v4 }
  0x1e   : > { %1531 = vmatpush.bf16.msra.mxu2 %v1322_v4  ;;  %1532 = vmatpush.bf16.msra.mxu3 %v1322_v4 }
  0x21   : > { %548 = vmatpush.bf16.msra.mxu0 %v1321_v5  ;;  %1533 = vmatpush.bf16.msra.mxu1 %v1321_v5 }
  0x22   : > { %1534 = vmatpush.bf16.msra.mxu2 %v1321_v5  ;;  %1535 = vmatpush.bf16.msra.mxu3 %v1321_v5 }
  0x25   : > { %549 = vmatpush.bf16.msra.mxu0 %v1320_v6  ;;  %1536 = vmatpush.bf16.msra.mxu1 %v1320_v6 }
  0x26   : > { %1537 = vmatpush.bf16.msra.mxu2 %v1320_v6  ;;  %1538 = vmatpush.bf16.msra.mxu3 %v1320_v6 }
  0x29   : > { %550 = vmatpush.bf16.msra.mxu0 %v1319_v7  ;;  %1539 = vmatpush.bf16.msra.mxu1 %v1319_v7 }
  0x2a   : > { %1540 = vmatpush.bf16.msra.mxu2 %v1319_v7  ;;  %1541 = vmatpush.bf16.msra.mxu3 %v1319_v7 }
  0x2c   : > { %551 = vmatmul.bf16.vlgmr.msra.gmra.mxu0 %v1287_v8  ;;  %591 = vmatmul.bf16.vlgmr.msra.gmra.mxu1 %v1295_v9 }
  0x2d   : > { %631 = vmatmul.bf16.vlgmr.msra.gmra.mxu2 %v1303_v10  ;;  %671 = vmatmul.bf16.vlgmr.msra.gmra.mxu3 %v1311_v11 }
  0x3c   : > { %556 = vmatmul.bf16.gmra.mxu0 %v1288_v12  ;;  %596 = vmatmul.bf16.gmra.mxu1 %v1296_v13 }
  0x3d   : > { %636 = vmatmul.bf16.gmra.mxu2 %v1304_v14  ;;  %676 = vmatmul.bf16.gmra.mxu3 %v1312_v15 }
  0x4c   : > { %561 = vmatmul.bf16.gmra.mxu0 %v1289_v16  ;;  %601 = vmatmul.bf16.gmra.mxu1 %v1297_v17 }
  0x4d   : > { %641 = vmatmul.bf16.gmra.mxu2 %v1305_v18  ;;  %681 = vmatmul.bf16.gmra.mxu3 %v1313_v19 }
  0x5c   : > { %566 = vmatmul.bf16.gmra.mxu0 %v1290_v20  ;;  %606 = vmatmul.bf16.gmra.mxu1 %v1298_v21 }
  0x5d   : > { %646 = vmatmul.bf16.gmra.mxu2 %v1306_v22  ;;  %686 = vmatmul.bf16.gmra.mxu3 %v1314_v23 }
  0x6c   : > { %571 = vmatmul.bf16.gmra.mxu0 %v1291_v24  ;;  %611 = vmatmul.bf16.gmra.mxu1 %v1299_v25 }
  0x6d   : > { %651 = vmatmul.bf16.gmra.mxu2 %v1307_v26  ;;  %691 = vmatmul.bf16.gmra.mxu3 %v1315_v27 }
  0x7c   : > { %576 = vmatmul.bf16.gmra.mxu0 %v1292_v28  ;;  %616 = vmatmul.bf16.gmra.mxu1 %v1300_v29 }
  0x7d   : > { %656 = vmatmul.bf16.gmra.mxu2 %v1308_v30  ;;  %696 = vmatmul.bf16.gmra.mxu3 %v1316_v31 }
  0x8c   : > { %581 = vmatmul.bf16.gmra.mxu0 %v1293_v32  ;;  %621 = vmatmul.bf16.gmra.mxu1 %v1301_v33 }
  0x8d   : > { %661 = vmatmul.bf16.gmra.mxu2 %v1309_v34  ;;  %701 = vmatmul.bf16.gmra.mxu3 %v1317_v35 }
  0x9c   : > { %586 = vmatmul.bf16.gmra.mxu0 %v1294_v36  ;;  %626 = vmatmul.bf16.gmra.mxu1 %v1302_v37 }
  0x9d   : > { %666 = vmatmul.bf16.gmra.mxu2 %v1310_v38  ;;  %706 = vmatmul.bf16.gmra.mxu3 %v1318_v39 }
  0xa9   : > { %v552_v40 = vpop.f32.mrf.mxu0  ;;  %v592_v41 = vpop.f32.mrf.mxu1 }
  0xaa   : > { %v553_v43 = vadd.f32 %v1701_v42, %v552_v40  ;;  %v593_v44 = vadd.f32 %v1701_v42, %v592_v41 }
  0xac   : > { %v776_v49 = vmul.f32 0.01, %v553_v43  ;;  %v792_v50 = vmul.f32 0.01, %v593_v44  ;;  %vm712_vm0 = vcmp.ge.f32.partialorder %v553_v43, 0.0  ;;  %vm728_vm1 = vcmp.ge.f32.partialorder %v593_v44, 0.0 }
  0xae   : > { %v840_v57 = vsel %vm712_vm0, %v553_v43, %v776_v49  ;;  %v856_v58 = vsel %vm728_vm1, %v593_v44, %v792_v50 }
  0xb0   : > { %v632_v45 = vpop.f32.mrf.mxu2  ;;  %v672_v46 = vpop.f32.mrf.mxu3 }
  0xb1   : > { %v554_v47 = vpop.f32.mrf.mxu0  ;;  %v594_v48 = vpop.f32.mrf.mxu1  ;;  %v633_v55 = vadd.f32 %v1701_v42, %v632_v45  ;;  %v673_v56 = vadd.f32 %v1701_v42, %v672_v46 }
  0xb2   : > { %v555_v51 = vadd.f32 %v1701_v42, %v554_v47  ;;  %v595_v52 = vadd.f32 %v1701_v42, %v594_v48 }
  0xb3   : > { %v808_v1 = vmul.f32 0.01, %v633_v55  ;;  %v824_v2 = vmul.f32 0.01, %v673_v56  ;;  %vm744_vm4 = vcmp.ge.f32.partialorder %v633_v55, 0.0  ;;  %vm760_vm5 = vcmp.ge.f32.partialorder %v673_v56, 0.0 }
  0xb4   : > { %vm713_vm2 = vcmp.ge.f32.partialorder %v555_v51, 0.0  ;;  %v777_v53 = vmul.f32 0.01, %v555_v51  ;;  %vm729_vm3 = vcmp.ge.f32.partialorder %v595_v52, 0.0  ;;  %v793_v54 = vmul.f32 0.01, %v595_v52 }
  0xb5   : > { %v872_v9 = vsel %vm744_vm4, %v633_v55, %v808_v1  ;;  %v888_v10 = vsel %vm760_vm5, %v673_v56, %v824_v2 }
  0xb6   : > { %v841_v59 = vsel %vm713_vm2, %v555_v51, %v777_v53  ;;  %v857_v60 = vsel %vm729_vm3, %v595_v52, %v793_v54 }
  0xb7   : > { %v1330_v61 = vpack.c.bf16 %v841_v59, %v840_v57  ;;  %v1370_v62 = vpack.c.bf16 %v857_v60, %v856_v58 }
  0xb8   : > { %v634_v63 = vpop.f32.mrf.mxu2  ;;  %v674_v0 = vpop.f32.mrf.mxu3 }
  0xb9   : > { %1331 = vst [vmem:[%s1714_s17] sm:$0xff] %v1330_v61   ;;  %v635_v3 = vadd.f32 %v1701_v42, %v634_v63  ;;  %v675_v4 = vadd.f32 %v1701_v42, %v674_v0  ;;  %v557_v5 = vpop.f32.mrf.mxu0  ;;  %v597_v6 = vpop.f32.mrf.mxu1 }
  0xba   : > { %1494 = vst [vmem:[%s1714_s17 + $0x40] sm:$0xff] %v1370_v62   ;;  %v558_v15 = vadd.f32 %v1701_v42, %v557_v5  ;;  %v598_v16 = vadd.f32 %v1701_v42, %v597_v6 }
  0xbb   : > { %vm745_vm6 = vcmp.ge.f32.partialorder %v635_v3, 0.0  ;;  %v809_v7 = vmul.f32 0.01, %v635_v3  ;;  %vm761_vm7 = vcmp.ge.f32.partialorder %v675_v4, 0.0  ;;  %v825_v8 = vmul.f32 0.01, %v675_v4 }
  0xbc   : > { %v778_v21 = vmul.f32 0.01, %v558_v15  ;;  %v794_v22 = vmul.f32 0.01, %v598_v16  ;;  %vm714_vm8 = vcmp.ge.f32.partialorder %v558_v15, 0.0  ;;  %vm730_vm9 = vcmp.ge.f32.partialorder %v598_v16, 0.0 }
  0xbd   : > { %v873_v11 = vsel %vm745_vm6, %v635_v3, %v809_v7  ;;  %v889_v12 = vsel %vm761_vm7, %v675_v4, %v825_v8 }
  0xbe   : > { %v1410_v13 = vpack.c.bf16 %v873_v11, %v872_v9  ;;  %v1450_v14 = vpack.c.bf16 %v889_v12, %v888_v10  ;;  %v842_v29 = vsel %vm714_vm8, %v558_v15, %v778_v21  ;;  %v858_v30 = vsel %vm730_vm9, %v598_v16, %v794_v22 }
  0xc0   : > { %1502 = vst [vmem:[%s1714_s17 + $0x80] sm:$0xff] %v1410_v13   ;;  %v637_v17 = vpop.f32.mrf.mxu2  ;;  %v677_v18 = vpop.f32.mrf.mxu3 }
  0xc1   : > { %1510 = vst [vmem:[%s1714_s17 + $0xc0] sm:$0xff] %v1450_v14   ;;  %v559_v19 = vpop.f32.mrf.mxu0  ;;  %v599_v20 = vpop.f32.mrf.mxu1  ;;  %v638_v27 = vadd.f32 %v1701_v42, %v637_v17  ;;  %v678_v28 = vadd.f32 %v1701_v42, %v677_v18 }
  0xc2   : > { %v560_v23 = vadd.f32 %v1701_v42, %v559_v19  ;;  %v600_v24 = vadd.f32 %v1701_v42, %v599_v20 }
  0xc3   : > { %v810_v37 = vmul.f32 0.01, %v638_v27  ;;  %v826_v38 = vmul.f32 0.01, %v678_v28  ;;  %vm746_vm12 = vcmp.ge.f32.partialorder %v638_v27, 0.0  ;;  %vm762_vm13 = vcmp.ge.f32.partialorder %v678_v28, 0.0 }
  0xc4   : > { %vm715_vm10 = vcmp.ge.f32.partialorder %v560_v23, 0.0  ;;  %v779_v25 = vmul.f32 0.01, %v560_v23  ;;  %vm731_vm11 = vcmp.ge.f32.partialorder %v600_v24, 0.0  ;;  %v795_v26 = vmul.f32 0.01, %v600_v24 }
  0xc5   : > { %v874_v46 = vsel %vm746_vm12, %v638_v27, %v810_v37  ;;  %v890_v47 = vsel %vm762_vm13, %v678_v28, %v826_v38 }
  0xc6   : > { %v843_v31 = vsel %vm715_vm10, %v560_v23, %v779_v25  ;;  %v859_v32 = vsel %vm731_vm11, %v600_v24, %v795_v26 }
  0xc7   : > { %v1335_v33 = vpack.c.bf16 %v843_v31, %v842_v29  ;;  %v1375_v34 = vpack.c.bf16 %v859_v32, %v858_v30 }
  0xc8   : > { %v639_v35 = vpop.f32.mrf.mxu2  ;;  %v679_v36 = vpop.f32.mrf.mxu3 }
  0xc9   : > { %1487 = vst [vmem:[%s1714_s17 + $0x8] sm:$0xff] %v1335_v33   ;;  %v640_v39 = vadd.f32 %v1701_v42, %v639_v35  ;;  %v680_v40 = vadd.f32 %v1701_v42, %v679_v36  ;;  %v562_v41 = vpop.f32.mrf.mxu0  ;;  %v602_v43 = vpop.f32.mrf.mxu1 }
  0xca   : > { %1495 = vst [vmem:[%s1714_s17 + $0x48] sm:$0xff] %v1375_v34   ;;  %v563_v52 = vadd.f32 %v1701_v42, %v562_v41  ;;  %v603_v53 = vadd.f32 %v1701_v42, %v602_v43 }
  0xcb   : > { %vm747_vm14 = vcmp.ge.f32.partialorder %v640_v39, 0.0  ;;  %v811_v44 = vmul.f32 0.01, %v640_v39  ;;  %vm763_vm15 = vcmp.ge.f32.partialorder %v680_v40, 0.0  ;;  %v827_v45 = vmul.f32 0.01, %v680_v40 }
  0xcc   : > { %v780_v58 = vmul.f32 0.01, %v563_v52  ;;  %v796_v59 = vmul.f32 0.01, %v603_v53  ;;  %vm716_vm0 = vcmp.ge.f32.partialorder %v563_v52, 0.0  ;;  %vm732_vm1 = vcmp.ge.f32.partialorder %v603_v53, 0.0 }
  0xcd   : > { %v875_v48 = vsel %vm747_vm14, %v640_v39, %v811_v44  ;;  %v891_v49 = vsel %vm763_vm15, %v680_v40, %v827_v45 }
  0xce   : > { %v1415_v50 = vpack.c.bf16 %v875_v48, %v874_v46  ;;  %v1455_v51 = vpack.c.bf16 %v891_v49, %v890_v47  ;;  %v844_v2 = vsel %vm716_vm0, %v563_v52, %v780_v58  ;;  %v860_v3 = vsel %vm732_vm1, %v603_v53, %v796_v59 }
  0xd0   : > { %1503 = vst [vmem:[%s1714_s17 + $0x88] sm:$0xff] %v1415_v50   ;;  %v642_v54 = vpop.f32.mrf.mxu2  ;;  %v682_v55 = vpop.f32.mrf.mxu3 }
  0xd1   : > { %1511 = vst [vmem:[%s1714_s17 + $0xc8] sm:$0xff] %v1455_v51   ;;  %v564_v56 = vpop.f32.mrf.mxu0  ;;  %v604_v57 = vpop.f32.mrf.mxu1  ;;  %v643_v0 = vadd.f32 %v1701_v42, %v642_v54  ;;  %v683_v1 = vadd.f32 %v1701_v42, %v682_v55 }
  0xd2   : > { %v565_v60 = vadd.f32 %v1701_v42, %v564_v56  ;;  %v605_v61 = vadd.f32 %v1701_v42, %v604_v57 }
  0xd3   : > { %v812_v10 = vmul.f32 0.01, %v643_v0  ;;  %v828_v11 = vmul.f32 0.01, %v683_v1  ;;  %vm748_vm4 = vcmp.ge.f32.partialorder %v643_v0, 0.0  ;;  %vm764_vm5 = vcmp.ge.f32.partialorder %v683_v1, 0.0 }
  0xd4   : > { %vm717_vm2 = vcmp.ge.f32.partialorder %v565_v60, 0.0  ;;  %v781_v62 = vmul.f32 0.01, %v565_v60  ;;  %vm733_vm3 = vcmp.ge.f32.partialorder %v605_v61, 0.0  ;;  %v797_v63 = vmul.f32 0.01, %v605_v61 }
  0xd5   : > { %v876_v18 = vsel %vm748_vm4, %v643_v0, %v812_v10  ;;  %v892_v19 = vsel %vm764_vm5, %v683_v1, %v828_v11 }
  0xd6   : > { %v845_v4 = vsel %vm717_vm2, %v565_v60, %v781_v62  ;;  %v861_v5 = vsel %vm733_vm3, %v605_v61, %v797_v63 }
  0xd7   : > { %v1340_v6 = vpack.c.bf16 %v845_v4, %v844_v2  ;;  %v1380_v7 = vpack.c.bf16 %v861_v5, %v860_v3 }
  0xd8   : > { %v644_v8 = vpop.f32.mrf.mxu2  ;;  %v684_v9 = vpop.f32.mrf.mxu3 }
  0xd9   : > { %1488 = vst [vmem:[%s1714_s17 + $0x10] sm:$0xff] %v1340_v6   ;;  %v645_v12 = vadd.f32 %v1701_v42, %v644_v8  ;;  %v685_v13 = vadd.f32 %v1701_v42, %v684_v9  ;;  %v567_v14 = vpop.f32.mrf.mxu0  ;;  %v607_v15 = vpop.f32.mrf.mxu1 }
  0xda   : > { %1496 = vst [vmem:[%s1714_s17 + $0x50] sm:$0xff] %v1380_v7   ;;  %v568_v24 = vadd.f32 %v1701_v42, %v567_v14  ;;  %v608_v25 = vadd.f32 %v1701_v42, %v607_v15 }
  0xdb   : > { %vm749_vm6 = vcmp.ge.f32.partialorder %v645_v12, 0.0  ;;  %v813_v16 = vmul.f32 0.01, %v645_v12  ;;  %vm765_vm7 = vcmp.ge.f32.partialorder %v685_v13, 0.0  ;;  %v829_v17 = vmul.f32 0.01, %v685_v13 }
  0xdc   : > { %v782_v30 = vmul.f32 0.01, %v568_v24  ;;  %v798_v31 = vmul.f32 0.01, %v608_v25  ;;  %vm718_vm8 = vcmp.ge.f32.partialorder %v568_v24, 0.0  ;;  %vm734_vm9 = vcmp.ge.f32.partialorder %v608_v25, 0.0 }
  0xdd   : > { %v877_v20 = vsel %vm749_vm6, %v645_v12, %v813_v16  ;;  %v893_v21 = vsel %vm765_vm7, %v685_v13, %v829_v17 }
  0xde   : > { %v1420_v22 = vpack.c.bf16 %v877_v20, %v876_v18  ;;  %v1460_v23 = vpack.c.bf16 %v893_v21, %v892_v19  ;;  %v846_v38 = vsel %vm718_vm8, %v568_v24, %v782_v30  ;;  %v862_v39 = vsel %vm734_vm9, %v608_v25, %v798_v31 }
  0xe0   : > { %1504 = vst [vmem:[%s1714_s17 + $0x90] sm:$0xff] %v1420_v22   ;;  %v647_v26 = vpop.f32.mrf.mxu2  ;;  %v687_v27 = vpop.f32.mrf.mxu3 }
  0xe1   : > { %1512 = vst [vmem:[%s1714_s17 + $0xd0] sm:$0xff] %v1460_v23   ;;  %v569_v28 = vpop.f32.mrf.mxu0  ;;  %v609_v29 = vpop.f32.mrf.mxu1  ;;  %v648_v36 = vadd.f32 %v1701_v42, %v647_v26  ;;  %v688_v37 = vadd.f32 %v1701_v42, %v687_v27 }
  0xe2   : > { %v570_v32 = vadd.f32 %v1701_v42, %v569_v28  ;;  %v610_v33 = vadd.f32 %v1701_v42, %v609_v29 }
  0xe3   : > { %v814_v47 = vmul.f32 0.01, %v648_v36  ;;  %v830_v48 = vmul.f32 0.01, %v688_v37  ;;  %vm750_vm12 = vcmp.ge.f32.partialorder %v648_v36, 0.0  ;;  %vm766_vm13 = vcmp.ge.f32.partialorder %v688_v37, 0.0 }
  0xe4   : > { %vm719_vm10 = vcmp.ge.f32.partialorder %v570_v32, 0.0  ;;  %v783_v34 = vmul.f32 0.01, %v570_v32  ;;  %vm735_vm11 = vcmp.ge.f32.partialorder %v610_v33, 0.0  ;;  %v799_v35 = vmul.f32 0.01, %v610_v33 }
  0xe5   : > { %v878_v55 = vsel %vm750_vm12, %v648_v36, %v814_v47  ;;  %v894_v56 = vsel %vm766_vm13, %v688_v37, %v830_v48 }
  0xe6   : > { %v847_v40 = vsel %vm719_vm10, %v570_v32, %v783_v34  ;;  %v863_v41 = vsel %vm735_vm11, %v610_v33, %v799_v35 }
  0xe7   : > { %v1345_v43 = vpack.c.bf16 %v847_v40, %v846_v38  ;;  %v1385_v44 = vpack.c.bf16 %v863_v41, %v862_v39 }
  0xe8   : > { %v649_v45 = vpop.f32.mrf.mxu2  ;;  %v689_v46 = vpop.f32.mrf.mxu3 }
  0xe9   : > { %1489 = vst [vmem:[%s1714_s17 + $0x18] sm:$0xff] %v1345_v43   ;;  %v650_v49 = vadd.f32 %v1701_v42, %v649_v45  ;;  %v690_v50 = vadd.f32 %v1701_v42, %v689_v46  ;;  %v572_v51 = vpop.f32.mrf.mxu0  ;;  %v612_v52 = vpop.f32.mrf.mxu1 }
  0xea   : > { %1497 = vst [vmem:[%s1714_s17 + $0x58] sm:$0xff] %v1385_v44   ;;  %v573_v61 = vadd.f32 %v1701_v42, %v572_v51  ;;  %v613_v62 = vadd.f32 %v1701_v42, %v612_v52 }
  0xeb   : > { %vm751_vm14 = vcmp.ge.f32.partialorder %v650_v49, 0.0  ;;  %v815_v53 = vmul.f32 0.01, %v650_v49  ;;  %vm767_vm15 = vcmp.ge.f32.partialorder %v690_v50, 0.0  ;;  %v831_v54 = vmul.f32 0.01, %v690_v50 }
  0xec   : > { %v784_v3 = vmul.f32 0.01, %v573_v61  ;;  %v800_v4 = vmul.f32 0.01, %v613_v62  ;;  %vm720_vm0 = vcmp.ge.f32.partialorder %v573_v61, 0.0  ;;  %vm736_vm1 = vcmp.ge.f32.partialorder %v613_v62, 0.0 }
  0xed   : > { %v879_v57 = vsel %vm751_vm14, %v650_v49, %v815_v53  ;;  %v895_v58 = vsel %vm767_vm15, %v690_v50, %v831_v54 }
  0xee   : > { %v1425_v59 = vpack.c.bf16 %v879_v57, %v878_v55  ;;  %v1465_v60 = vpack.c.bf16 %v895_v58, %v894_v56  ;;  %v848_v11 = vsel %vm720_vm0, %v573_v61, %v784_v3  ;;  %v864_v12 = vsel %vm736_vm1, %v613_v62, %v800_v4 }
  0xf0   : > { %1505 = vst [vmem:[%s1714_s17 + $0x98] sm:$0xff] %v1425_v59   ;;  %v652_v63 = vpop.f32.mrf.mxu2  ;;  %v692_v0 = vpop.f32.mrf.mxu3 }
  0xf1   : > { %1513 = vst [vmem:[%s1714_s17 + $0xd8] sm:$0xff] %v1465_v60   ;;  %v574_v1 = vpop.f32.mrf.mxu0  ;;  %v614_v2 = vpop.f32.mrf.mxu1  ;;  %v653_v9 = vadd.f32 %v1701_v42, %v652_v63  ;;  %v693_v10 = vadd.f32 %v1701_v42, %v692_v0 }
  0xf2   : > { %v575_v5 = vadd.f32 %v1701_v42, %v574_v1  ;;  %v615_v6 = vadd.f32 %v1701_v42, %v614_v2 }
  0xf3   : > { %v816_v19 = vmul.f32 0.01, %v653_v9  ;;  %v832_v20 = vmul.f32 0.01, %v693_v10  ;;  %vm752_vm4 = vcmp.ge.f32.partialorder %v653_v9, 0.0  ;;  %vm768_vm5 = vcmp.ge.f32.partialorder %v693_v10, 0.0 }
  0xf4   : > { %vm721_vm2 = vcmp.ge.f32.partialorder %v575_v5, 0.0  ;;  %v785_v7 = vmul.f32 0.01, %v575_v5  ;;  %vm737_vm3 = vcmp.ge.f32.partialorder %v615_v6, 0.0  ;;  %v801_v8 = vmul.f32 0.01, %v615_v6 }
  0xf5   : > { %v880_v27 = vsel %vm752_vm4, %v653_v9, %v816_v19  ;;  %v896_v28 = vsel %vm768_vm5, %v693_v10, %v832_v20 }
  0xf6   : > { %v849_v13 = vsel %vm721_vm2, %v575_v5, %v785_v7  ;;  %v865_v14 = vsel %vm737_vm3, %v615_v6, %v801_v8 }
  0xf7   : > { %v1350_v15 = vpack.c.bf16 %v849_v13, %v848_v11  ;;  %v1390_v16 = vpack.c.bf16 %v865_v14, %v864_v12 }
  0xf8   : > { %v654_v17 = vpop.f32.mrf.mxu2  ;;  %v694_v18 = vpop.f32.mrf.mxu3 }
  0xf9   : > { %1490 = vst [vmem:[%s1714_s17 + $0x20] sm:$0xff] %v1350_v15   ;;  %v655_v21 = vadd.f32 %v1701_v42, %v654_v17  ;;  %v695_v22 = vadd.f32 %v1701_v42, %v694_v18  ;;  %v577_v23 = vpop.f32.mrf.mxu0  ;;  %v617_v24 = vpop.f32.mrf.mxu1 }
  0xfa   : > { %1498 = vst [vmem:[%s1714_s17 + $0x60] sm:$0xff] %v1390_v16   ;;  %v578_v33 = vadd.f32 %v1701_v42, %v577_v23  ;;  %v618_v34 = vadd.f32 %v1701_v42, %v617_v24 }
  0xfb   : > { %vm753_vm6 = vcmp.ge.f32.partialorder %v655_v21, 0.0  ;;  %v817_v25 = vmul.f32 0.01, %v655_v21  ;;  %vm769_vm7 = vcmp.ge.f32.partialorder %v695_v22, 0.0  ;;  %v833_v26 = vmul.f32 0.01, %v695_v22 }
  0xfc   : > { %v786_v39 = vmul.f32 0.01, %v578_v33  ;;  %v802_v40 = vmul.f32 0.01, %v618_v34  ;;  %vm722_vm8 = vcmp.ge.f32.partialorder %v578_v33, 0.0  ;;  %vm738_vm9 = vcmp.ge.f32.partialorder %v618_v34, 0.0 }
  0xfd   : > { %v881_v29 = vsel %vm753_vm6, %v655_v21, %v817_v25  ;;  %v897_v30 = vsel %vm769_vm7, %v695_v22, %v833_v26 }
  0xfe   : > { %v1430_v31 = vpack.c.bf16 %v881_v29, %v880_v27  ;;  %v1470_v32 = vpack.c.bf16 %v897_v30, %v896_v28  ;;  %v850_v48 = vsel %vm722_vm8, %v578_v33, %v786_v39  ;;  %v866_v49 = vsel %vm738_vm9, %v618_v34, %v802_v40 }
 0x100   : > { %1506 = vst [vmem:[%s1714_s17 + $0xa0] sm:$0xff] %v1430_v31   ;;  %v657_v35 = vpop.f32.mrf.mxu2  ;;  %v697_v36 = vpop.f32.mrf.mxu3 }
 0x101   : > { %1514 = vst [vmem:[%s1714_s17 + $0xe0] sm:$0xff] %v1470_v32   ;;  %v579_v37 = vpop.f32.mrf.mxu0  ;;  %v619_v38 = vpop.f32.mrf.mxu1  ;;  %v658_v46 = vadd.f32 %v1701_v42, %v657_v35  ;;  %v698_v47 = vadd.f32 %v1701_v42, %v697_v36 }
 0x102   : > { %v580_v41 = vadd.f32 %v1701_v42, %v579_v37  ;;  %v620_v43 = vadd.f32 %v1701_v42, %v619_v38 }
 0x103   : > { %v818_v56 = vmul.f32 0.01, %v658_v46  ;;  %v834_v57 = vmul.f32 0.01, %v698_v47  ;;  %vm754_vm12 = vcmp.ge.f32.partialorder %v658_v46, 0.0  ;;  %vm770_vm13 = vcmp.ge.f32.partialorder %v698_v47, 0.0 }
 0x104   : > { %vm723_vm10 = vcmp.ge.f32.partialorder %v580_v41, 0.0  ;;  %v787_v44 = vmul.f32 0.01, %v580_v41  ;;  %vm739_vm11 = vcmp.ge.f32.partialorder %v620_v43, 0.0  ;;  %v803_v45 = vmul.f32 0.01, %v620_v43 }
 0x105   : > { %v882_v0 = vsel %vm754_vm12, %v658_v46, %v818_v56  ;;  %v898_v1 = vsel %vm770_vm13, %v698_v47, %v834_v57 }
 0x106   : > { %v851_v50 = vsel %vm723_vm10, %v580_v41, %v787_v44  ;;  %v867_v51 = vsel %vm739_vm11, %v620_v43, %v803_v45 }
 0x107   : > { %v1355_v52 = vpack.c.bf16 %v851_v50, %v850_v48  ;;  %v1395_v53 = vpack.c.bf16 %v867_v51, %v866_v49 }
 0x108   : > { %v659_v54 = vpop.f32.mrf.mxu2  ;;  %v699_v55 = vpop.f32.mrf.mxu3 }
 0x109   : > { %1491 = vst [vmem:[%s1714_s17 + $0x28] sm:$0xff] %v1355_v52   ;;  %v660_v58 = vadd.f32 %v1701_v42, %v659_v54  ;;  %v700_v59 = vadd.f32 %v1701_v42, %v699_v55  ;;  %v582_v60 = vpop.f32.mrf.mxu0  ;;  %v622_v61 = vpop.f32.mrf.mxu1 }
 0x10a   : > { %1499 = vst [vmem:[%s1714_s17 + $0x68] sm:$0xff] %v1395_v53   ;;  %v583_v6 = vadd.f32 %v1701_v42, %v582_v60  ;;  %v623_v7 = vadd.f32 %v1701_v42, %v622_v61 }
 0x10b   : > { %vm755_vm14 = vcmp.ge.f32.partialorder %v660_v58, 0.0  ;;  %v819_v62 = vmul.f32 0.01, %v660_v58  ;;  %vm771_vm15 = vcmp.ge.f32.partialorder %v700_v59, 0.0  ;;  %v835_v63 = vmul.f32 0.01, %v700_v59 }
 0x10c   : > { %v788_v12 = vmul.f32 0.01, %v583_v6  ;;  %v804_v13 = vmul.f32 0.01, %v623_v7  ;;  %vm724_vm0 = vcmp.ge.f32.partialorder %v583_v6, 0.0  ;;  %vm740_vm1 = vcmp.ge.f32.partialorder %v623_v7, 0.0 }
 0x10d   : > { %v883_v2 = vsel %vm755_vm14, %v660_v58, %v819_v62  ;;  %v899_v3 = vsel %vm771_vm15, %v700_v59, %v835_v63 }
 0x10e   : > { %v1435_v4 = vpack.c.bf16 %v883_v2, %v882_v0  ;;  %v1475_v5 = vpack.c.bf16 %v899_v3, %v898_v1  ;;  %v852_v20 = vsel %vm724_vm0, %v583_v6, %v788_v12  ;;  %v868_v21 = vsel %vm740_vm1, %v623_v7, %v804_v13 }
 0x110   : > { %1507 = vst [vmem:[%s1714_s17 + $0xa8] sm:$0xff] %v1435_v4   ;;  %v662_v8 = vpop.f32.mrf.mxu2  ;;  %v702_v9 = vpop.f32.mrf.mxu3 }
 0x111   : > { %1515 = vst [vmem:[%s1714_s17 + $0xe8] sm:$0xff] %v1475_v5   ;;  %v584_v10 = vpop.f32.mrf.mxu0  ;;  %v624_v11 = vpop.f32.mrf.mxu1  ;;  %v663_v18 = vadd.f32 %v1701_v42, %v662_v8  ;;  %v703_v19 = vadd.f32 %v1701_v42, %v702_v9 }
 0x112   : > { %v585_v14 = vadd.f32 %v1701_v42, %v584_v10  ;;  %v625_v15 = vadd.f32 %v1701_v42, %v624_v11 }
 0x113   : > { %v820_v28 = vmul.f32 0.01, %v663_v18  ;;  %v836_v29 = vmul.f32 0.01, %v703_v19  ;;  %vm756_vm4 = vcmp.ge.f32.partialorder %v663_v18, 0.0  ;;  %vm772_vm5 = vcmp.ge.f32.partialorder %v703_v19, 0.0 }
 0x114   : > { %vm725_vm2 = vcmp.ge.f32.partialorder %v585_v14, 0.0  ;;  %v789_v16 = vmul.f32 0.01, %v585_v14  ;;  %vm741_vm3 = vcmp.ge.f32.partialorder %v625_v15, 0.0  ;;  %v805_v17 = vmul.f32 0.01, %v625_v15 }
 0x115   : > { %v884_v36 = vsel %vm756_vm4, %v663_v18, %v820_v28  ;;  %v900_v37 = vsel %vm772_vm5, %v703_v19, %v836_v29 }
 0x116   : > { %v853_v22 = vsel %vm725_vm2, %v585_v14, %v789_v16  ;;  %v869_v23 = vsel %vm741_vm3, %v625_v15, %v805_v17 }
 0x117   : > { %v1360_v24 = vpack.c.bf16 %v853_v22, %v852_v20  ;;  %v1400_v25 = vpack.c.bf16 %v869_v23, %v868_v21 }
 0x118   : > { %v664_v26 = vpop.f32.mrf.mxu2  ;;  %v704_v27 = vpop.f32.mrf.mxu3 }
 0x119   : > { %1492 = vst [vmem:[%s1714_s17 + $0x30] sm:$0xff] %v1360_v24   ;;  %v665_v30 = vadd.f32 %v1701_v42, %v664_v26  ;;  %v705_v31 = vadd.f32 %v1701_v42, %v704_v27  ;;  %v587_v32 = vpop.f32.mrf.mxu0  ;;  %v627_v33 = vpop.f32.mrf.mxu1 }
 0x11a   : > { %1500 = vst [vmem:[%s1714_s17 + $0x70] sm:$0xff] %v1400_v25   ;;  %v588_v43 = vadd.f32 %v1701_v42, %v587_v32  ;;  %v628_v44 = vadd.f32 %v1701_v42, %v627_v33 }
 0x11b   : > { %vm757_vm6 = vcmp.ge.f32.partialorder %v665_v30, 0.0  ;;  %v821_v34 = vmul.f32 0.01, %v665_v30  ;;  %vm773_vm7 = vcmp.ge.f32.partialorder %v705_v31, 0.0  ;;  %v837_v35 = vmul.f32 0.01, %v705_v31 }
 0x11c   : > { %v790_v49 = vmul.f32 0.01, %v588_v43  ;;  %v806_v50 = vmul.f32 0.01, %v628_v44  ;;  %vm726_vm8 = vcmp.ge.f32.partialorder %v588_v43, 0.0  ;;  %vm742_vm9 = vcmp.ge.f32.partialorder %v628_v44, 0.0 }
 0x11d   : > { %v885_v38 = vsel %vm757_vm6, %v665_v30, %v821_v34  ;;  %v901_v39 = vsel %vm773_vm7, %v705_v31, %v837_v35 }
 0x11e   : > { %v1440_v40 = vpack.c.bf16 %v885_v38, %v884_v36  ;;  %v1480_v41 = vpack.c.bf16 %v901_v39, %v900_v37  ;;  %v854_v57 = vsel %vm726_vm8, %v588_v43, %v790_v49  ;;  %v870_v58 = vsel %vm742_vm9, %v628_v44, %v806_v50 }
 0x120   : > { %1508 = vst [vmem:[%s1714_s17 + $0xb0] sm:$0xff] %v1440_v40   ;;  %v667_v45 = vpop.f32.mrf.mxu2  ;;  %v707_v46 = vpop.f32.mrf.mxu3 }
 0x121   : > { %1516 = vst [vmem:[%s1714_s17 + $0xf0] sm:$0xff] %v1480_v41   ;;  %v589_v47 = vpop.f32.mrf.mxu0  ;;  %v629_v48 = vpop.f32.mrf.mxu1  ;;  %v668_v55 = vadd.f32 %v1701_v42, %v667_v45  ;;  %v708_v56 = vadd.f32 %v1701_v42, %v707_v46 }
 0x122   : > { %v590_v51 = vadd.f32 %v1701_v42, %v589_v47  ;;  %v630_v52 = vadd.f32 %v1701_v42, %v629_v48 }
 0x123   : > { %v822_v1 = vmul.f32 0.01, %v668_v55  ;;  %v838_v2 = vmul.f32 0.01, %v708_v56  ;;  %vm758_vm12 = vcmp.ge.f32.partialorder %v668_v55, 0.0  ;;  %vm774_vm13 = vcmp.ge.f32.partialorder %v708_v56, 0.0 }
 0x124   : > { %vm727_vm10 = vcmp.ge.f32.partialorder %v590_v51, 0.0  ;;  %v791_v53 = vmul.f32 0.01, %v590_v51  ;;  %vm743_vm11 = vcmp.ge.f32.partialorder %v630_v52, 0.0  ;;  %v807_v54 = vmul.f32 0.01, %v630_v52 }
 0x125   : > { %v886_v7 = vsel %vm758_vm12, %v668_v55, %v822_v1  ;;  %v902_v8 = vsel %vm774_vm13, %v708_v56, %v838_v2 }
 0x126   : > { %v855_v59 = vsel %vm727_vm10, %v590_v51, %v791_v53  ;;  %v871_v60 = vsel %vm743_vm11, %v630_v52, %v807_v54 }
 0x127   : > { %v1365_v61 = vpack.c.bf16 %v855_v59, %v854_v57  ;;  %v1405_v62 = vpack.c.bf16 %v871_v60, %v870_v58 }
 0x128   : > { %v669_v63 = vpop.f32.mrf.mxu2  ;;  %v709_v0 = vpop.f32.mrf.mxu3 }
 0x129   : > { %1493 = vst [vmem:[%s1714_s17 + $0x38] sm:$0xff] %v1365_v61   ;;  %v670_v3 = vadd.f32 %v1701_v42, %v669_v63  ;;  %v710_v4 = vadd.f32 %v1701_v42, %v709_v0 }
 0x12a   : > { %1501 = vst [vmem:[%s1714_s17 + $0x78] sm:$0xff] %v1405_v62  }
 0x12b   : > { %vm759_vm14 = vcmp.ge.f32.partialorder %v670_v3, 0.0  ;;  %v823_v5 = vmul.f32 0.01, %v670_v3  ;;  %vm775_vm15 = vcmp.ge.f32.partialorder %v710_v4, 0.0  ;;  %v839_v6 = vmul.f32 0.01, %v710_v4 }
 0x12d   : > { %v887_v9 = vsel %vm759_vm14, %v670_v3, %v823_v5  ;;  %v903_v10 = vsel %vm775_vm15, %v710_v4, %v839_v6 }
 0x12e   : > { %v1445_v11 = vpack.c.bf16 %v887_v9, %v886_v7  ;;  %v1485_v12 = vpack.c.bf16 %v903_v10, %v902_v8 }
 0x130   : > { %1509 = vst [vmem:[%s1714_s17 + $0xb8] sm:$0xff] %v1445_v11  }
 0x131   : > { %1517 = vst [vmem:[%s1714_s17 + $0xf8] sm:$0xff] %v1485_v12  }
 0x132 PF: > { %s13_s14 = sadd.s32 1, %s1589_s14   ;;  %s1819_s12 = smov %s1585_s13 }
 0x133   : > { %p10_p5 = scmp.ge.s32.totalorder %s13_s14, 4   ;;  %s1820_s13 = smov %s1822_s15 }
 0x135   :  { %12 = sbr.rel (!%p10_p5) target bundleno = 2 (0x2), region = 65 }

// kernel: _lambda_.9
= control target key start
LH: loop header
LB: loop body
LE: loop exit
PB: predicated region body
PF: predicated region fallthrough
CT: control target
= control target key end

     0   :  { %s1350_s12 = smov 0   ;;  %s1352_s13 = smov 0   ;;  %s1581_s0 = inlined_call_operand.vmem [shape: bf16[128,1024], index: 0, kind: input, shape index: {}]   ;;  %s1582_s1 = inlined_call_operand.vmem [shape: bf16[1024,128], index: 1, kind: input, shape index: {}]   ;;  %s1583_s2 = inlined_call_operand.vmem [shape: f32[1,128], index: 2, kind: input, shape index: {}]   ;;  %s1584_s3 = inlined_call_operand.vmem [shape: bf16[128,128], index: 3, kind: output, shape index: {}]  }
   0x1   :  { %s1354_s14 = smov 0   ;;  %s1356_s15 = smov 0  }
   0x2   :  { %s1358_s16 = smov 0   ;;  %s1360_s17 = smov 0  }
   0x3   :  { %s1362_s18 = smov 0  }
   0x4 LB: > { %s22_s19 = sadd.s32 1, %s1320_s16  ;;  %s25_s20 = sadd.s32 1, %s1324_s17  ;;  %s1328_s18 = sphi %s1362_s18, %s13_s18   ;;  %s1324_s17 = sphi %s1360_s17, %s1590_s17   ;;  %s1320_s16 = sphi %s1358_s16, %s1589_s16   ;;  %s1316_s15 = sphi %s1356_s15, %s1588_s15   ;;  %s1312_s14 = sphi %s1354_s14, %s1587_s14   ;;  %s1308_s13 = sphi %s1352_s13, %s1586_s13   ;;  %s1304_s12 = sphi %s1350_s12, %s1585_s12  }
   0x5   : > { %p23_p0 = scmp.ge.s32.totalorder %s22_s19, 2  ;;  %p41_p1 = scmp.ne.s32.totalorder %s1308_s13, %s1304_s12 }
   0x6   : > { %p42_p2 = scmp.eq.s32.totalorder %s1328_s18, 0  ;;  %s34_s24 = sadd.s32 1, %s1308_s13 }
   0x7   : > { %s1592_s19 = smov (%p23_p0, %s22_s19), 0  ;;  %s1594_s20 = smov (!%p23_p0, %s25_s20), %s1324_s17 }
   0x8   : > { %p43_p3 = por %p42_p2, %p41_p1  ;;  %p27_p4 = scmp.ge.s32.totalorder %s1594_s20, 2 }
   0x9   : > { %s30_s21 = ssub.s32 %s1320_s16, %s1592_s19  ;;  %p937_p6 = scmp.ge.s32.totalorder %s1328_s18, 4 }
   0xa   : > { %s1596_s20 = smov (%p27_p4, %s1594_s20), 0 }
   0xb   : > { %s29_s22 = ssub.s32 %s1324_s17, %s1596_s20  ;;  %143 = sbr.rel (%p937_p6) target bundleno = 39 (0x27), region = 20 }
   0xc   : > { %s31_s23 = sor.u32 %s30_s21, %s29_s22 }
   0xd   : > { %p32_p5 = scmp.eq.s32.totalorder %s31_s23, 0 }
   0xf   : > { %s1401_s25 = scalar_select %p32_p5, %s1308_s13, %s34_s24  }
  0x10   : > { %146 = sbr.rel (!%p43_p3) target bundleno = 39 (0x27), region = 24  ;;  %s148_s26 = sand.u32 (%p43_p3), 1, %s1308_s13  }
  0x11   : > { %s940_s27 = sshll.u32 (%p43_p3), %s1320_s16, 2  ;;  %s938_s28 = sshll.u32 (%p43_p3), %s148_s26, 7 }
  0x12   : > { %s1145_s29 = sshll.u32 (%p43_p3), %s1324_s17, 6  ;;  %s150_s8 = scalar_lea.vmem (%p43_p3), [#allocation3], %s938_s28 }
  0x13   : > { %s154_s30 = sadd.s32 (%p43_p3), %s1145_s29, %s940_s27 }
  0x14   : > { %s942_s4 = sshll.u32 (%p43_p3), %s154_s30, 2 }
  0x15   : > { %s1410_s7 = scalar_lea.vmem %s1581_s0, %s942_s4 }
  0x16   : > { %v169_v0 = vld [vmem:[%s1410_s7] sm:$0xff]  ;;  %v171_v1 = vld [vmem:[%s1410_s7 + $0x8] sm:$0xff] }
  0x17   : > { %v173_v2 = vld [vmem:[%s1410_s7 + $0x20] sm:$0xff]  ;;  %170 = vst [vmem:[%s150_s8] sm:$0xff] %v169_v0  ;;  %v175_v3 = vld [vmem:[%s1410_s7 + $0x28] sm:$0xff] }
  0x18   : > { %172 = vst [vmem:[%s150_s8 + $0x8] sm:$0xff] %v171_v1  ;;  %v177_v4 = vld [vmem:[%s1410_s7 + $0x40] sm:$0xff]  ;;  %v179_v5 = vld [vmem:[%s1410_s7 + $0x48] sm:$0xff] }
  0x19   : > { %174 = vst [vmem:[%s150_s8 + $0x10] sm:$0xff] %v173_v2  ;;  %v181_v6 = vld [vmem:[%s1410_s7 + $0x60] sm:$0xff]  ;;  %v183_v7 = vld [vmem:[%s1410_s7 + $0x68] sm:$0xff] }
  0x1a   : > { %176 = vst [vmem:[%s150_s8 + $0x18] sm:$0xff] %v175_v3  ;;  %v185_v8 = vld [vmem:[%s1410_s7 + $0x80] sm:$0xff]  ;;  %v187_v9 = vld [vmem:[%s1410_s7 + $0x88] sm:$0xff] }
  0x1b   : > { %178 = vst [vmem:[%s150_s8 + $0x20] sm:$0xff] %v177_v4  ;;  %v189_v10 = vld [vmem:[%s1410_s7 + $0xa0] sm:$0xff]  ;;  %v191_v11 = vld [vmem:[%s1410_s7 + $0xa8] sm:$0xff] }
  0x1c   : > { %180 = vst [vmem:[%s150_s8 + $0x28] sm:$0xff] %v179_v5  ;;  %v193_v12 = vld [vmem:[%s1410_s7 + $0xc0] sm:$0xff]  ;;  %v195_v13 = vld [vmem:[%s1410_s7 + $0xc8] sm:$0xff] }
  0x1d   : > { %182 = vst [vmem:[%s150_s8 + $0x30] sm:$0xff] %v181_v6  ;;  %v197_v14 = vld [vmem:[%s1410_s7 + $0xe0] sm:$0xff]  ;;  %v199_v15 = vld [vmem:[%s1410_s7 + $0xe8] sm:$0xff] }
  0x1e   : > { %184 = vst [vmem:[%s150_s8 + $0x38] sm:$0xff] %v183_v7 }
  0x1f   : > { %186 = vst [vmem:[%s150_s8 + $0x40] sm:$0xff] %v185_v8 }
  0x20   : > { %188 = vst [vmem:[%s150_s8 + $0x48] sm:$0xff] %v187_v9 }
  0x21   : > { %190 = vst [vmem:[%s150_s8 + $0x50] sm:$0xff] %v189_v10 }
  0x22   : > { %192 = vst [vmem:[%s150_s8 + $0x58] sm:$0xff] %v191_v11 }
  0x23   : > { %194 = vst [vmem:[%s150_s8 + $0x60] sm:$0xff] %v193_v12 }
  0x24   : > { %196 = vst [vmem:[%s150_s8 + $0x68] sm:$0xff] %v195_v13 }
  0x25   : > { %198 = vst [vmem:[%s150_s8 + $0x70] sm:$0xff] %v197_v14 }
  0x26   : > { %200 = vst [vmem:[%s150_s8 + $0x78] sm:$0xff] %v199_v15 }
  0x27 PF: > { %p943_p7 = scmp.ge.s32.totalorder %s1328_s18, 1  ;;  %p214_p8 = scmp.lt.s32.totalorder %s1328_s18, 5 }
  0x29   : > { %p215_p9 = pnand %p943_p7, %p214_p8 }
  0x2a   : > { %s945_s9 = sshll.u32 (!%p215_p9), %s1312_s14, 6  ;;  %s947_s10 = sshll.u32 (!%p215_p9), %s1316_s15, 3 }
  0x2b   : > { %218 = sbr.rel (%p215_p9) target bundleno = 329 (0x149), region = 51  ;;  %p252_p10 = scmp.lt.s32.totalorder (!%p215_p9), %s945_s9, 127 }
  0x2c   : > { %p258_p11 = scmp.lt.s32.totalorder (!%p215_p9), %s947_s10, 15  ;;  %s221_s28 = sand.u32 (!%p215_p9), 1, %s1304_s12  }
  0x2d   : > { %s944_s29 = sshll.u32 (!%p215_p9), %s221_s28, 7  ;;  %p1141_p12 = scmp.ne.s32.totalorder (!%p215_p9), %s1312_s14, 0 }
  0x2e   : > { %s1475_s12 = scalar_lea.vmem (!%p215_p9), [#allocation3], %s944_s29 }
  0x30   : > { %s1598_s9 = smov (!%p252_p10, %s945_s9), 127  ;;  %s1600_s10 = smov (!%p258_p11, %s947_s10), 15  ;;  %v951_v48 = vld [vmem:[%s1475_s12] sm:$0xf]  ;;  %v1148_v49 = vld [vmem:[%s1475_s12 + $0xc] sm:$0xf0] }
  0x31   : > { %s946_s11 = sshll.u32 %s1598_s9, 2  ;;  %s948_s24 = sshll.u32 %s1600_s10, 2  ;;  %v1146_v50 = vld [vmem:[%s1475_s12 + $0x4] sm:$0xf]  ;;  %v953_v51 = vld [vmem:[%s1475_s12 + $0x10] sm:$0xf0]  ;;  %v952_v56 = vor.u32 %v1148_v49, %v951_v48 }
  0x32   : > { %s1435_s23 = scalar_lea.vmem %s1582_s1, %s946_s11  ;;  %s1440_s27 = scalar_lea.vmem %s1584_s3, %s948_s24  ;;  %v959_v52 = vld [vmem:[%s1475_s12 + $0x8] sm:$0xf]  ;;  %v1149_v53 = vld [vmem:[%s1475_s12 + $0x14] sm:$0xf0]  ;;  %v1147_v54 = vld [vmem:[%s1475_s12 + $0xc] sm:$0xf]  ;;  %v956_v57 = vor.u32 %v1146_v50, %v953_v51 }
  0x33   : > { %v1169_v16 = vld [vmem:[%s1435_s23 + $0x38] sm:$0xff]  ;;  %v1168_v20 = vld [vmem:[%s1435_s23 + $0x30] sm:$0xff]  ;;  %v1167_v24 = vld [vmem:[%s1435_s23 + $0x28] sm:$0xff]  ;;  %v960_v58 = vor.u32 %v1149_v53, %v959_v52 }
  0x34   : > { %v1177_v17 = vld [vmem:[%s1435_s23 + $0x78] sm:$0xff]  ;;  %615 = vmatpush.bf16.msra.mxu0 %v1169_v16  ;;  %v1176_v21 = vld [vmem:[%s1435_s23 + $0x70] sm:$0xff]  ;;  %v1175_v25 = vld [vmem:[%s1435_s23 + $0x68] sm:$0xff] }
  0x35   : > { %v1185_v18 = vld [vmem:[%s1435_s23 + $0xb8] sm:$0xff]  ;;  %644 = vmatpush.bf16.msra.mxu1 %v1177_v17  ;;  %v1184_v22 = vld [vmem:[%s1435_s23 + $0xb0] sm:$0xff]  ;;  %v1183_v26 = vld [vmem:[%s1435_s23 + $0xa8] sm:$0xff] }
  0x36   : > { %v1193_v19 = vld [vmem:[%s1435_s23 + $0xf8] sm:$0xff]  ;;  %673 = vmatpush.bf16.msra.mxu2 %v1185_v18  ;;  %v1192_v23 = vld [vmem:[%s1435_s23 + $0xf0] sm:$0xff]  ;;  %v1191_v27 = vld [vmem:[%s1435_s23 + $0xe8] sm:$0xff] }
  0x37   : > { %702 = vmatpush.bf16.msra.mxu3 %v1193_v19  ;;  %v1166_v28 = vld [vmem:[%s1435_s23 + $0x20] sm:$0xff]  ;;  %v1165_v32 = vld [vmem:[%s1435_s23 + $0x18] sm:$0xff]  ;;  %v1164_v36 = vld [vmem:[%s1435_s23 + $0x10] sm:$0xff] }
  0x38   : > { %616 = vmatpush.bf16.msra.mxu0 %v1168_v20  ;;  %v1174_v29 = vld [vmem:[%s1435_s23 + $0x60] sm:$0xff]  ;;  %v1173_v33 = vld [vmem:[%s1435_s23 + $0x58] sm:$0xff]  ;;  %v1172_v37 = vld [vmem:[%s1435_s23 + $0x50] sm:$0xff] }
  0x39   : > { %645 = vmatpush.bf16.msra.mxu1 %v1176_v21  ;;  %v1182_v30 = vld [vmem:[%s1435_s23 + $0xa0] sm:$0xff]  ;;  %v1181_v34 = vld [vmem:[%s1435_s23 + $0x98] sm:$0xff]  ;;  %v1180_v38 = vld [vmem:[%s1435_s23 + $0x90] sm:$0xff] }
  0x3a   : > { %674 = vmatpush.bf16.msra.mxu2 %v1184_v22  ;;  %v1190_v31 = vld [vmem:[%s1435_s23 + $0xe0] sm:$0xff]  ;;  %v1189_v35 = vld [vmem:[%s1435_s23 + $0xd8] sm:$0xff]  ;;  %v1188_v39 = vld [vmem:[%s1435_s23 + $0xd0] sm:$0xff] }
  0x3b   : > { %703 = vmatpush.bf16.msra.mxu3 %v1192_v23  ;;  %v1163_v40 = vld [vmem:[%s1435_s23 + $0x8] sm:$0xff]  ;;  %v1162_v44 = vld [vmem:[%s1435_s23] sm:$0xff]  ;;  %v961_v55 = vld [vmem:[%s1475_s12 + $0x18] sm:$0xf0] }
  0x3c   : > { %617 = vmatpush.bf16.msra.mxu0 %v1167_v24  ;;  %v1171_v41 = vld [vmem:[%s1435_s23 + $0x48] sm:$0xff]  ;;  %v1170_v45 = vld [vmem:[%s1435_s23 + $0x40] sm:$0xff]  ;;  %v964_v59 = vor.u32 %v1147_v54, %v961_v55  ;;  %v1152_v61 = vld [vmem:[%s1475_s12 + $0x2c] sm:$0xf0] }
  0x3d   : > { %646 = vmatpush.bf16.msra.mxu1 %v1175_v25  ;;  %v1179_v42 = vld [vmem:[%s1435_s23 + $0x88] sm:$0xff]  ;;  %v1178_v46 = vld [vmem:[%s1435_s23 + $0x80] sm:$0xff]  ;;  %v969_v63 = vld [vmem:[%s1475_s12 + $0x30] sm:$0xf0] }
  0x3e   : > { %675 = vmatpush.bf16.msra.mxu2 %v1183_v26  ;;  %v1187_v43 = vld [vmem:[%s1435_s23 + $0xc8] sm:$0xff]  ;;  %v1186_v47 = vld [vmem:[%s1435_s23 + $0xc0] sm:$0xff]  ;;  %v1153_v1 = vld [vmem:[%s1475_s12 + $0x34] sm:$0xf0] }
  0x3f   : > { %704 = vmatpush.bf16.msra.mxu3 %v1191_v27  ;;  %v967_v60 = vld [vmem:[%s1475_s12 + $0x20] sm:$0xf]  ;;  %v1150_v62 = vld [vmem:[%s1475_s12 + $0x24] sm:$0xf]  ;;  %v975_v0 = vld [vmem:[%s1475_s12 + $0x28] sm:$0xf] }
  0x40   : > { %618 = vmatpush.bf16.msra.mxu0 %v1166_v28  ;;  %v1151_v2 = vld [vmem:[%s1475_s12 + $0x2c] sm:$0xf]  ;;  %v977_v3 = vld [vmem:[%s1475_s12 + $0x38] sm:$0xf0]  ;;  %v968_v4 = vor.u32 %v1152_v61, %v967_v60  ;;  %v972_v5 = vor.u32 %v1150_v62, %v969_v63  ;;  %v976_v6 = vor.u32 %v1153_v1, %v975_v0  ;;  %v983_v8 = vld [vmem:[%s1475_s12 + $0x40] sm:$0xf] }
  0x41   : > { %647 = vmatpush.bf16.msra.mxu1 %v1174_v29  ;;  %v980_v7 = vor.u32 %v1151_v2, %v977_v3  ;;  %v1156_v9 = vld [vmem:[%s1475_s12 + $0x4c] sm:$0xf0]  ;;  %v1154_v10 = vld [vmem:[%s1475_s12 + $0x44] sm:$0xf]  ;;  %v985_v11 = vld [vmem:[%s1475_s12 + $0x50] sm:$0xf0] }
  0x42   : > { %676 = vmatpush.bf16.msra.mxu2 %v1182_v30  ;;  %v991_v12 = vld [vmem:[%s1475_s12 + $0x48] sm:$0xf]  ;;  %v1157_v13 = vld [vmem:[%s1475_s12 + $0x54] sm:$0xf0]  ;;  %v1155_v14 = vld [vmem:[%s1475_s12 + $0x4c] sm:$0xf]  ;;  %v984_v16 = vor.u32 %v1156_v9, %v983_v8  ;;  %v988_v17 = vor.u32 %v1154_v10, %v985_v11 }
  0x43   : > { %705 = vmatpush.bf16.msra.mxu3 %v1190_v31  ;;  %v993_v15 = vld [vmem:[%s1475_s12 + $0x58] sm:$0xf0]  ;;  %v992_v18 = vor.u32 %v1157_v13, %v991_v12  ;;  %v999_v20 = vld [vmem:[%s1475_s12 + $0x60] sm:$0xf]  ;;  %v1160_v21 = vld [vmem:[%s1475_s12 + $0x6c] sm:$0xf0] }
  0x44   : > { %619 = vmatpush.bf16.msra.mxu0 %v1165_v32  ;;  %v996_v19 = vor.u32 %v1155_v14, %v993_v15  ;;  %v1158_v22 = vld [vmem:[%s1475_s12 + $0x64] sm:$0xf]  ;;  %v1001_v23 = vld [vmem:[%s1475_s12 + $0x70] sm:$0xf0]  ;;  %v1007_v24 = vld [vmem:[%s1475_s12 + $0x68] sm:$0xf]  ;;  %v1000_v28 = vor.u32 %v1160_v21, %v999_v20 }
  0x45   : > { %648 = vmatpush.bf16.msra.mxu1 %v1173_v33  ;;  %v1161_v25 = vld [vmem:[%s1475_s12 + $0x74] sm:$0xf0]  ;;  %v1159_v26 = vld [vmem:[%s1475_s12 + $0x6c] sm:$0xf]  ;;  %v1009_v27 = vld [vmem:[%s1475_s12 + $0x78] sm:$0xf0]  ;;  %v1004_v29 = vor.u32 %v1158_v22, %v1001_v23 }
  0x46   : > { %677 = vmatpush.bf16.msra.mxu2 %v1181_v34  ;;  %v1008_v30 = vor.u32 %v1161_v25, %v1007_v24  ;;  %v1012_v31 = vor.u32 %v1159_v26, %v1009_v27 }
  0x47   : > { %706 = vmatpush.bf16.msra.mxu3 %v1189_v35 }
  0x48   : > { %620 = vmatpush.bf16.msra.mxu0 %v1164_v36 }
  0x49   : > { %649 = vmatpush.bf16.msra.mxu1 %v1172_v37 }
  0x4a   : > { %678 = vmatpush.bf16.msra.mxu2 %v1180_v38 }
  0x4b   : > { %707 = vmatpush.bf16.msra.mxu3 %v1188_v39 }
  0x4c   : > { %621 = vmatpush.bf16.msra.mxu0 %v1163_v40 }
  0x4d   : > { %650 = vmatpush.bf16.msra.mxu1 %v1171_v41 }
  0x4e   : > { %679 = vmatpush.bf16.msra.mxu2 %v1179_v42 }
  0x4f   : > { %708 = vmatpush.bf16.msra.mxu3 %v1187_v43 }
  0x50   : > { %622 = vmatpush.bf16.msra.mxu0 %v1162_v44 }
  0x51   : > { %651 = vmatpush.bf16.msra.mxu1 %v1170_v45 }
  0x52   : > { %680 = vmatpush.bf16.msra.mxu2 %v1178_v46 }
  0x53   : > { %709 = vmatpush.bf16.msra.mxu3 %v1186_v47  ;;  %623 = vmatmul.bf16.vlgmr.msra.gmra.mxu0 %v952_v56 }
  0x54   : > { %652 = vmatmul.bf16.vlgmr.msra.gmra.mxu1 %v956_v57 }
  0x55   : > { %681 = vmatmul.bf16.vlgmr.msra.gmra.mxu2 %v960_v58 }
  0x56   : > { %710 = vmatmul.bf16.vlgmr.msra.gmra.mxu3 %v964_v59 }
  0x63   : > { %628 = vmatmul.bf16.gmra.mxu0 %v968_v4 }
  0x64   : > { %657 = vmatmul.bf16.gmra.mxu1 %v972_v5 }
  0x65   : > { %686 = vmatmul.bf16.gmra.mxu2 %v976_v6 }
  0x66   : > { %715 = vmatmul.bf16.gmra.mxu3 %v980_v7 }
  0x73   : > { %633 = vmatmul.bf16.gmra.mxu0 %v984_v16 }
  0x74   : > { %662 = vmatmul.bf16.gmra.mxu1 %v988_v17 }
  0x75   : > { %691 = vmatmul.bf16.gmra.mxu2 %v992_v18 }
  0x76   : > { %720 = vmatmul.bf16.gmra.mxu3 %v996_v19 }
  0x83   : > { %638 = vmatmul.bf16.gmra.mxu0 %v1000_v28 }
  0x84   : > { %667 = vmatmul.bf16.gmra.mxu1 %v1004_v29 }
  0x85   : > { %696 = vmatmul.bf16.gmra.mxu2 %v1008_v30 }
  0x86   : > { %725 = vmatmul.bf16.gmra.mxu3 %v1012_v31 }
  0xd0   : > { %v624_v32 = vpop.f32.mrf.mxu0 }
  0xd1   : > { %v653_v33 = vpop.f32.mrf.mxu1 }
  0xd2   : > { %v654_v34 = vadd.f32 %v653_v33, %v624_v32 }
  0xd8   : > { %v682_v35 = vpop.f32.mrf.mxu2  ;;  %v626_v38 = vpop.f32.mrf.mxu0 }
  0xd9   : > { %v711_v36 = vpop.f32.mrf.mxu3  ;;  %v683_v37 = vadd.f32 %v682_v35, %v654_v34  ;;  %v655_v39 = vpop.f32.mrf.mxu1 }
  0xda   : > { %v656_v41 = vadd.f32 %v655_v39, %v626_v38 }
  0xdb   : > { %v1509_v40 = vadd.f32 %v711_v36, %v683_v37 }
  0xe0   : > { %v684_v42 = vpop.f32.mrf.mxu2  ;;  %v629_v45 = vpop.f32.mrf.mxu0 }
  0xe1   : > { %v713_v43 = vpop.f32.mrf.mxu3  ;;  %v685_v44 = vadd.f32 %v684_v42, %v656_v41  ;;  %v658_v46 = vpop.f32.mrf.mxu1 }
  0xe2   : > { %v659_v48 = vadd.f32 %v658_v46, %v629_v45 }
  0xe3   : > { %v1511_v47 = vadd.f32 %v713_v43, %v685_v44 }
  0xe8   : > { %v687_v49 = vpop.f32.mrf.mxu2  ;;  %v631_v52 = vpop.f32.mrf.mxu0 }
  0xe9   : > { %v716_v50 = vpop.f32.mrf.mxu3  ;;  %v688_v51 = vadd.f32 %v687_v49, %v659_v48  ;;  %v660_v53 = vpop.f32.mrf.mxu1 }
  0xea   : > { %v661_v55 = vadd.f32 %v660_v53, %v631_v52 }
  0xeb   : > { %v1513_v54 = vadd.f32 %v716_v50, %v688_v51 }
  0xf0   : > { %v689_v56 = vpop.f32.mrf.mxu2  ;;  %v634_v59 = vpop.f32.mrf.mxu0 }
  0xf1   : > { %v718_v57 = vpop.f32.mrf.mxu3  ;;  %v690_v58 = vadd.f32 %v689_v56, %v661_v55  ;;  %v663_v60 = vpop.f32.mrf.mxu1 }
  0xf2   : > { %v664_v62 = vadd.f32 %v663_v60, %v634_v59 }
  0xf3   : > { %v1515_v61 = vadd.f32 %v718_v57, %v690_v58 }
  0xf8   : > { %v692_v63 = vpop.f32.mrf.mxu2  ;;  %v636_v2 = vpop.f32.mrf.mxu0 }
  0xf9   : > { %v721_v0 = vpop.f32.mrf.mxu3  ;;  %v693_v1 = vadd.f32 %v692_v63, %v664_v62  ;;  %v665_v3 = vpop.f32.mrf.mxu1 }
  0xfa   : > { %v666_v5 = vadd.f32 %v665_v3, %v636_v2 }
  0xfb   : > { %v1517_v4 = vadd.f32 %v721_v0, %v693_v1 }
 0x100   : > { %v694_v6 = vpop.f32.mrf.mxu2  ;;  %v639_v9 = vpop.f32.mrf.mxu0 }
 0x101   : > { %v723_v7 = vpop.f32.mrf.mxu3  ;;  %v695_v8 = vadd.f32 %v694_v6, %v666_v5  ;;  %v668_v10 = vpop.f32.mrf.mxu1 }
 0x102   : > { %v669_v12 = vadd.f32 %v668_v10, %v639_v9 }
 0x103   : > { %v1519_v11 = vadd.f32 %v723_v7, %v695_v8 }
 0x108   : > { %v697_v13 = vpop.f32.mrf.mxu2  ;;  %v641_v17 = vpop.f32.mrf.mxu0 }
 0x109   : > { %v726_v14 = vpop.f32.mrf.mxu3  ;;  %v698_v15 = vadd.f32 %v697_v13, %v669_v12  ;;  %v670_v18 = vpop.f32.mrf.mxu1 }
 0x10a   : > { %v671_v19 = vadd.f32 %v670_v18, %v641_v17 }
 0x10b   : > { %v1521_v16 = vadd.f32 %v726_v14, %v698_v15 }
 0x10f   : > { %734 = sbr.rel (%p1141_p12) target bundleno = 284 (0x11c), region = 59 }
 0x110   : > { %v699_v20 = vpop.f32.mrf.mxu2 }
 0x111   : > { %v700_v21 = vadd.f32 %v699_v20, %v671_v19  ;;  %v728_v22 = vpop.f32.mrf.mxu3 }
 0x113   : > { %v1523_v23 = vadd.f32 %v728_v22, %v700_v21 }
 0x114   : > { %735 = vst [vmem:[#allocation2 + $0x30] sm:$0xff] %v1509_v40 }
 0x115   : > { %736 = vst [vmem:[#allocation2] sm:$0xff] %v1511_v47 }
 0x116   : > { %737 = vst [vmem:[#allocation2 + $0x18] sm:$0xff] %v1513_v54 }
 0x117   : > { %738 = vst [vmem:[#allocation2 + $0x10] sm:$0xff] %v1515_v61 }
 0x118   : > { %739 = vst [vmem:[#allocation2 + $0x8] sm:$0xff] %v1517_v4 }
 0x119   : > { %740 = vst [vmem:[#allocation2 + $0x20] sm:$0xff] %v1519_v11 }
 0x11a   : > { %741 = vst [vmem:[#allocation2 + $0x28] sm:$0xff] %v1521_v16 }
 0x11b   : > { %742 = vst [vmem:[#allocation2 + $0x38] sm:$0xff] %v1523_v23 }
 0x11c PF: > { %p743_p13 = scmp.gt.s32.totalorder %s1312_s14, 0  ;;  %p744_p0 = scmp.lt.s32.totalorder %s1312_s14, 1 }
 0x11e   : > { %p745_p1 = pnand %p744_p0, %p743_p13 }
 0x120   : > { %748 = sbr.rel (%p745_p1) target bundleno = 304 (0x130), region = 63 }
 0x125   : > { %v749_v24 = vld [vmem:[#allocation2 + $0x30] sm:$0xff]  ;;  %v750_v25 = vld [vmem:[#allocation2] sm:$0xff]  ;;  %v751_v26 = vld [vmem:[#allocation2 + $0x18] sm:$0xff] }
 0x126   : > { %v757_v27 = vadd.f32 %v749_v24, %v1509_v40  ;;  %v758_v28 = vadd.f32 %v750_v25, %v1511_v47  ;;  %v759_v29 = vadd.f32 %v751_v26, %v1513_v54  ;;  %v752_v30 = vld [vmem:[#allocation2 + $0x10] sm:$0xff]  ;;  %v753_v31 = vld [vmem:[#allocation2 + $0x8] sm:$0xff]  ;;  %v754_v32 = vld [vmem:[#allocation2 + $0x20] sm:$0xff] }
 0x127   : > { %v760_v33 = vadd.f32 %v752_v30, %v1515_v61  ;;  %v755_v34 = vld [vmem:[#allocation2 + $0x28] sm:$0xff]  ;;  %v761_v35 = vadd.f32 %v753_v31, %v1517_v4  ;;  %v756_v36 = vld [vmem:[#allocation2 + $0x38] sm:$0xff]  ;;  %v762_v37 = vadd.f32 %v754_v32, %v1519_v11 }
 0x128   : > { %765 = vst [vmem:[#allocation2 + $0x30] sm:$0xff] %v757_v27  ;;  %v763_v38 = vadd.f32 %v755_v34, %v1521_v16  ;;  %v764_v39 = vadd.f32 %v756_v36, %v1523_v23 }
 0x129   : > { %766 = vst [vmem:[#allocation2] sm:$0xff] %v758_v28 }
 0x12a   : > { %767 = vst [vmem:[#allocation2 + $0x18] sm:$0xff] %v759_v29 }
 0x12b   : > { %768 = vst [vmem:[#allocation2 + $0x10] sm:$0xff] %v760_v33 }
 0x12c   : > { %769 = vst [vmem:[#allocation2 + $0x8] sm:$0xff] %v761_v35 }
 0x12d   : > { %770 = vst [vmem:[#allocation2 + $0x20] sm:$0xff] %v762_v37 }
 0x12e   : > { %771 = vst [vmem:[#allocation2 + $0x28] sm:$0xff] %v763_v38 }
 0x12f   : > { %772 = vst [vmem:[#allocation2 + $0x38] sm:$0xff] %v764_v39 }
 0x130 PF: > { %p1142_p2 = scmp.ne.s32.totalorder %s1312_s14, 1 }
 0x132   : > { %776 = sbr.rel (%p1142_p2) target bundleno = 329 (0x149), region = 67 }
 0x137   : > { %v777_v41 = vld [vmem:[#allocation2 + $0x30] sm:$0xff]  ;;  %v778_v42 = vld [vmem:[#allocation2] sm:$0xff]  ;;  %v779_v46 = vld [vmem:[#allocation2 + $0x18] sm:$0xff] }
 0x138   : > { %v785_v43 = vadd.f32 %v777_v41, %v1509_v40  ;;  %v786_v44 = vadd.f32 %v778_v42, %v1511_v47  ;;  %v1273_v45 = vld [vmem:[%s1583_s2] ss:$0 sm:$0xff]  ;;  %v780_v48 = vld [vmem:[#allocation2 + $0x10] sm:$0xff]  ;;  %v787_v49 = vadd.f32 %v779_v46, %v1513_v54  ;;  %v781_v51 = vld [vmem:[#allocation2 + $0x8] sm:$0xff] }
 0x139   : > { %v788_v50 = vadd.f32 %v780_v48, %v1515_v61  ;;  %v782_v52 = vld [vmem:[#allocation2 + $0x20] sm:$0xff]  ;;  %v783_v53 = vld [vmem:[#allocation2 + $0x28] sm:$0xff]  ;;  %v789_v57 = vadd.f32 %v781_v51, %v1517_v4  ;;  %v784_v47 = vld [vmem:[#allocation2 + $0x38] sm:$0xff] }
 0x13a   : > { %v797_v55 = vadd.f32 %v1273_v45, %v785_v43  ;;  %v798_v56 = vadd.f32 %v1273_v45, %v786_v44  ;;  %v790_v40 = vadd.f32 %v782_v52, %v1519_v11  ;;  %v799_v58 = vadd.f32 %v1273_v45, %v787_v49 }
 0x13b   : > { %v800_v59 = vadd.f32 %v1273_v45, %v788_v50  ;;  %v791_v60 = vadd.f32 %v783_v53, %v1521_v16  ;;  %v792_v62 = vadd.f32 %v784_v47, %v1523_v23  ;;  %v801_v3 = vadd.f32 %v1273_v45, %v789_v57 }
 0x13c   : > { %vm805_vm0 = vcmp.ge.f32.partialorder %v797_v55, 0.0  ;;  %vm806_vm1 = vcmp.ge.f32.partialorder %v798_v56, 0.0  ;;  %v813_v54 = vmul.f32 0.01, %v797_v55  ;;  %v814_v61 = vmul.f32 0.01, %v798_v56 }
 0x13d   : > { %vm807_vm2 = vcmp.ge.f32.partialorder %v799_v58, 0.0  ;;  %vm808_vm3 = vcmp.ge.f32.partialorder %v800_v59, 0.0  ;;  %v815_v63 = vmul.f32 0.01, %v799_v58  ;;  %v816_v0 = vmul.f32 0.01, %v800_v59 }
 0x13e   : > { %v821_v1 = vsel %vm805_vm0, %v797_v55, %v813_v54  ;;  %v822_v2 = vsel %vm806_vm1, %v798_v56, %v814_v61  ;;  %v802_v4 = vadd.f32 %v1273_v45, %v790_v40  ;;  %v803_v8 = vadd.f32 %v1273_v45, %v791_v60 }
 0x13f   : > { %v1197_v5 = vpack.c.bf16 %v822_v2, %v821_v1  ;;  %v823_v6 = vsel %vm807_vm2, %v799_v58, %v815_v63  ;;  %v824_v7 = vsel %vm808_vm3, %v800_v59, %v816_v0  ;;  %vm809_vm4 = vcmp.ge.f32.partialorder %v801_v3, 0.0 }
 0x140   : > { %v1202_v9 = vpack.c.bf16 %v824_v7, %v823_v6  ;;  %vm810_vm5 = vcmp.ge.f32.partialorder %v802_v4, 0.0  ;;  %v817_v10 = vmul.f32 0.01, %v801_v3  ;;  %v818_v11 = vmul.f32 0.01, %v802_v4 }
 0x141   : > { %1198 = vst [vmem:[%s1440_s27] sm:$0xff] %v1197_v5   ;;  %v804_v12 = vadd.f32 %v1273_v45, %v792_v62  ;;  %vm811_vm6 = vcmp.ge.f32.partialorder %v803_v8, 0.0  ;;  %v819_v13 = vmul.f32 0.01, %v803_v8 }
 0x142   : > { %1214 = vst [vmem:[%s1440_s27 + $0x8] sm:$0xff] %v1202_v9   ;;  %v825_v14 = vsel %vm809_vm4, %v801_v3, %v817_v10  ;;  %v826_v15 = vsel %vm810_vm5, %v802_v4, %v818_v11 }
 0x143   : > { %vm812_vm7 = vcmp.ge.f32.partialorder %v804_v12, 0.0  ;;  %v820_v16 = vmul.f32 0.01, %v804_v12  ;;  %v827_v17 = vsel %vm811_vm6, %v803_v8, %v819_v13  ;;  %v1207_v18 = vpack.c.bf16 %v826_v15, %v825_v14 }
 0x145   : > { %v828_v19 = vsel %vm812_vm7, %v804_v12, %v820_v16  ;;  %1215 = vst [vmem:[%s1440_s27 + $0x10] sm:$0xff] %v1207_v18  }
 0x146   : > { %v1212_v20 = vpack.c.bf16 %v828_v19, %v827_v17 }
 0x148   : > { %1216 = vst [vmem:[%s1440_s27 + $0x18] sm:$0xff] %v1212_v20  }
 0x149 PF: > { %s13_s18 = sadd.s32 1, %s1328_s18   ;;  %s1585_s12 = smov %s1308_s13 }
 0x14a   : > { %p10_p3 = scmp.ge.s32.totalorder %s13_s18, 6   ;;  %s1586_s13 = smov %s1401_s25 }
 0x14b   : > { %s1587_s14 = smov %s1320_s16  ;;  %s1588_s15 = smov %s1324_s17 }
 0x14c   : > { %s1589_s16 = smov %s1592_s19  ;;  %s1590_s17 = smov %s1596_s20 }
 0x14d   :  { %12 = sbr.rel (!%p10_p3) target bundleno = 4 (0x4), region = 105 }

// kernel: _lambda_.10
= control target key start
LH: loop header
LB: loop body
LE: loop exit
PB: predicated region body
PF: predicated region fallthrough
CT: control target
= control target key end

     0   :  { %s639_s1 = inlined_call_operand.vmem [shape: bf16[512,128], index: 1, kind: input, shape index: {}]   ;;  %s640_s2 = inlined_call_operand.vmem [shape: f32[1,128], index: 2, kind: input, shape index: {}]   ;;  %s641_s0 = inlined_call_operand.vmem [shape: bf16[8,512], index: 0, kind: input, shape index: {}]   ;;  %s642_s3 = inlined_call_operand.vmem [shape: f32[8,128], index: 3, kind: output, shape index: {}]  }
   0x1   :  { %v485_v0 = vld [vmem:[%s639_s1 + $0x38] sm:$0xff]  ;;  %v484_v4 = vld [vmem:[%s639_s1 + $0x30] sm:$0xff]  ;;  %v483_v8 = vld [vmem:[%s639_s1 + $0x28] sm:$0xff] }
   0x2   :  { %v493_v1 = vld [vmem:[%s639_s1 + $0x78] sm:$0xff]  ;;  %290 = vmatpush.bf16.msra.mxu0 %v485_v0  ;;  %v492_v5 = vld [vmem:[%s639_s1 + $0x70] sm:$0xff]  ;;  %v491_v9 = vld [vmem:[%s639_s1 + $0x68] sm:$0xff] }
   0x3   :  { %v501_v2 = vld [vmem:[%s639_s1 + $0xb8] sm:$0xff]  ;;  %303 = vmatpush.bf16.msra.mxu1 %v493_v1  ;;  %v500_v6 = vld [vmem:[%s639_s1 + $0xb0] sm:$0xff]  ;;  %v499_v10 = vld [vmem:[%s639_s1 + $0xa8] sm:$0xff] }
   0x4   :  { %v509_v3 = vld [vmem:[%s639_s1 + $0xf8] sm:$0xff]  ;;  %316 = vmatpush.bf16.msra.mxu2 %v501_v2  ;;  %v508_v7 = vld [vmem:[%s639_s1 + $0xf0] sm:$0xff]  ;;  %v507_v11 = vld [vmem:[%s639_s1 + $0xe8] sm:$0xff] }
   0x5   :  { %329 = vmatpush.bf16.msra.mxu3 %v509_v3  ;;  %v482_v12 = vld [vmem:[%s639_s1 + $0x20] sm:$0xff]  ;;  %v481_v16 = vld [vmem:[%s639_s1 + $0x18] sm:$0xff]  ;;  %v480_v20 = vld [vmem:[%s639_s1 + $0x10] sm:$0xff] }
   0x6   :  { %291 = vmatpush.bf16.msra.mxu0 %v484_v4  ;;  %v490_v13 = vld [vmem:[%s639_s1 + $0x60] sm:$0xff]  ;;  %v489_v17 = vld [vmem:[%s639_s1 + $0x58] sm:$0xff]  ;;  %v488_v21 = vld [vmem:[%s639_s1 + $0x50] sm:$0xff] }
   0x7   :  { %304 = vmatpush.bf16.msra.mxu1 %v492_v5  ;;  %v498_v14 = vld [vmem:[%s639_s1 + $0xa0] sm:$0xff]  ;;  %v497_v18 = vld [vmem:[%s639_s1 + $0x98] sm:$0xff]  ;;  %v496_v22 = vld [vmem:[%s639_s1 + $0x90] sm:$0xff] }
   0x8   :  { %317 = vmatpush.bf16.msra.mxu2 %v500_v6  ;;  %v506_v15 = vld [vmem:[%s639_s1 + $0xe0] sm:$0xff]  ;;  %v505_v19 = vld [vmem:[%s639_s1 + $0xd8] sm:$0xff]  ;;  %v504_v23 = vld [vmem:[%s639_s1 + $0xd0] sm:$0xff] }
   0x9   :  { %330 = vmatpush.bf16.msra.mxu3 %v508_v7  ;;  %v479_v24 = vld [vmem:[%s639_s1 + $0x8] sm:$0xff]  ;;  %v14_v26 = vld [vmem:[%s641_s0] sm:$0xff] }
   0xa   :  { %292 = vmatpush.bf16.msra.mxu0 %v483_v8  ;;  %v487_v25 = vld [vmem:[%s639_s1 + $0x48] sm:$0xff]  ;;  %v86_v30 = vunpack.c.l.b16 %v14_v26  ;;  %v87_v31 = vunpack.c.h.b16 %v14_v26  ;;  %v478_v32 = vld [vmem:[%s639_s1] sm:$0xff] }
   0xb   :  { %305 = vmatpush.bf16.msra.mxu1 %v491_v9  ;;  %v495_v27 = vld [vmem:[%s639_s1 + $0x88] sm:$0xff]  ;;  %v486_v33 = vld [vmem:[%s639_s1 + $0x40] sm:$0xff] }
   0xc   :  { %318 = vmatpush.bf16.msra.mxu2 %v499_v10  ;;  %v503_v28 = vld [vmem:[%s639_s1 + $0xc8] sm:$0xff]  ;;  %v494_v36 = vld [vmem:[%s639_s1 + $0x80] sm:$0xff]  ;;  %v90_v38 = vpack.c.b16 %v86_v30, %v86_v30  ;;  %v91_v39 = vpack.c.b16 %v87_v31, %v87_v31 }
   0xd   :  { %331 = vmatpush.bf16.msra.mxu3 %v507_v11  ;;  %v15_v29 = vld [vmem:[%s641_s0 + $0x8] sm:$0xff]  ;;  %v502_v37 = vld [vmem:[%s639_s1 + $0xc0] sm:$0xff] }
   0xe   :  { %293 = vmatpush.bf16.msra.mxu0 %v482_v12  ;;  %v88_v34 = vunpack.c.l.b16 %v15_v29  ;;  %v89_v35 = vunpack.c.h.b16 %v15_v29  ;;  %v510_v42 = vld [vmem:[%s640_s2] ss:$0 sm:$0xff] }
   0xf   :  { %306 = vmatpush.bf16.msra.mxu1 %v490_v13 }
  0x10   :  { %319 = vmatpush.bf16.msra.mxu2 %v498_v14  ;;  %v92_v40 = vpack.c.b16 %v88_v34, %v88_v34  ;;  %v93_v41 = vpack.c.b16 %v89_v35, %v89_v35 }
  0x11   :  { %332 = vmatpush.bf16.msra.mxu3 %v506_v15 }
  0x12   :  { %294 = vmatpush.bf16.msra.mxu0 %v481_v16 }
  0x13   :  { %307 = vmatpush.bf16.msra.mxu1 %v489_v17 }
  0x14   :  { %320 = vmatpush.bf16.msra.mxu2 %v497_v18 }
  0x15   :  { %333 = vmatpush.bf16.msra.mxu3 %v505_v19 }
  0x16   :  { %295 = vmatpush.bf16.msra.mxu0 %v480_v20 }
  0x17   :  { %308 = vmatpush.bf16.msra.mxu1 %v488_v21 }
  0x18   :  { %321 = vmatpush.bf16.msra.mxu2 %v496_v22 }
  0x19   :  { %334 = vmatpush.bf16.msra.mxu3 %v504_v23 }
  0x1a   :  { %296 = vmatpush.bf16.msra.mxu0 %v479_v24 }
  0x1b   :  { %309 = vmatpush.bf16.msra.mxu1 %v487_v25 }
  0x1c   :  { %322 = vmatpush.bf16.msra.mxu2 %v495_v27 }
  0x1d   :  { %335 = vmatpush.bf16.msra.mxu3 %v503_v28 }
  0x1e   :  { %297 = vmatpush.bf16.msra.mxu0 %v478_v32 }
  0x1f   :  { %310 = vmatpush.bf16.msra.mxu1 %v486_v33 }
  0x20   :  { %323 = vmatpush.bf16.msra.mxu2 %v494_v36 }
  0x21   :  { %336 = vmatpush.bf16.msra.mxu3 %v502_v37  ;;  %298 = vmatmul.bf16.vlgmr.msra.gmra.mxu0 %v90_v38 }
  0x22   :  { %311 = vmatmul.bf16.vlgmr.msra.gmra.mxu1 %v91_v39 }
  0x23   :  { %324 = vmatmul.bf16.vlgmr.msra.gmra.mxu2 %v92_v40 }
  0x24   :  { %337 = vmatmul.bf16.vlgmr.msra.gmra.mxu3 %v93_v41 }
  0x9e   :  { %v299_v43 = vpop.f32.mrf.mxu0 }
  0x9f   :  { %v312_v44 = vpop.f32.mrf.mxu1  ;;  %v300_v45 = vadd.f32 %v510_v42, %v299_v43 }
  0xa1   :  { %v313_v46 = vadd.f32 %v312_v44, %v300_v45 }
  0xa6   :  { %v325_v47 = vpop.f32.mrf.mxu2  ;;  %v301_v50 = vpop.f32.mrf.mxu0 }
  0xa7   :  { %v338_v48 = vpop.f32.mrf.mxu3  ;;  %v326_v49 = vadd.f32 %v325_v47, %v313_v46  ;;  %v314_v51 = vpop.f32.mrf.mxu1 }
  0xa9   :  { %v339_v52 = vadd.f32 %v338_v48, %v326_v49 }
  0xab   :  { %vm342_vm0 = vcmp.ge.f32.partialorder %v339_v52, 0.0  ;;  %v343_v53 = vmul.f32 0.01, %v339_v52 }
  0xad   :  { %v344_v54 = vsel %vm342_vm0, %v339_v52, %v343_v53 }
  0xae   :  { %345 = vst [vmem:[%s642_s3] sm:$0xff] %v344_v54  ;;  %v327_v55 = vpop.f32.mrf.mxu2 }
  0xaf   :  { %v340_v56 = vpop.f32.mrf.mxu3 }

// kernel: _lambda_.11
= control target key start
LH: loop header
LB: loop body
LE: loop exit
PB: predicated region body
PF: predicated region fallthrough
CT: control target
= control target key end

     0   :  { %s349_s1 = inlined_call_operand.vmem [shape: bf16[128,128], index: 1, kind: input, shape index: {}]   ;;  %s350_s3 = inlined_call_operand.vmem [shape: f32[128,128], index: 3, kind: input, shape index: {}]   ;;  %s351_s2 = inlined_call_operand.vmem [shape: f32[1,128], index: 2, kind: input, shape index: {}]   ;;  %s352_s0 = inlined_call_operand.vmem [shape: f32[8,128], index: 0, kind: input, shape index: {}]   ;;  %s353_s4 = inlined_call_operand.vmem [shape: f32[1,128], index: 4, kind: input, shape index: {}]   ;;  %s354_s5 = inlined_call_operand.vmem [shape: f32[8,128], index: 5, kind: output, shape index: {0}]   ;;  %s355_s6 = inlined_call_operand.vmem [shape: f32[8,128], index: 6, kind: output, shape index: {1}]  }
   0x1   :  { %v220_v0 = vld [vmem:[%s349_s1 + $0x38] sm:$0xff]  ;;  %v219_v1 = vld [vmem:[%s349_s1 + $0x30] sm:$0xff]  ;;  %v119_v4 = vld [vmem:[%s350_s3 + $0x68] sm:$0xff] }
   0x2   :  { %92 = vmatpush.bf16.msra.mxu0 %v220_v0  ;;  %v121_v2 = vld [vmem:[%s350_s3 + $0x78] sm:$0xff]  ;;  %v120_v3 = vld [vmem:[%s350_s3 + $0x70] sm:$0xff]  ;;  %v218_v5 = vld [vmem:[%s349_s1 + $0x28] sm:$0xff] }
   0x3   :  { %122 = vmatpush.msra.mxu1 %v121_v2  ;;  %v118_v6 = vld [vmem:[%s350_s3 + $0x60] sm:$0xff]  ;;  %v117_v7 = vld [vmem:[%s350_s3 + $0x58] sm:$0xff]  ;;  %v116_v9 = vld [vmem:[%s350_s3 + $0x50] sm:$0xff] }
   0x4   :  { %v217_v8 = vld [vmem:[%s349_s1 + $0x20] sm:$0xff]  ;;  %v115_v10 = vld [vmem:[%s350_s3 + $0x48] sm:$0xff]  ;;  %v216_v11 = vld [vmem:[%s349_s1 + $0x18] sm:$0xff] }
   0x5   :  { %123 = vmatpush.msra.mxu1 %v120_v3  ;;  %v114_v12 = vld [vmem:[%s350_s3 + $0x40] sm:$0xff]  ;;  %v113_v13 = vld [vmem:[%s350_s3 + $0x38] sm:$0xff]  ;;  %v215_v14 = vld [vmem:[%s349_s1 + $0x10] sm:$0xff] }
   0x6   :  { %93 = vmatpush.bf16.msra.mxu0 %v219_v1  ;;  %v112_v15 = vld [vmem:[%s350_s3 + $0x30] sm:$0xff]  ;;  %v111_v16 = vld [vmem:[%s350_s3 + $0x28] sm:$0xff]  ;;  %v110_v18 = vld [vmem:[%s350_s3 + $0x20] sm:$0xff] }
   0x7   :  { %124 = vmatpush.msra.mxu1 %v119_v4  ;;  %v214_v17 = vld [vmem:[%s349_s1 + $0x8] sm:$0xff]  ;;  %v109_v19 = vld [vmem:[%s350_s3 + $0x18] sm:$0xff]  ;;  %v213_v20 = vld [vmem:[%s349_s1] sm:$0xff] }
   0x8   :  { %v22_v21 = vld [vmem:[%s352_s0] sm:$0xff]  ;;  %v108_v22 = vld [vmem:[%s350_s3 + $0x10] sm:$0xff]  ;;  %v107_v24 = vld [vmem:[%s350_s3 + $0x8] sm:$0xff] }
   0x9   :  { %125 = vmatpush.msra.mxu1 %v118_v6  ;;  %v23_v23 = vpack.c.bf16 %v22_v21, %v22_v21  ;;  %v106_v25 = vld [vmem:[%s350_s3] sm:$0xff] }
   0xa   :  { %94 = vmatpush.bf16.msra.mxu0 %v218_v5  ;;  %v221_v26 = vld [vmem:[%s351_s2] ss:$0 sm:$0xff] }
   0xb   :  { %126 = vmatpush.msra.mxu1 %v117_v7  ;;  %v222_v33 = vld [vmem:[%s353_s4] ss:$0 sm:$0xff] }
   0xd   :  { %127 = vmatpush.msra.mxu1 %v116_v9 }
   0xe   :  { %95 = vmatpush.bf16.msra.mxu0 %v217_v8 }
   0xf   :  { %128 = vmatpush.msra.mxu1 %v115_v10 }
  0x11   :  { %129 = vmatpush.msra.mxu1 %v114_v12 }
  0x12   :  { %96 = vmatpush.bf16.msra.mxu0 %v216_v11 }
  0x13   :  { %130 = vmatpush.msra.mxu1 %v113_v13 }
  0x15   :  { %131 = vmatpush.msra.mxu1 %v112_v15 }
  0x16   :  { %97 = vmatpush.bf16.msra.mxu0 %v215_v14 }
  0x17   :  { %132 = vmatpush.msra.mxu1 %v111_v16 }
  0x19   :  { %133 = vmatpush.msra.mxu1 %v110_v18 }
  0x1a   :  { %98 = vmatpush.bf16.msra.mxu0 %v214_v17 }
  0x1b   :  { %134 = vmatpush.msra.mxu1 %v109_v19 }
  0x1d   :  { %135 = vmatpush.msra.mxu1 %v108_v22 }
  0x1e   :  { %99 = vmatpush.bf16.msra.mxu0 %v213_v20 }
  0x1f   :  { %136 = vmatpush.msra.mxu1 %v107_v24 }
  0x21   :  { %100 = vmatmul.bf16.vlgmr.msra.gmra.mxu0 %v23_v23  ;;  %137 = vmatpush.msra.mxu1 %v106_v25 }
  0x9e   :  { %v101_v27 = vpop.f32.mrf.mxu0 }
  0x9f   :  { %v102_v28 = vadd.f32 %v221_v26, %v101_v27 }
  0xa1   :  { %105 = vst [vmem:[%s354_s5] sm:$0xff] %v102_v28  ;;  %138 = vmatmul.f32.vlgmr.msra.gmra.mxu1 %v102_v28  ;;  %v142_v29 = vmul.f32 %v102_v28, %v102_v28 }
  0xa3   :  { %143 = vadd.xlane.f32.xlu0 %v142_v29 }
  0xa6   :  { %v103_v30 = vpop.f32.mrf.mxu0 }
 0x116   :  { %v144_v34 = vpop.xlane.xlu0 %143 }
 0x11e   :  { %v139_v31 = vpop.f32.mrf.mxu1 }
 0x11f   :  { %v145_v32 = vmul.f32 2.0, %v139_v31 }
 0x121   :  { %v146_v35 = vsub.f32 %v144_v34, %v145_v32 }
 0x123   :  { %v151_v36 = vadd.f32 %v222_v33, %v146_v35 }
 0x125   :  { %v152_v37 = vmax.f32 %v151_v36, 0.0 }
 0x127   :  { %v153_v38 = vadd.f32 1.0, %v152_v37 }
 0x129   :  { %223 = vrcp.f32 %v153_v38 }
 0x12f   :  { %v224_v39 = vpop.eup %223 }
 0x130   :  { %155 = vadd.xlane.f32.xlu0 %v224_v39 }
 0x1a3   :  { %v156_v40 = vpop.xlane.xlu0 %155 }
 0x1a4   :  { %225 = vrcp.f32 %v156_v40  ;;  %v168_v44 = vand.u32 2147483648, %v156_v40  ;;  %v166_v46 = vand.u32 2147483647, %v156_v40  ;;  %vm162_vm1 = vweird.f32 %v156_v40 }
 0x1a6   :  { %v169_v48 = vor.u32 1.1754944e-38, %v168_v44  ;;  %vm167_vm3 = vcmp.eq.f32.partialorder %v166_v46, 8.507059e+37 }
 0x1aa   :  { %v226_v41 = vpop.eup %225 }
 0x1ab   :  { %v158_v42 = vmul.f32 %v226_v41, %v156_v40  ;;  %vm163_vm0 = vweird.f32 %v226_v41 }
 0x1ac   :  { %vm164_vm2 = vmor %vm162_vm1, %vm163_vm0 }
 0x1ad   :  { %v159_v43 = vsub.f32 1.0, %v158_v42 }
 0x1af   :  { %v160_v45 = vmul.f32 %v226_v41, %v159_v43 }
 0x1b1   :  { %v161_v47 = vadd.f32 %v226_v41, %v160_v45 }
 0x1b3   :  { %v165_v49 = vsel %vm164_vm2, %v226_v41, %v161_v47 }
 0x1b4   :  { %v170_v50 = vsel %vm167_vm3, %v169_v48, %v165_v49 }
 0x1b5   :  { %v171_v51 = vmul.f32 %v224_v39, %v170_v50 }
 0x1b7   :  { %172 = vst [vmem:[%s355_s6] sm:$0xff] %v171_v51 }

// kernel: _lambda_.12
= control target key start
LH: loop header
LB: loop body
LE: loop exit
PB: predicated region body
PF: predicated region fallthrough
CT: control target
= control target key end

     0   :  { %s200_s1 = inlined_call_operand.vmem [shape: bf16[128,128], index: 1, kind: input, shape index: {}]   ;;  %s201_s2 = inlined_call_operand.vmem [shape: f32[1,128], index: 2, kind: input, shape index: {}]   ;;  %s202_s0 = inlined_call_operand.vmem [shape: f32[8,128], index: 0, kind: input, shape index: {}]   ;;  %s203_s3 = inlined_call_operand.vmem [shape: bf16[8,128], index: 3, kind: output, shape index: {}]  }
   0x1   :  { %v145_v0 = vld [vmem:[%s200_s1 + $0x38] sm:$0xff]  ;;  %v144_v1 = vld [vmem:[%s200_s1 + $0x30] sm:$0xff]  ;;  %v143_v2 = vld [vmem:[%s200_s1 + $0x28] sm:$0xff] }
   0x2   :  { %84 = vmatpush.bf16.msra.mxu0 %v145_v0  ;;  %v142_v3 = vld [vmem:[%s200_s1 + $0x20] sm:$0xff]  ;;  %v141_v4 = vld [vmem:[%s200_s1 + $0x18] sm:$0xff]  ;;  %v140_v5 = vld [vmem:[%s200_s1 + $0x10] sm:$0xff] }
   0x3   :  { %v139_v6 = vld [vmem:[%s200_s1 + $0x8] sm:$0xff]  ;;  %v138_v7 = vld [vmem:[%s200_s1] sm:$0xff] }
   0x4   :  { %v14_v8 = vld [vmem:[%s202_s0] sm:$0xff] }
   0x5   :  { %v15_v9 = vpack.c.bf16 %v14_v8, %v14_v8  ;;  %v146_v10 = vld [vmem:[%s201_s2] ss:$0 sm:$0xff] }
   0x6   :  { %85 = vmatpush.bf16.msra.mxu0 %v144_v1 }
   0xa   :  { %86 = vmatpush.bf16.msra.mxu0 %v143_v2 }
   0xe   :  { %87 = vmatpush.bf16.msra.mxu0 %v142_v3 }
  0x12   :  { %88 = vmatpush.bf16.msra.mxu0 %v141_v4 }
  0x16   :  { %89 = vmatpush.bf16.msra.mxu0 %v140_v5 }
  0x1a   :  { %90 = vmatpush.bf16.msra.mxu0 %v139_v6 }
  0x1e   :  { %91 = vmatpush.bf16.msra.mxu0 %v138_v7 }
  0x21   :  { %92 = vmatmul.bf16.vlgmr.msra.gmra.mxu0 %v15_v9 }
  0x9e   :  { %v93_v11 = vpop.f32.mrf.mxu0 }
  0x9f   :  { %v94_v12 = vadd.f32 %v146_v10, %v93_v11 }
  0xa1   :  { %vm97_vm0 = vcmp.ge.f32.partialorder %v94_v12, 0.0  ;;  %v98_v13 = vmul.f32 0.01, %v94_v12 }
  0xa3   :  { %v99_v14 = vsel %vm97_vm0, %v94_v12, %v98_v13 }
  0xa4   :  { %v100_v15 = vpack.c.bf16 %v99_v14, %v99_v14 }
  0xa6   :  { %101 = vst [vmem:[%s203_s3] sm:$0xf] %v100_v15  ;;  %v95_v16 = vpop.f32.mrf.mxu0 }

// kernel: _lambda_.13
= control target key start
LH: loop header
LB: loop body
LE: loop exit
PB: predicated region body
PF: predicated region fallthrough
CT: control target
= control target key end

     0   :  { %s382_s1 = inlined_call_operand.vmem [shape: bf16[256,128], index: 1, kind: input, shape index: {}]   ;;  %s383_s2 = inlined_call_operand.vmem [shape: f32[1,128], index: 2, kind: input, shape index: {}]   ;;  %s384_s0 = inlined_call_operand.vmem [shape: bf16[16,256], index: 0, kind: input, shape index: {}]   ;;  %s385_s3 = inlined_call_operand.vmem [shape: bf16[16,128], index: 3, kind: output, shape index: {}]  }
   0x1   :  { %v281_v0 = vld [vmem:[%s382_s1 + $0x38] sm:$0xff]  ;;  %v280_v2 = vld [vmem:[%s382_s1 + $0x30] sm:$0xff]  ;;  %v279_v4 = vld [vmem:[%s382_s1 + $0x28] sm:$0xff] }
   0x2   :  { %v289_v1 = vld [vmem:[%s382_s1 + $0x78] sm:$0xff]  ;;  %158 = vmatpush.bf16.msra.mxu0 %v281_v0  ;;  %v288_v3 = vld [vmem:[%s382_s1 + $0x70] sm:$0xff]  ;;  %v287_v5 = vld [vmem:[%s382_s1 + $0x68] sm:$0xff] }
   0x3   :  { %172 = vmatpush.bf16.msra.mxu1 %v289_v1  ;;  %v278_v6 = vld [vmem:[%s382_s1 + $0x20] sm:$0xff]  ;;  %v277_v8 = vld [vmem:[%s382_s1 + $0x18] sm:$0xff]  ;;  %v276_v10 = vld [vmem:[%s382_s1 + $0x10] sm:$0xff] }
   0x4   :  { %v286_v7 = vld [vmem:[%s382_s1 + $0x60] sm:$0xff]  ;;  %v285_v9 = vld [vmem:[%s382_s1 + $0x58] sm:$0xff]  ;;  %v284_v11 = vld [vmem:[%s382_s1 + $0x50] sm:$0xff] }
   0x5   :  { %v275_v12 = vld [vmem:[%s382_s1 + $0x8] sm:$0xff]  ;;  %v274_v14 = vld [vmem:[%s382_s1] sm:$0xff] }
   0x6   :  { %159 = vmatpush.bf16.msra.mxu0 %v280_v2  ;;  %v283_v13 = vld [vmem:[%s382_s1 + $0x48] sm:$0xff]  ;;  %v282_v15 = vld [vmem:[%s382_s1 + $0x40] sm:$0xff] }
   0x7   :  { %173 = vmatpush.bf16.msra.mxu1 %v288_v3  ;;  %v202_v16 = vld [vmem:[%s384_s0] sm:$0xf]  ;;  %v273_v17 = vld [vmem:[%s384_s0 + $0x4] sm:$0xf0]  ;;  %v272_v18 = vld [vmem:[%s384_s0 + $0x4] sm:$0xf] }
   0x8   :  { %v204_v19 = vld [vmem:[%s384_s0 + $0x8] sm:$0xf0]  ;;  %v203_v20 = vor.u32 %v273_v17, %v202_v16  ;;  %v295_v22 = vld [vmem:[%s383_s2] ss:$0 sm:$0xff] }
   0x9   :  { %v207_v21 = vor.u32 %v272_v18, %v204_v19 }
   0xa   :  { %160 = vmatpush.bf16.msra.mxu0 %v279_v4 }
   0xb   :  { %174 = vmatpush.bf16.msra.mxu1 %v287_v5 }
   0xe   :  { %161 = vmatpush.bf16.msra.mxu0 %v278_v6 }
   0xf   :  { %175 = vmatpush.bf16.msra.mxu1 %v286_v7 }
  0x12   :  { %162 = vmatpush.bf16.msra.mxu0 %v277_v8 }
  0x13   :  { %176 = vmatpush.bf16.msra.mxu1 %v285_v9 }
  0x16   :  { %163 = vmatpush.bf16.msra.mxu0 %v276_v10 }
  0x17   :  { %177 = vmatpush.bf16.msra.mxu1 %v284_v11 }
  0x1a   :  { %164 = vmatpush.bf16.msra.mxu0 %v275_v12 }
  0x1b   :  { %178 = vmatpush.bf16.msra.mxu1 %v283_v13 }
  0x1e   :  { %165 = vmatpush.bf16.msra.mxu0 %v274_v14 }
  0x1f   :  { %179 = vmatpush.bf16.msra.mxu1 %v282_v15 }
  0x21   :  { %166 = vmatmul.bf16.vlgmr.msra.gmra.mxu0 %v203_v20 }
  0x22   :  { %180 = vmatmul.bf16.vlgmr.msra.gmra.mxu1 %v207_v21 }
  0x9e   :  { %v167_v23 = vpop.f32.mrf.mxu0 }
  0x9f   :  { %v181_v24 = vpop.f32.mrf.mxu1  ;;  %v168_v25 = vadd.f32 %v295_v22, %v167_v23 }
  0xa1   :  { %v182_v26 = vadd.f32 %v181_v24, %v168_v25 }
  0xa3   :  { %v188_v30 = vmul.f32 0.01, %v182_v26  ;;  %vm186_vm0 = vcmp.ge.f32.partialorder %v182_v26, 0.0 }
  0xa5   :  { %v190_v33 = vsel %vm186_vm0, %v182_v26, %v188_v30 }
  0xa6   :  { %v169_v27 = vpop.f32.mrf.mxu0 }
  0xa7   :  { %v170_v28 = vadd.f32 %v295_v22, %v169_v27  ;;  %v183_v29 = vpop.f32.mrf.mxu1 }
  0xa9   :  { %v184_v31 = vadd.f32 %v183_v29, %v170_v28 }
  0xab   :  { %vm187_vm1 = vcmp.ge.f32.partialorder %v184_v31, 0.0  ;;  %v189_v32 = vmul.f32 0.01, %v184_v31 }
  0xad   :  { %v191_v34 = vsel %vm187_vm1, %v184_v31, %v189_v32 }
  0xae   :  { %v293_v35 = vpack.c.bf16 %v191_v34, %v190_v33 }
  0xb0   :  { %294 = vst [vmem:[%s385_s3] sm:$0xff] %v293_v35  }

// kernel: _lambda_.14
= control target key start
LH: loop header
LB: loop body
LE: loop exit
PB: predicated region body
PF: predicated region fallthrough
CT: control target
= control target key end

     0   :  { %s1171_s12 = smov 0   ;;  %s1173_s13 = smov 0   ;;  %s1360_s0 = inlined_call_operand.vmem [shape: bf16[128,512], index: 0, kind: input, shape index: {}]   ;;  %s1361_s1 = inlined_call_operand.vmem [shape: bf16[512,128], index: 1, kind: input, shape index: {}]   ;;  %s1362_s2 = inlined_call_operand.vmem [shape: f32[1,128], index: 2, kind: input, shape index: {}]   ;;  %s1363_s3 = inlined_call_operand.vmem [shape: bf16[128,128], index: 3, kind: output, shape index: {}]  }
   0x1   :  { %s1175_s14 = smov 0  }
   0x2 LB: > { %s25_s15 = sadd.s32 1, %s1145_s13  ;;  %p830_p0 = scmp.ge.s32.totalorder %s1149_s14, 1  ;;  %s1149_s14 = sphi %s1175_s14, %s13_s14   ;;  %s1145_s13 = sphi %s1173_s13, %s1365_s13   ;;  %s1141_s12 = sphi %s1171_s12, %s1364_s12  }
   0x3   : > { %p27_p1 = scmp.ge.s32.totalorder %s25_s15, 2  ;;  %p169_p2 = scmp.lt.s32.totalorder %s1149_s14, 3 }
   0x5   : > { %s1367_s15 = smov (%p27_p1, %s25_s15), 0  ;;  %p170_p3 = pnand %p830_p0, %p169_p2 }
   0x6   : > { %s831_s17 = sshll.u32 (!%p170_p3), %s1141_s12, 3 }
   0x7   : > { %173 = sbr.rel (%p170_p3) target bundleno = 244 (0xf4), region = 32  ;;  %p205_p4 = scmp.lt.s32.totalorder (!%p170_p3), %s831_s17, 15 }
   0xc   : > { %v1054_v0 = vld [vmem:[%s1361_s1 + $0x38] sm:$0xff]  ;;  %v1053_v4 = vld [vmem:[%s1361_s1 + $0x30] sm:$0xff]  ;;  %v1052_v8 = vld [vmem:[%s1361_s1 + $0x28] sm:$0xff]  ;;  %s1369_s17 = smov (!%p205_p4, %s831_s17), 15 }
   0xd   : > { %v1062_v1 = vld [vmem:[%s1361_s1 + $0x78] sm:$0xff]  ;;  %583 = vmatpush.bf16.msra.mxu0 %v1054_v0  ;;  %v1061_v5 = vld [vmem:[%s1361_s1 + $0x70] sm:$0xff]  ;;  %v1060_v9 = vld [vmem:[%s1361_s1 + $0x68] sm:$0xff]  ;;  %s1030_s19 = sshll.u32 %s1369_s17, 4  ;;  %s835_s18 = sshll.u32 %s1369_s17, 2 }
   0xe   : > { %v1070_v2 = vld [vmem:[%s1361_s1 + $0xb8] sm:$0xff]  ;;  %612 = vmatpush.bf16.msra.mxu1 %v1062_v1  ;;  %v1069_v6 = vld [vmem:[%s1361_s1 + $0xb0] sm:$0xff]  ;;  %v1068_v10 = vld [vmem:[%s1361_s1 + $0xa8] sm:$0xff]  ;;  %s1276_s12 = scalar_lea.vmem %s1360_s0, %s1030_s19  ;;  %s1340_s21 = scalar_lea.vmem %s1363_s3, %s835_s18 }
   0xf   : > { %v1078_v3 = vld [vmem:[%s1361_s1 + $0xf8] sm:$0xff]  ;;  %641 = vmatpush.bf16.msra.mxu2 %v1070_v2  ;;  %v1077_v7 = vld [vmem:[%s1361_s1 + $0xf0] sm:$0xff]  ;;  %v1076_v11 = vld [vmem:[%s1361_s1 + $0xe8] sm:$0xff] }
  0x10   : > { %670 = vmatpush.bf16.msra.mxu3 %v1078_v3  ;;  %v1051_v12 = vld [vmem:[%s1361_s1 + $0x20] sm:$0xff]  ;;  %v1050_v16 = vld [vmem:[%s1361_s1 + $0x18] sm:$0xff]  ;;  %v1049_v20 = vld [vmem:[%s1361_s1 + $0x10] sm:$0xff] }
  0x11   : > { %584 = vmatpush.bf16.msra.mxu0 %v1053_v4  ;;  %v1059_v13 = vld [vmem:[%s1361_s1 + $0x60] sm:$0xff]  ;;  %v1058_v17 = vld [vmem:[%s1361_s1 + $0x58] sm:$0xff]  ;;  %v1057_v21 = vld [vmem:[%s1361_s1 + $0x50] sm:$0xff] }
  0x12   : > { %613 = vmatpush.bf16.msra.mxu1 %v1061_v5  ;;  %v1067_v14 = vld [vmem:[%s1361_s1 + $0xa0] sm:$0xff]  ;;  %v1066_v18 = vld [vmem:[%s1361_s1 + $0x98] sm:$0xff]  ;;  %v1065_v22 = vld [vmem:[%s1361_s1 + $0x90] sm:$0xff] }
  0x13   : > { %642 = vmatpush.bf16.msra.mxu2 %v1069_v6  ;;  %v1075_v15 = vld [vmem:[%s1361_s1 + $0xe0] sm:$0xff]  ;;  %v1074_v19 = vld [vmem:[%s1361_s1 + $0xd8] sm:$0xff]  ;;  %v1073_v23 = vld [vmem:[%s1361_s1 + $0xd0] sm:$0xff] }
  0x14   : > { %671 = vmatpush.bf16.msra.mxu3 %v1077_v7  ;;  %v1048_v24 = vld [vmem:[%s1361_s1 + $0x8] sm:$0xff]  ;;  %v1047_v28 = vld [vmem:[%s1361_s1] sm:$0xff]  ;;  %v1033_v33 = vld [vmem:[%s1276_s12 + $0xc] sm:$0xf0] }
  0x15   : > { %585 = vmatpush.bf16.msra.mxu0 %v1052_v8  ;;  %v1056_v25 = vld [vmem:[%s1361_s1 + $0x48] sm:$0xff]  ;;  %v1055_v29 = vld [vmem:[%s1361_s1 + $0x40] sm:$0xff]  ;;  %v840_v35 = vld [vmem:[%s1276_s12 + $0x10] sm:$0xf0] }
  0x16   : > { %614 = vmatpush.bf16.msra.mxu1 %v1060_v9  ;;  %v1064_v26 = vld [vmem:[%s1361_s1 + $0x88] sm:$0xff]  ;;  %v1063_v30 = vld [vmem:[%s1361_s1 + $0x80] sm:$0xff]  ;;  %v1034_v37 = vld [vmem:[%s1276_s12 + $0x14] sm:$0xf0] }
  0x17   : > { %643 = vmatpush.bf16.msra.mxu2 %v1068_v10  ;;  %v1072_v27 = vld [vmem:[%s1361_s1 + $0xc8] sm:$0xff]  ;;  %v1071_v31 = vld [vmem:[%s1361_s1 + $0xc0] sm:$0xff]  ;;  %v848_v39 = vld [vmem:[%s1276_s12 + $0x18] sm:$0xf0] }
  0x18   : > { %672 = vmatpush.bf16.msra.mxu3 %v1076_v11  ;;  %v838_v32 = vld [vmem:[%s1276_s12] sm:$0xf]  ;;  %v1031_v34 = vld [vmem:[%s1276_s12 + $0x4] sm:$0xf]  ;;  %v846_v36 = vld [vmem:[%s1276_s12 + $0x8] sm:$0xf] }
  0x19   : > { %586 = vmatpush.bf16.msra.mxu0 %v1051_v12  ;;  %v1032_v38 = vld [vmem:[%s1276_s12 + $0xc] sm:$0xf]  ;;  %v839_v40 = vor.u32 %v1033_v33, %v838_v32  ;;  %v843_v41 = vor.u32 %v1031_v34, %v840_v35  ;;  %v847_v42 = vor.u32 %v1034_v37, %v846_v36  ;;  %v854_v44 = vld [vmem:[%s1276_s12 + $0x20] sm:$0xf]  ;;  %v1037_v45 = vld [vmem:[%s1276_s12 + $0x2c] sm:$0xf0] }
  0x1a   : > { %615 = vmatpush.bf16.msra.mxu1 %v1059_v13  ;;  %v851_v43 = vor.u32 %v1032_v38, %v848_v39  ;;  %v1035_v46 = vld [vmem:[%s1276_s12 + $0x24] sm:$0xf]  ;;  %v856_v47 = vld [vmem:[%s1276_s12 + $0x30] sm:$0xf0]  ;;  %v862_v48 = vld [vmem:[%s1276_s12 + $0x28] sm:$0xf]  ;;  %v855_v52 = vor.u32 %v1037_v45, %v854_v44 }
  0x1b   : > { %644 = vmatpush.bf16.msra.mxu2 %v1067_v14  ;;  %v1038_v49 = vld [vmem:[%s1276_s12 + $0x34] sm:$0xf0]  ;;  %v1036_v50 = vld [vmem:[%s1276_s12 + $0x2c] sm:$0xf]  ;;  %v864_v51 = vld [vmem:[%s1276_s12 + $0x38] sm:$0xf0]  ;;  %v859_v53 = vor.u32 %v1035_v46, %v856_v47 }
  0x1c   : > { %673 = vmatpush.bf16.msra.mxu3 %v1075_v15  ;;  %v863_v54 = vor.u32 %v1038_v49, %v862_v48  ;;  %v867_v55 = vor.u32 %v1036_v50, %v864_v51  ;;  %v870_v56 = vld [vmem:[%s1276_s12 + $0x40] sm:$0xf]  ;;  %v1041_v57 = vld [vmem:[%s1276_s12 + $0x4c] sm:$0xf0]  ;;  %v1039_v58 = vld [vmem:[%s1276_s12 + $0x44] sm:$0xf] }
  0x1d   : > { %587 = vmatpush.bf16.msra.mxu0 %v1050_v16  ;;  %v872_v59 = vld [vmem:[%s1276_s12 + $0x50] sm:$0xf0]  ;;  %v878_v60 = vld [vmem:[%s1276_s12 + $0x48] sm:$0xf]  ;;  %v1042_v61 = vld [vmem:[%s1276_s12 + $0x54] sm:$0xf0]  ;;  %v871_v0 = vor.u32 %v1041_v57, %v870_v56 }
  0x1e   : > { %616 = vmatpush.bf16.msra.mxu1 %v1058_v17  ;;  %v1040_v62 = vld [vmem:[%s1276_s12 + $0x4c] sm:$0xf]  ;;  %v880_v63 = vld [vmem:[%s1276_s12 + $0x58] sm:$0xf0]  ;;  %v875_v1 = vor.u32 %v1039_v58, %v872_v59  ;;  %v879_v2 = vor.u32 %v1042_v61, %v878_v60  ;;  %v886_v4 = vld [vmem:[%s1276_s12 + $0x60] sm:$0xf] }
  0x1f   : > { %645 = vmatpush.bf16.msra.mxu2 %v1066_v18  ;;  %v883_v3 = vor.u32 %v1040_v62, %v880_v63  ;;  %v1045_v5 = vld [vmem:[%s1276_s12 + $0x6c] sm:$0xf0]  ;;  %v1043_v6 = vld [vmem:[%s1276_s12 + $0x64] sm:$0xf]  ;;  %v888_v7 = vld [vmem:[%s1276_s12 + $0x70] sm:$0xf0] }
  0x20   : > { %674 = vmatpush.bf16.msra.mxu3 %v1074_v19  ;;  %v894_v8 = vld [vmem:[%s1276_s12 + $0x68] sm:$0xf]  ;;  %v1046_v9 = vld [vmem:[%s1276_s12 + $0x74] sm:$0xf0]  ;;  %v1044_v10 = vld [vmem:[%s1276_s12 + $0x6c] sm:$0xf]  ;;  %v887_v12 = vor.u32 %v1045_v5, %v886_v4  ;;  %v891_v13 = vor.u32 %v1043_v6, %v888_v7 }
  0x21   : > { %588 = vmatpush.bf16.msra.mxu0 %v1049_v20  ;;  %v896_v11 = vld [vmem:[%s1276_s12 + $0x78] sm:$0xf0]  ;;  %v895_v14 = vor.u32 %v1046_v9, %v894_v8  ;;  %v1331_v16 = vld [vmem:[%s1362_s2] ss:$0 sm:$0xff] }
  0x22   : > { %617 = vmatpush.bf16.msra.mxu1 %v1057_v21  ;;  %v899_v15 = vor.u32 %v1044_v10, %v896_v11 }
  0x23   : > { %646 = vmatpush.bf16.msra.mxu2 %v1065_v22 }
  0x24   : > { %675 = vmatpush.bf16.msra.mxu3 %v1073_v23 }
  0x25   : > { %589 = vmatpush.bf16.msra.mxu0 %v1048_v24 }
  0x26   : > { %618 = vmatpush.bf16.msra.mxu1 %v1056_v25 }
  0x27   : > { %647 = vmatpush.bf16.msra.mxu2 %v1064_v26 }
  0x28   : > { %676 = vmatpush.bf16.msra.mxu3 %v1072_v27 }
  0x29   : > { %590 = vmatpush.bf16.msra.mxu0 %v1047_v28 }
  0x2a   : > { %619 = vmatpush.bf16.msra.mxu1 %v1055_v29 }
  0x2b   : > { %648 = vmatpush.bf16.msra.mxu2 %v1063_v30 }
  0x2c   : > { %677 = vmatpush.bf16.msra.mxu3 %v1071_v31  ;;  %591 = vmatmul.bf16.vlgmr.msra.gmra.mxu0 %v839_v40 }
  0x2d   : > { %620 = vmatmul.bf16.vlgmr.msra.gmra.mxu1 %v843_v41 }
  0x2e   : > { %649 = vmatmul.bf16.vlgmr.msra.gmra.mxu2 %v847_v42 }
  0x2f   : > { %678 = vmatmul.bf16.vlgmr.msra.gmra.mxu3 %v851_v43 }
  0x3c   : > { %596 = vmatmul.bf16.gmra.mxu0 %v855_v52 }
  0x3d   : > { %625 = vmatmul.bf16.gmra.mxu1 %v859_v53 }
  0x3e   : > { %654 = vmatmul.bf16.gmra.mxu2 %v863_v54 }
  0x3f   : > { %683 = vmatmul.bf16.gmra.mxu3 %v867_v55 }
  0x4c   : > { %601 = vmatmul.bf16.gmra.mxu0 %v871_v0 }
  0x4d   : > { %630 = vmatmul.bf16.gmra.mxu1 %v875_v1 }
  0x4e   : > { %659 = vmatmul.bf16.gmra.mxu2 %v879_v2 }
  0x4f   : > { %688 = vmatmul.bf16.gmra.mxu3 %v883_v3 }
  0x5c   : > { %606 = vmatmul.bf16.gmra.mxu0 %v887_v12 }
  0x5d   : > { %635 = vmatmul.bf16.gmra.mxu1 %v891_v13 }
  0x5e   : > { %664 = vmatmul.bf16.gmra.mxu2 %v895_v14 }
  0x5f   : > { %693 = vmatmul.bf16.gmra.mxu3 %v899_v15 }
  0xa9   : > { %v592_v17 = vpop.f32.mrf.mxu0 }
  0xaa   : > { %v621_v18 = vpop.f32.mrf.mxu1  ;;  %v593_v19 = vadd.f32 %v1331_v16, %v592_v17 }
  0xac   : > { %v622_v20 = vadd.f32 %v621_v18, %v593_v19 }
  0xb1   : > { %v650_v21 = vpop.f32.mrf.mxu2  ;;  %v594_v23 = vpop.f32.mrf.mxu0 }
  0xb2   : > { %v679_v22 = vpop.f32.mrf.mxu3  ;;  %v623_v24 = vpop.f32.mrf.mxu1  ;;  %v651_v25 = vadd.f32 %v650_v21, %v622_v20  ;;  %v595_v26 = vadd.f32 %v1331_v16, %v594_v23 }
  0xb4   : > { %v680_v27 = vadd.f32 %v679_v22, %v651_v25  ;;  %v624_v28 = vadd.f32 %v623_v24, %v595_v26 }
  0xb6   : > { %v707_v34 = vmul.f32 0.01, %v680_v27  ;;  %vm699_vm0 = vcmp.ge.f32.partialorder %v680_v27, 0.0 }
  0xb8   : > { %v715_v38 = vsel %vm699_vm0, %v680_v27, %v707_v34 }
  0xb9   : > { %v652_v29 = vpop.f32.mrf.mxu2  ;;  %v597_v32 = vpop.f32.mrf.mxu0 }
  0xba   : > { %v681_v30 = vpop.f32.mrf.mxu3  ;;  %v653_v31 = vadd.f32 %v652_v29, %v624_v28  ;;  %v626_v33 = vpop.f32.mrf.mxu1  ;;  %v598_v36 = vadd.f32 %v1331_v16, %v597_v32 }
  0xbc   : > { %v682_v35 = vadd.f32 %v681_v30, %v653_v31  ;;  %v627_v40 = vadd.f32 %v626_v33, %v598_v36 }
  0xbe   : > { %vm700_vm1 = vcmp.ge.f32.partialorder %v682_v35, 0.0  ;;  %v708_v37 = vmul.f32 0.01, %v682_v35 }
  0xc0   : > { %v716_v39 = vsel %vm700_vm1, %v682_v35, %v708_v37 }
  0xc1   : > { %v1082_v41 = vpack.c.bf16 %v716_v39, %v715_v38  ;;  %v655_v42 = vpop.f32.mrf.mxu2  ;;  %v599_v44 = vpop.f32.mrf.mxu0 }
  0xc2   : > { %v684_v43 = vpop.f32.mrf.mxu3  ;;  %v628_v45 = vpop.f32.mrf.mxu1  ;;  %v656_v46 = vadd.f32 %v655_v42, %v627_v40  ;;  %v600_v47 = vadd.f32 %v1331_v16, %v599_v44 }
  0xc3   : > { %1083 = vst [vmem:[%s1340_s21] sm:$0xff] %v1082_v41  }
  0xc4   : > { %v685_v48 = vadd.f32 %v684_v43, %v656_v46  ;;  %v629_v49 = vadd.f32 %v628_v45, %v600_v47 }
  0xc6   : > { %v709_v55 = vmul.f32 0.01, %v685_v48  ;;  %vm701_vm2 = vcmp.ge.f32.partialorder %v685_v48, 0.0 }
  0xc8   : > { %v717_v59 = vsel %vm701_vm2, %v685_v48, %v709_v55 }
  0xc9   : > { %v657_v50 = vpop.f32.mrf.mxu2  ;;  %v602_v53 = vpop.f32.mrf.mxu0 }
  0xca   : > { %v686_v51 = vpop.f32.mrf.mxu3  ;;  %v658_v52 = vadd.f32 %v657_v50, %v629_v49  ;;  %v631_v54 = vpop.f32.mrf.mxu1  ;;  %v603_v57 = vadd.f32 %v1331_v16, %v602_v53 }
  0xcc   : > { %v687_v56 = vadd.f32 %v686_v51, %v658_v52  ;;  %v632_v61 = vadd.f32 %v631_v54, %v603_v57 }
  0xce   : > { %vm702_vm3 = vcmp.ge.f32.partialorder %v687_v56, 0.0  ;;  %v710_v58 = vmul.f32 0.01, %v687_v56 }
  0xd0   : > { %v718_v60 = vsel %vm702_vm3, %v687_v56, %v710_v58 }
  0xd1   : > { %v1087_v62 = vpack.c.bf16 %v718_v60, %v717_v59  ;;  %v660_v63 = vpop.f32.mrf.mxu2  ;;  %v604_v1 = vpop.f32.mrf.mxu0 }
  0xd2   : > { %v689_v0 = vpop.f32.mrf.mxu3  ;;  %v633_v2 = vpop.f32.mrf.mxu1  ;;  %v661_v3 = vadd.f32 %v660_v63, %v632_v61  ;;  %v605_v4 = vadd.f32 %v1331_v16, %v604_v1 }
  0xd3   : > { %1099 = vst [vmem:[%s1340_s21 + $0x8] sm:$0xff] %v1087_v62  }
  0xd4   : > { %v690_v5 = vadd.f32 %v689_v0, %v661_v3  ;;  %v634_v6 = vadd.f32 %v633_v2, %v605_v4 }
  0xd6   : > { %v711_v11 = vmul.f32 0.01, %v690_v5  ;;  %vm703_vm4 = vcmp.ge.f32.partialorder %v690_v5, 0.0 }
  0xd8   : > { %v719_v17 = vsel %vm703_vm4, %v690_v5, %v711_v11 }
  0xd9   : > { %v662_v7 = vpop.f32.mrf.mxu2  ;;  %v607_v10 = vpop.f32.mrf.mxu0 }
  0xda   : > { %v691_v8 = vpop.f32.mrf.mxu3  ;;  %v663_v9 = vadd.f32 %v662_v7, %v634_v6  ;;  %v608_v13 = vadd.f32 %v1331_v16, %v607_v10  ;;  %v636_v14 = vpop.f32.mrf.mxu1 }
  0xdc   : > { %v692_v12 = vadd.f32 %v691_v8, %v663_v9  ;;  %v637_v19 = vadd.f32 %v636_v14, %v608_v13 }
  0xde   : > { %vm704_vm5 = vcmp.ge.f32.partialorder %v692_v12, 0.0  ;;  %v712_v15 = vmul.f32 0.01, %v692_v12 }
  0xe0   : > { %v720_v18 = vsel %vm704_vm5, %v692_v12, %v712_v15 }
  0xe1   : > { %v1092_v20 = vpack.c.bf16 %v720_v18, %v719_v17  ;;  %v665_v21 = vpop.f32.mrf.mxu2  ;;  %v609_v23 = vpop.f32.mrf.mxu0 }
  0xe2   : > { %v694_v22 = vpop.f32.mrf.mxu3  ;;  %v666_v24 = vadd.f32 %v665_v21, %v637_v19  ;;  %v610_v25 = vadd.f32 %v1331_v16, %v609_v23  ;;  %v638_v26 = vpop.f32.mrf.mxu1 }
  0xe3   : > { %1100 = vst [vmem:[%s1340_s21 + $0x10] sm:$0xff] %v1092_v20  }
  0xe4   : > { %v695_v27 = vadd.f32 %v694_v22, %v666_v24  ;;  %v639_v28 = vadd.f32 %v638_v26, %v610_v25 }
  0xe6   : > { %v713_v32 = vmul.f32 0.01, %v695_v27  ;;  %vm705_vm6 = vcmp.ge.f32.partialorder %v695_v27, 0.0 }
  0xe8   : > { %v721_v35 = vsel %vm705_vm6, %v695_v27, %v713_v32 }
  0xe9   : > { %v667_v29 = vpop.f32.mrf.mxu2 }
  0xea   : > { %v668_v30 = vadd.f32 %v667_v29, %v639_v28  ;;  %v696_v31 = vpop.f32.mrf.mxu3 }
  0xec   : > { %v697_v33 = vadd.f32 %v696_v31, %v668_v30 }
  0xee   : > { %vm706_vm7 = vcmp.ge.f32.partialorder %v697_v33, 0.0  ;;  %v714_v34 = vmul.f32 0.01, %v697_v33 }
  0xf0   : > { %v722_v36 = vsel %vm706_vm7, %v697_v33, %v714_v34 }
  0xf1   : > { %v1097_v37 = vpack.c.bf16 %v722_v36, %v721_v35 }
  0xf3   : > { %1101 = vst [vmem:[%s1340_s21 + $0x18] sm:$0xff] %v1097_v37  }
  0xf4 PF: > { %s13_s14 = sadd.s32 1, %s1149_s14   ;;  %s1364_s12 = smov %s1145_s13 }
  0xf5   : > { %p10_p5 = scmp.ge.s32.totalorder %s13_s14, 4   ;;  %s1365_s13 = smov %s1367_s15 }
  0xf7   :  { %12 = sbr.rel (!%p10_p5) target bundleno = 2 (0x2), region = 65 }

// kernel: _lambda_.15
= control target key start
LH: loop header
LB: loop body
LE: loop exit
PB: predicated region body
PF: predicated region fallthrough
CT: control target
= control target key end

     0   :  { %s1730_s12 = smov 0   ;;  %s1732_s13 = smov 0   ;;  %s2086_s0 = inlined_call_operand.vmem [shape: bf16[1024,256], index: 0, kind: input, shape index: {}]   ;;  %s2087_s1 = inlined_call_operand.vmem [shape: bf16[256,128], index: 1, kind: input, shape index: {}]   ;;  %s2088_s2 = inlined_call_operand.vmem [shape: f32[1,128], index: 2, kind: input, shape index: {}]   ;;  %s2089_s3 = inlined_call_operand.vmem [shape: f32[1024,128], index: 3, kind: output, shape index: {}]  }
   0x1   :  { %s1734_s14 = smov 0  }
   0x2 LB: > { %s25_s15 = sadd.s32 1, %s1704_s13  ;;  %p1236_p0 = scmp.ge.s32.totalorder %s1708_s14, 1  ;;  %s1708_s14 = sphi %s1734_s14, %s13_s14   ;;  %s1704_s13 = sphi %s1732_s13, %s2091_s13   ;;  %s1700_s12 = sphi %s1730_s12, %s2090_s12  }
   0x3   : > { %p27_p1 = scmp.ge.s32.totalorder %s25_s15, 2  ;;  %p169_p2 = scmp.lt.s32.totalorder %s1708_s14, 3 }
   0x5   : > { %s2093_s15 = smov (%p27_p1, %s25_s15), 0  ;;  %p170_p3 = pnand %p1236_p0, %p169_p2 }
   0x6   : > { %s1237_s28 = sshll.u32 (!%p170_p3), %s1700_s12, 6 }
   0x7   : > { %173 = sbr.rel (%p170_p3) target bundleno = 429 (0x1ad), region = 32  ;;  %p205_p4 = scmp.lt.s32.totalorder (!%p170_p3), %s1237_s28, 127 }
   0xc   : > { %v1636_v0 = vld [vmem:[%s2087_s1 + $0x38] sm:$0xff]  ;;  %v1635_v2 = vld [vmem:[%s2087_s1 + $0x30] sm:$0xff]  ;;  %v1634_v4 = vld [vmem:[%s2087_s1 + $0x28] sm:$0xff]  ;;  %s2095_s28 = smov (!%p205_p4, %s1237_s28), 127 }
   0xd   : > { %v1644_v1 = vld [vmem:[%s2087_s1 + $0x78] sm:$0xff]  ;;  %743 = vmatpush.bf16.msra.mxu0 %v1636_v0  ;;  %1645 = vmatpush.bf16.msra.mxu2 %v1636_v0  ;;  %v1643_v3 = vld [vmem:[%s2087_s1 + $0x70] sm:$0xff]  ;;  %v1642_v5 = vld [vmem:[%s2087_s1 + $0x68] sm:$0xff]  ;;  %s1564_s17 = sshll.u32 %s2095_s28, 3 }
   0xe   : > { %912 = vmatpush.bf16.msra.mxu1 %v1644_v1  ;;  %1653 = vmatpush.bf16.msra.mxu3 %v1644_v1  ;;  %v1633_v6 = vld [vmem:[%s2087_s1 + $0x20] sm:$0xff]  ;;  %v1632_v8 = vld [vmem:[%s2087_s1 + $0x18] sm:$0xff]  ;;  %v1631_v10 = vld [vmem:[%s2087_s1 + $0x10] sm:$0xff]  ;;  %s1798_s22 = scalar_lea.vmem %s2086_s0, %s1564_s17  ;;  %s1892_s7 = scalar_lea.vmem %s2089_s3, %s1564_s17 }
   0xf   : > { %v1641_v7 = vld [vmem:[%s2087_s1 + $0x60] sm:$0xff]  ;;  %v1640_v9 = vld [vmem:[%s2087_s1 + $0x58] sm:$0xff]  ;;  %v1639_v11 = vld [vmem:[%s2087_s1 + $0x50] sm:$0xff] }
  0x10   : > { %v1630_v12 = vld [vmem:[%s2087_s1 + $0x8] sm:$0xff]  ;;  %v1629_v14 = vld [vmem:[%s2087_s1] sm:$0xff]  ;;  %v1252_v28 = vld [vmem:[%s1798_s22 + $0x10] sm:$0xf] }
  0x11   : > { %744 = vmatpush.bf16.msra.mxu0 %v1635_v2  ;;  %1646 = vmatpush.bf16.msra.mxu2 %v1635_v2  ;;  %v1638_v13 = vld [vmem:[%s2087_s1 + $0x48] sm:$0xff]  ;;  %v1637_v15 = vld [vmem:[%s2087_s1 + $0x40] sm:$0xff]  ;;  %v1568_v29 = vld [vmem:[%s1798_s22 + $0x14] sm:$0xf0] }
  0x12   : > { %913 = vmatpush.bf16.msra.mxu1 %v1643_v3  ;;  %1654 = vmatpush.bf16.msra.mxu3 %v1643_v3  ;;  %v1244_v16 = vld [vmem:[%s1798_s22] sm:$0xf]  ;;  %v1566_v17 = vld [vmem:[%s1798_s22 + $0x4] sm:$0xf0]  ;;  %v1565_v20 = vld [vmem:[%s1798_s22 + $0x4] sm:$0xf]  ;;  %v1253_v36 = vor.u32 %v1568_v29, %v1252_v28 }
  0x13   : > { %v1372_v18 = vld [vmem:[%s1798_s22 + $0x100] sm:$0xf]  ;;  %v1598_v19 = vld [vmem:[%s1798_s22 + $0x104] sm:$0xf0]  ;;  %v1246_v21 = vld [vmem:[%s1798_s22 + $0x8] sm:$0xf0]  ;;  %v1245_v24 = vor.u32 %v1566_v17, %v1244_v16 }
  0x14   : > { %v1597_v22 = vld [vmem:[%s1798_s22 + $0x104] sm:$0xf]  ;;  %v1374_v23 = vld [vmem:[%s1798_s22 + $0x108] sm:$0xf0]  ;;  %v1373_v25 = vor.u32 %v1598_v19, %v1372_v18  ;;  %v1249_v26 = vor.u32 %v1565_v20, %v1246_v21  ;;  %v1380_v30 = vld [vmem:[%s1798_s22 + $0x110] sm:$0xf] }
  0x15   : > { %745 = vmatpush.bf16.msra.mxu0 %v1634_v4  ;;  %1647 = vmatpush.bf16.msra.mxu2 %v1634_v4  ;;  %v1377_v27 = vor.u32 %v1597_v22, %v1374_v23  ;;  %v1600_v31 = vld [vmem:[%s1798_s22 + $0x114] sm:$0xf0]  ;;  %v1567_v32 = vld [vmem:[%s1798_s22 + $0x14] sm:$0xf]  ;;  %v1254_v33 = vld [vmem:[%s1798_s22 + $0x18] sm:$0xf0] }
  0x16   : > { %914 = vmatpush.bf16.msra.mxu1 %v1642_v5  ;;  %1655 = vmatpush.bf16.msra.mxu3 %v1642_v5  ;;  %v1599_v34 = vld [vmem:[%s1798_s22 + $0x114] sm:$0xf]  ;;  %v1382_v35 = vld [vmem:[%s1798_s22 + $0x118] sm:$0xf0]  ;;  %v1381_v37 = vor.u32 %v1600_v31, %v1380_v30  ;;  %v1257_v38 = vor.u32 %v1567_v32, %v1254_v33  ;;  %v1260_v40 = vld [vmem:[%s1798_s22 + $0x20] sm:$0xf] }
  0x17   : > { %v1385_v39 = vor.u32 %v1599_v34, %v1382_v35  ;;  %v1570_v41 = vld [vmem:[%s1798_s22 + $0x24] sm:$0xf0]  ;;  %v1388_v42 = vld [vmem:[%s1798_s22 + $0x120] sm:$0xf]  ;;  %v1569_v44 = vld [vmem:[%s1798_s22 + $0x24] sm:$0xf] }
  0x18   : > { %v1602_v43 = vld [vmem:[%s1798_s22 + $0x124] sm:$0xf0]  ;;  %v1262_v45 = vld [vmem:[%s1798_s22 + $0x28] sm:$0xf0]  ;;  %v1601_v46 = vld [vmem:[%s1798_s22 + $0x124] sm:$0xf]  ;;  %v1261_v48 = vor.u32 %v1570_v41, %v1260_v40 }
  0x19   : > { %746 = vmatpush.bf16.msra.mxu0 %v1633_v6  ;;  %1648 = vmatpush.bf16.msra.mxu2 %v1633_v6  ;;  %v1390_v47 = vld [vmem:[%s1798_s22 + $0x128] sm:$0xf0]  ;;  %v1389_v49 = vor.u32 %v1602_v43, %v1388_v42  ;;  %v1265_v50 = vor.u32 %v1569_v44, %v1262_v45  ;;  %v1268_v52 = vld [vmem:[%s1798_s22 + $0x30] sm:$0xf]  ;;  %v1572_v53 = vld [vmem:[%s1798_s22 + $0x34] sm:$0xf0] }
  0x1a   : > { %915 = vmatpush.bf16.msra.mxu1 %v1641_v7  ;;  %1656 = vmatpush.bf16.msra.mxu3 %v1641_v7  ;;  %v1393_v51 = vor.u32 %v1601_v46, %v1390_v47  ;;  %v1396_v54 = vld [vmem:[%s1798_s22 + $0x130] sm:$0xf]  ;;  %v1604_v55 = vld [vmem:[%s1798_s22 + $0x134] sm:$0xf0]  ;;  %v1571_v56 = vld [vmem:[%s1798_s22 + $0x34] sm:$0xf]  ;;  %v1269_v60 = vor.u32 %v1572_v53, %v1268_v52 }
  0x1b   : > { %v1270_v57 = vld [vmem:[%s1798_s22 + $0x38] sm:$0xf0]  ;;  %v1603_v58 = vld [vmem:[%s1798_s22 + $0x134] sm:$0xf]  ;;  %v1397_v61 = vor.u32 %v1604_v55, %v1396_v54  ;;  %v1276_v0 = vld [vmem:[%s1798_s22 + $0x40] sm:$0xf] }
  0x1c   : > { %v1398_v59 = vld [vmem:[%s1798_s22 + $0x138] sm:$0xf0]  ;;  %v1273_v62 = vor.u32 %v1571_v56, %v1270_v57  ;;  %v1574_v1 = vld [vmem:[%s1798_s22 + $0x44] sm:$0xf0]  ;;  %v1404_v2 = vld [vmem:[%s1798_s22 + $0x140] sm:$0xf] }
  0x1d   : > { %747 = vmatpush.bf16.msra.mxu0 %v1632_v8  ;;  %1649 = vmatpush.bf16.msra.mxu2 %v1632_v8  ;;  %v1401_v63 = vor.u32 %v1603_v58, %v1398_v59  ;;  %v1606_v3 = vld [vmem:[%s1798_s22 + $0x144] sm:$0xf0]  ;;  %v1573_v4 = vld [vmem:[%s1798_s22 + $0x44] sm:$0xf]  ;;  %v1278_v5 = vld [vmem:[%s1798_s22 + $0x48] sm:$0xf0]  ;;  %v1277_v8 = vor.u32 %v1574_v1, %v1276_v0 }
  0x1e   : > { %916 = vmatpush.bf16.msra.mxu1 %v1640_v9  ;;  %1657 = vmatpush.bf16.msra.mxu3 %v1640_v9  ;;  %v1605_v6 = vld [vmem:[%s1798_s22 + $0x144] sm:$0xf]  ;;  %v1406_v7 = vld [vmem:[%s1798_s22 + $0x148] sm:$0xf0]  ;;  %v1405_v9 = vor.u32 %v1606_v3, %v1404_v2  ;;  %v1575_v16 = vld [vmem:[%s1798_s22 + $0x54] sm:$0xf] }
  0x1f   : > { %v1286_v17 = vld [vmem:[%s1798_s22 + $0x58] sm:$0xf0]  ;;  %v1607_v18 = vld [vmem:[%s1798_s22 + $0x154] sm:$0xf]  ;;  %v1577_v28 = vld [vmem:[%s1798_s22 + $0x64] sm:$0xf] }
  0x20   : > { %v1414_v19 = vld [vmem:[%s1798_s22 + $0x158] sm:$0xf0]  ;;  %v1289_v22 = vor.u32 %v1575_v16, %v1286_v17  ;;  %v1294_v29 = vld [vmem:[%s1798_s22 + $0x68] sm:$0xf0]  ;;  %v1609_v30 = vld [vmem:[%s1798_s22 + $0x164] sm:$0xf] }
  0x21   : > { %748 = vmatpush.bf16.msra.mxu0 %v1631_v10  ;;  %1650 = vmatpush.bf16.msra.mxu2 %v1631_v10  ;;  %v1281_v10 = vor.u32 %v1573_v4, %v1278_v5  ;;  %v1417_v23 = vor.u32 %v1607_v18, %v1414_v19  ;;  %v1422_v31 = vld [vmem:[%s1798_s22 + $0x168] sm:$0xf0]  ;;  %v1297_v34 = vor.u32 %v1577_v28, %v1294_v29  ;;  %v1579_v40 = vld [vmem:[%s1798_s22 + $0x74] sm:$0xf]  ;;  %v1302_v41 = vld [vmem:[%s1798_s22 + $0x78] sm:$0xf0] }
  0x22   : > { %917 = vmatpush.bf16.msra.mxu1 %v1639_v11  ;;  %1658 = vmatpush.bf16.msra.mxu3 %v1639_v11  ;;  %v1409_v11 = vor.u32 %v1605_v6, %v1406_v7  ;;  %v1425_v35 = vor.u32 %v1609_v30, %v1422_v31  ;;  %v1611_v42 = vld [vmem:[%s1798_s22 + $0x174] sm:$0xf]  ;;  %v1430_v43 = vld [vmem:[%s1798_s22 + $0x178] sm:$0xf0]  ;;  %v1305_v46 = vor.u32 %v1579_v40, %v1302_v41  ;;  %v1614_v52 = vld [vmem:[%s1798_s22 + $0x184] sm:$0xf0] }
  0x23   : > { %v1433_v47 = vor.u32 %v1611_v42, %v1430_v43  ;;  %v1581_v53 = vld [vmem:[%s1798_s22 + $0x84] sm:$0xf]  ;;  %v1310_v54 = vld [vmem:[%s1798_s22 + $0x88] sm:$0xf0]  ;;  %v1446_v16 = vld [vmem:[%s1798_s22 + $0x198] sm:$0xf0] }
  0x24   : > { %v1613_v55 = vld [vmem:[%s1798_s22 + $0x184] sm:$0xf]  ;;  %v1438_v56 = vld [vmem:[%s1798_s22 + $0x188] sm:$0xf0]  ;;  %v1618_v40 = vld [vmem:[%s1798_s22 + $0x1a4] sm:$0xf0] }
  0x25   : > { %749 = vmatpush.bf16.msra.mxu0 %v1630_v12  ;;  %1651 = vmatpush.bf16.msra.mxu2 %v1630_v12  ;;  %v1284_v12 = vld [vmem:[%s1798_s22 + $0x50] sm:$0xf]  ;;  %v1585_v41 = vld [vmem:[%s1798_s22 + $0xa4] sm:$0xf]  ;;  %v1326_v42 = vld [vmem:[%s1798_s22 + $0xa8] sm:$0xf0] }
  0x26   : > { %918 = vmatpush.bf16.msra.mxu1 %v1638_v13  ;;  %1659 = vmatpush.bf16.msra.mxu3 %v1638_v13  ;;  %v1576_v13 = vld [vmem:[%s1798_s22 + $0x54] sm:$0xf0]  ;;  %v1617_v43 = vld [vmem:[%s1798_s22 + $0x1a4] sm:$0xf] }
  0x27   : > { %v1285_v20 = vor.u32 %v1576_v13, %v1284_v12  ;;  %v1616_v12 = vld [vmem:[%s1798_s22 + $0x194] sm:$0xf0]  ;;  %v1583_v13 = vld [vmem:[%s1798_s22 + $0x94] sm:$0xf] }
  0x29   : > { %750 = vmatpush.bf16.msra.mxu0 %v1629_v14  ;;  %1652 = vmatpush.bf16.msra.mxu2 %v1629_v14  ;;  %v1412_v14 = vld [vmem:[%s1798_s22 + $0x150] sm:$0xf] }
  0x2a   : > { %919 = vmatpush.bf16.msra.mxu1 %v1637_v15  ;;  %1660 = vmatpush.bf16.msra.mxu3 %v1637_v15  ;;  %v1608_v15 = vld [vmem:[%s1798_s22 + $0x154] sm:$0xf0] }
  0x2b   : > { %v1413_v21 = vor.u32 %v1608_v15, %v1412_v14  ;;  %v1318_v14 = vld [vmem:[%s1798_s22 + $0x98] sm:$0xf0]  ;;  %v1615_v15 = vld [vmem:[%s1798_s22 + $0x194] sm:$0xf] }
  0x2c   : > { %751 = vmatmul.bf16.vlgmr.msra.gmra.mxu0 %v1245_v24  ;;  %831 = vmatmul.bf16.vlgmr.msra.gmra.mxu2 %v1373_v25  ;;  %v1292_v24 = vld [vmem:[%s1798_s22 + $0x60] sm:$0xf]  ;;  %v1578_v25 = vld [vmem:[%s1798_s22 + $0x64] sm:$0xf0] }
  0x2d   : > { %920 = vmatmul.bf16.vlgmr.msra.gmra.mxu1 %v1249_v26  ;;  %1000 = vmatmul.bf16.vlgmr.msra.gmra.mxu3 %v1377_v27  ;;  %v1420_v26 = vld [vmem:[%s1798_s22 + $0x160] sm:$0xf]  ;;  %v1610_v27 = vld [vmem:[%s1798_s22 + $0x164] sm:$0xf0]  ;;  %v1293_v32 = vor.u32 %v1578_v25, %v1292_v24  ;;  %v1449_v24 = vor.u32 %v1615_v15, %v1446_v16 }
  0x2e   : > { %v1421_v33 = vor.u32 %v1610_v27, %v1420_v26 }
  0x3c   : > { %756 = vmatmul.bf16.gmra.mxu0 %v1253_v36  ;;  %836 = vmatmul.bf16.gmra.mxu2 %v1381_v37  ;;  %v1300_v36 = vld [vmem:[%s1798_s22 + $0x70] sm:$0xf]  ;;  %v1580_v37 = vld [vmem:[%s1798_s22 + $0x74] sm:$0xf0] }
  0x3d   : > { %925 = vmatmul.bf16.gmra.mxu1 %v1257_v38  ;;  %1005 = vmatmul.bf16.gmra.mxu3 %v1385_v39  ;;  %v1428_v38 = vld [vmem:[%s1798_s22 + $0x170] sm:$0xf]  ;;  %v1612_v39 = vld [vmem:[%s1798_s22 + $0x174] sm:$0xf0]  ;;  %v1301_v44 = vor.u32 %v1580_v37, %v1300_v36  ;;  %v1324_v36 = vld [vmem:[%s1798_s22 + $0xa0] sm:$0xf] }
  0x3e   : > { %v1429_v45 = vor.u32 %v1612_v39, %v1428_v38  ;;  %v1586_v38 = vld [vmem:[%s1798_s22 + $0xa4] sm:$0xf0]  ;;  %v1452_v39 = vld [vmem:[%s1798_s22 + $0x1a0] sm:$0xf] }
  0x4c   : > { %761 = vmatmul.bf16.gmra.mxu0 %v1261_v48  ;;  %841 = vmatmul.bf16.gmra.mxu2 %v1389_v49  ;;  %v1876_v48 = vld [vmem:[%s2088_s2] ss:$0 sm:$0xff] }
  0x4d   : > { %930 = vmatmul.bf16.gmra.mxu1 %v1265_v50  ;;  %1010 = vmatmul.bf16.gmra.mxu3 %v1393_v51  ;;  %v1308_v49 = vld [vmem:[%s1798_s22 + $0x80] sm:$0xf]  ;;  %v1582_v50 = vld [vmem:[%s1798_s22 + $0x84] sm:$0xf0] }
  0x4e   : > { %v1436_v51 = vld [vmem:[%s1798_s22 + $0x180] sm:$0xf]  ;;  %v1309_v57 = vor.u32 %v1582_v50, %v1308_v49  ;;  %v1325_v49 = vor.u32 %v1586_v38, %v1324_v36  ;;  %v1453_v50 = vor.u32 %v1618_v40, %v1452_v39  ;;  %v1621_v36 = vld [vmem:[%s1798_s22 + $0x1c4] sm:$0xf] }
  0x4f   : > { %v1437_v58 = vor.u32 %v1614_v52, %v1436_v51  ;;  %v1329_v52 = vor.u32 %v1585_v41, %v1326_v42 }
  0x5c   : > { %766 = vmatmul.bf16.gmra.mxu0 %v1269_v60  ;;  %846 = vmatmul.bf16.gmra.mxu2 %v1397_v61  ;;  %v1313_v60 = vor.u32 %v1581_v53, %v1310_v54  ;;  %v1441_v61 = vor.u32 %v1613_v55, %v1438_v56 }
  0x5d   : > { %935 = vmatmul.bf16.gmra.mxu1 %v1273_v62  ;;  %1015 = vmatmul.bf16.gmra.mxu3 %v1401_v63 }
  0x6c   : > { %771 = vmatmul.bf16.gmra.mxu0 %v1277_v8  ;;  %851 = vmatmul.bf16.gmra.mxu2 %v1405_v9  ;;  %v1316_v8 = vld [vmem:[%s1798_s22 + $0x90] sm:$0xf] }
  0x6d   : > { %940 = vmatmul.bf16.gmra.mxu1 %v1281_v10  ;;  %1020 = vmatmul.bf16.gmra.mxu3 %v1409_v11  ;;  %v1584_v10 = vld [vmem:[%s1798_s22 + $0x94] sm:$0xf0]  ;;  %v1444_v11 = vld [vmem:[%s1798_s22 + $0x190] sm:$0xf] }
  0x7c   : > { %776 = vmatmul.bf16.gmra.mxu0 %v1285_v20  ;;  %856 = vmatmul.bf16.gmra.mxu2 %v1413_v21  ;;  %v1317_v20 = vor.u32 %v1584_v10, %v1316_v8  ;;  %v1445_v21 = vor.u32 %v1616_v12, %v1444_v11  ;;  %v1619_v8 = vld [vmem:[%s1798_s22 + $0x1b4] sm:$0xf] }
  0x7d   : > { %945 = vmatmul.bf16.gmra.mxu1 %v1289_v22  ;;  %1025 = vmatmul.bf16.gmra.mxu3 %v1417_v23  ;;  %v1321_v23 = vor.u32 %v1583_v13, %v1318_v14 }
  0x8c   : > { %781 = vmatmul.bf16.gmra.mxu0 %v1293_v32  ;;  %861 = vmatmul.bf16.gmra.mxu2 %v1421_v33 }
  0x8d   : > { %950 = vmatmul.bf16.gmra.mxu1 %v1297_v34  ;;  %1030 = vmatmul.bf16.gmra.mxu3 %v1425_v35 }
  0x9c   : > { %786 = vmatmul.bf16.gmra.mxu0 %v1301_v44  ;;  %866 = vmatmul.bf16.gmra.mxu2 %v1429_v45  ;;  %v1454_v44 = vld [vmem:[%s1798_s22 + $0x1a8] sm:$0xf0] }
  0x9d   : > { %955 = vmatmul.bf16.gmra.mxu1 %v1305_v46  ;;  %1035 = vmatmul.bf16.gmra.mxu3 %v1433_v47  ;;  %v1457_v53 = vor.u32 %v1617_v43, %v1454_v44 }
  0xa9   : > { %v752_v59 = vpop.f32.mrf.mxu0 }
  0xaa   : > { %v753_v62 = vadd.f32 %v1876_v48, %v752_v59  ;;  %v921_v63 = vpop.f32.mrf.mxu1 }
  0xac   : > { %v922_v0 = vadd.f32 %v921_v63, %v753_v62  ;;  %791 = vmatmul.bf16.gmra.mxu0 %v1309_v57  ;;  %871 = vmatmul.bf16.gmra.mxu2 %v1437_v58 }
  0xad   : > { %960 = vmatmul.bf16.gmra.mxu1 %v1313_v60  ;;  %1040 = vmatmul.bf16.gmra.mxu3 %v1441_v61 }
  0xae   : > { %1081 = vst [vmem:[%s1892_s7] sm:$0xff] %v922_v0 }
  0xaf   : > { %v832_v1 = vpop.f32.mrf.mxu2 }
  0xb0   : > { %v833_v2 = vadd.f32 %v1876_v48, %v832_v1  ;;  %v1001_v3 = vpop.f32.mrf.mxu3  ;;  %v1332_v1 = vld [vmem:[%s1798_s22 + $0xb0] sm:$0xf] }
  0xb1   : > { %v754_v4 = vpop.f32.mrf.mxu0 }
  0xb2   : > { %v1002_v5 = vadd.f32 %v1001_v3, %v833_v2  ;;  %v755_v6 = vadd.f32 %v1876_v48, %v754_v4  ;;  %v923_v7 = vpop.f32.mrf.mxu1  ;;  %v1588_v3 = vld [vmem:[%s1798_s22 + $0xb4] sm:$0xf0]  ;;  %v1460_v4 = vld [vmem:[%s1798_s22 + $0x1b0] sm:$0xf] }
  0xb3   : > { %v1333_v13 = vor.u32 %v1588_v3, %v1332_v1  ;;  %v1623_v1 = vld [vmem:[%s1798_s22 + $0x1d4] sm:$0xf] }
  0xb4   : > { %1113 = vst [vmem:[%s1892_s7 + $0x100] sm:$0xff] %v1002_v5  ;;  %v924_v9 = vadd.f32 %v923_v7, %v755_v6  ;;  %v1620_v5 = vld [vmem:[%s1798_s22 + $0x1b4] sm:$0xf0]  ;;  %v1587_v6 = vld [vmem:[%s1798_s22 + $0xb4] sm:$0xf] }
  0xb5   : > { %v1334_v7 = vld [vmem:[%s1798_s22 + $0xb8] sm:$0xf0]  ;;  %v1461_v14 = vor.u32 %v1620_v5, %v1460_v4 }
  0xb6   : > { %1082 = vst [vmem:[%s1892_s7 + $0x8] sm:$0xff] %v924_v9  ;;  %v1462_v9 = vld [vmem:[%s1798_s22 + $0x1b8] sm:$0xf0]  ;;  %v1337_v16 = vor.u32 %v1587_v6, %v1334_v7 }
  0xb7   : > { %v834_v17 = vpop.f32.mrf.mxu2 }
  0xb8   : > { %v835_v18 = vadd.f32 %v1876_v48, %v834_v17  ;;  %v1003_v19 = vpop.f32.mrf.mxu3  ;;  %v1465_v17 = vor.u32 %v1619_v8, %v1462_v9 }
  0xb9   : > { %v757_v22 = vpop.f32.mrf.mxu0 }
  0xba   : > { %v1004_v25 = vadd.f32 %v1003_v19, %v835_v18  ;;  %v758_v26 = vadd.f32 %v1876_v48, %v757_v22  ;;  %v926_v27 = vpop.f32.mrf.mxu1 }
  0xbc   : > { %1114 = vst [vmem:[%s1892_s7 + $0x108] sm:$0xff] %v1004_v25  ;;  %v927_v28 = vadd.f32 %v926_v27, %v758_v26  ;;  %796 = vmatmul.bf16.gmra.mxu0 %v1317_v20  ;;  %876 = vmatmul.bf16.gmra.mxu2 %v1445_v21 }
  0xbd   : > { %965 = vmatmul.bf16.gmra.mxu1 %v1321_v23  ;;  %1045 = vmatmul.bf16.gmra.mxu3 %v1449_v24 }
  0xbe   : > { %1083 = vst [vmem:[%s1892_s7 + $0x10] sm:$0xff] %v927_v28 }
  0xbf   : > { %v837_v29 = vpop.f32.mrf.mxu2 }
  0xc0   : > { %v838_v30 = vadd.f32 %v1876_v48, %v837_v29  ;;  %v1006_v31 = vpop.f32.mrf.mxu3  ;;  %v1340_v29 = vld [vmem:[%s1798_s22 + $0xc0] sm:$0xf] }
  0xc1   : > { %v759_v32 = vpop.f32.mrf.mxu0 }
  0xc2   : > { %v1007_v33 = vadd.f32 %v1006_v31, %v838_v30  ;;  %v760_v34 = vadd.f32 %v1876_v48, %v759_v32  ;;  %v928_v35 = vpop.f32.mrf.mxu1  ;;  %v1590_v31 = vld [vmem:[%s1798_s22 + $0xc4] sm:$0xf0]  ;;  %v1468_v32 = vld [vmem:[%s1798_s22 + $0x1c0] sm:$0xf] }
  0xc3   : > { %v1341_v41 = vor.u32 %v1590_v31, %v1340_v29  ;;  %v1625_v29 = vld [vmem:[%s1798_s22 + $0x1e4] sm:$0xf] }
  0xc4   : > { %1115 = vst [vmem:[%s1892_s7 + $0x110] sm:$0xff] %v1007_v33  ;;  %v929_v37 = vadd.f32 %v928_v35, %v760_v34  ;;  %v1622_v33 = vld [vmem:[%s1798_s22 + $0x1c4] sm:$0xf0]  ;;  %v1589_v34 = vld [vmem:[%s1798_s22 + $0xc4] sm:$0xf] }
  0xc5   : > { %v1342_v35 = vld [vmem:[%s1798_s22 + $0xc8] sm:$0xf0]  ;;  %v1469_v42 = vor.u32 %v1622_v33, %v1468_v32 }
  0xc6   : > { %1084 = vst [vmem:[%s1892_s7 + $0x18] sm:$0xff] %v929_v37  ;;  %v1470_v37 = vld [vmem:[%s1798_s22 + $0x1c8] sm:$0xf0]  ;;  %v1345_v44 = vor.u32 %v1589_v34, %v1342_v35 }
  0xc7   : > { %v839_v45 = vpop.f32.mrf.mxu2 }
  0xc8   : > { %v840_v46 = vadd.f32 %v1876_v48, %v839_v45  ;;  %v1008_v47 = vpop.f32.mrf.mxu3  ;;  %v1473_v45 = vor.u32 %v1621_v36, %v1470_v37 }
  0xc9   : > { %v762_v51 = vpop.f32.mrf.mxu0 }
  0xca   : > { %v1009_v54 = vadd.f32 %v1008_v47, %v840_v46  ;;  %v763_v55 = vadd.f32 %v1876_v48, %v762_v51  ;;  %v931_v56 = vpop.f32.mrf.mxu1 }
  0xcc   : > { %1116 = vst [vmem:[%s1892_s7 + $0x118] sm:$0xff] %v1009_v54  ;;  %v932_v57 = vadd.f32 %v931_v56, %v763_v55  ;;  %801 = vmatmul.bf16.gmra.mxu0 %v1325_v49  ;;  %881 = vmatmul.bf16.gmra.mxu2 %v1453_v50 }
  0xcd   : > { %970 = vmatmul.bf16.gmra.mxu1 %v1329_v52  ;;  %1050 = vmatmul.bf16.gmra.mxu3 %v1457_v53 }
  0xce   : > { %1085 = vst [vmem:[%s1892_s7 + $0x20] sm:$0xff] %v932_v57 }
  0xcf   : > { %v842_v58 = vpop.f32.mrf.mxu2 }
  0xd0   : > { %v843_v59 = vadd.f32 %v1876_v48, %v842_v58  ;;  %v1011_v60 = vpop.f32.mrf.mxu3  ;;  %v1348_v58 = vld [vmem:[%s1798_s22 + $0xd0] sm:$0xf] }
  0xd1   : > { %v764_v61 = vpop.f32.mrf.mxu0 }
  0xd2   : > { %v1012_v62 = vadd.f32 %v1011_v60, %v843_v59  ;;  %v765_v63 = vadd.f32 %v1876_v48, %v764_v61  ;;  %v933_v0 = vpop.f32.mrf.mxu1  ;;  %v1592_v60 = vld [vmem:[%s1798_s22 + $0xd4] sm:$0xf0]  ;;  %v1476_v61 = vld [vmem:[%s1798_s22 + $0x1d0] sm:$0xf] }
  0xd3   : > { %v1349_v6 = vor.u32 %v1592_v60, %v1348_v58  ;;  %v1627_v58 = vld [vmem:[%s1798_s22 + $0x1f4] sm:$0xf] }
  0xd4   : > { %1117 = vst [vmem:[%s1892_s7 + $0x120] sm:$0xff] %v1012_v62  ;;  %v934_v2 = vadd.f32 %v933_v0, %v765_v63  ;;  %v1624_v62 = vld [vmem:[%s1798_s22 + $0x1d4] sm:$0xf0]  ;;  %v1591_v63 = vld [vmem:[%s1798_s22 + $0xd4] sm:$0xf] }
  0xd5   : > { %v1350_v0 = vld [vmem:[%s1798_s22 + $0xd8] sm:$0xf0]  ;;  %v1477_v7 = vor.u32 %v1624_v62, %v1476_v61 }
  0xd6   : > { %1086 = vst [vmem:[%s1892_s7 + $0x28] sm:$0xff] %v934_v2  ;;  %v1478_v2 = vld [vmem:[%s1798_s22 + $0x1d8] sm:$0xf0]  ;;  %v1353_v9 = vor.u32 %v1591_v63, %v1350_v0 }
  0xd7   : > { %v844_v10 = vpop.f32.mrf.mxu2 }
  0xd8   : > { %v845_v11 = vadd.f32 %v1876_v48, %v844_v10  ;;  %v1013_v12 = vpop.f32.mrf.mxu3  ;;  %v1481_v10 = vor.u32 %v1623_v1, %v1478_v2 }
  0xd9   : > { %v767_v15 = vpop.f32.mrf.mxu0 }
  0xda   : > { %v1014_v18 = vadd.f32 %v1013_v12, %v845_v11  ;;  %v768_v19 = vadd.f32 %v1876_v48, %v767_v15  ;;  %v936_v20 = vpop.f32.mrf.mxu1 }
  0xdc   : > { %1118 = vst [vmem:[%s1892_s7 + $0x128] sm:$0xff] %v1014_v18  ;;  %v937_v21 = vadd.f32 %v936_v20, %v768_v19  ;;  %806 = vmatmul.bf16.gmra.mxu0 %v1333_v13  ;;  %886 = vmatmul.bf16.gmra.mxu2 %v1461_v14 }
  0xdd   : > { %975 = vmatmul.bf16.gmra.mxu1 %v1337_v16  ;;  %1055 = vmatmul.bf16.gmra.mxu3 %v1465_v17 }
  0xde   : > { %1087 = vst [vmem:[%s1892_s7 + $0x30] sm:$0xff] %v937_v21 }
  0xdf   : > { %v847_v22 = vpop.f32.mrf.mxu2 }
  0xe0   : > { %v848_v23 = vadd.f32 %v1876_v48, %v847_v22  ;;  %v1016_v24 = vpop.f32.mrf.mxu3  ;;  %v1356_v22 = vld [vmem:[%s1798_s22 + $0xe0] sm:$0xf] }
  0xe1   : > { %v769_v25 = vpop.f32.mrf.mxu0 }
  0xe2   : > { %v1017_v26 = vadd.f32 %v1016_v24, %v848_v23  ;;  %v770_v27 = vadd.f32 %v1876_v48, %v769_v25  ;;  %v938_v28 = vpop.f32.mrf.mxu1  ;;  %v1594_v24 = vld [vmem:[%s1798_s22 + $0xe4] sm:$0xf0]  ;;  %v1484_v25 = vld [vmem:[%s1798_s22 + $0x1e0] sm:$0xf] }
  0xe3   : > { %v1357_v34 = vor.u32 %v1594_v24, %v1356_v22 }
  0xe4   : > { %1119 = vst [vmem:[%s1892_s7 + $0x130] sm:$0xff] %v1017_v26  ;;  %v939_v30 = vadd.f32 %v938_v28, %v770_v27  ;;  %v1626_v26 = vld [vmem:[%s1798_s22 + $0x1e4] sm:$0xf0]  ;;  %v1593_v27 = vld [vmem:[%s1798_s22 + $0xe4] sm:$0xf] }
  0xe5   : > { %v1358_v28 = vld [vmem:[%s1798_s22 + $0xe8] sm:$0xf0]  ;;  %v1485_v35 = vor.u32 %v1626_v26, %v1484_v25 }
  0xe6   : > { %1088 = vst [vmem:[%s1892_s7 + $0x38] sm:$0xff] %v939_v30  ;;  %v1486_v30 = vld [vmem:[%s1798_s22 + $0x1e8] sm:$0xf0]  ;;  %v1361_v37 = vor.u32 %v1593_v27, %v1358_v28 }
  0xe7   : > { %v849_v38 = vpop.f32.mrf.mxu2 }
  0xe8   : > { %v850_v39 = vadd.f32 %v1876_v48, %v849_v38  ;;  %v1018_v40 = vpop.f32.mrf.mxu3  ;;  %v1489_v38 = vor.u32 %v1625_v29, %v1486_v30 }
  0xe9   : > { %v772_v43 = vpop.f32.mrf.mxu0 }
  0xea   : > { %v1019_v46 = vadd.f32 %v1018_v40, %v850_v39  ;;  %v773_v47 = vadd.f32 %v1876_v48, %v772_v43  ;;  %v941_v49 = vpop.f32.mrf.mxu1 }
  0xec   : > { %1120 = vst [vmem:[%s1892_s7 + $0x138] sm:$0xff] %v1019_v46  ;;  %v942_v50 = vadd.f32 %v941_v49, %v773_v47  ;;  %811 = vmatmul.bf16.gmra.mxu0 %v1341_v41  ;;  %891 = vmatmul.bf16.gmra.mxu2 %v1469_v42 }
  0xed   : > { %980 = vmatmul.bf16.gmra.mxu1 %v1345_v44  ;;  %1060 = vmatmul.bf16.gmra.mxu3 %v1473_v45 }
  0xee   : > { %1089 = vst [vmem:[%s1892_s7 + $0x40] sm:$0xff] %v942_v50 }
  0xef   : > { %v852_v51 = vpop.f32.mrf.mxu2 }
  0xf0   : > { %v853_v52 = vadd.f32 %v1876_v48, %v852_v51  ;;  %v1021_v53 = vpop.f32.mrf.mxu3  ;;  %v1364_v51 = vld [vmem:[%s1798_s22 + $0xf0] sm:$0xf] }
  0xf1   : > { %v774_v54 = vpop.f32.mrf.mxu0 }
  0xf2   : > { %v1022_v55 = vadd.f32 %v1021_v53, %v853_v52  ;;  %v775_v56 = vadd.f32 %v1876_v48, %v774_v54  ;;  %v943_v57 = vpop.f32.mrf.mxu1  ;;  %v1596_v53 = vld [vmem:[%s1798_s22 + $0xf4] sm:$0xf0]  ;;  %v1492_v54 = vld [vmem:[%s1798_s22 + $0x1f0] sm:$0xf] }
  0xf3   : > { %v1365_v63 = vor.u32 %v1596_v53, %v1364_v51 }
  0xf4   : > { %1121 = vst [vmem:[%s1892_s7 + $0x140] sm:$0xff] %v1022_v55  ;;  %v944_v59 = vadd.f32 %v943_v57, %v775_v56  ;;  %v1628_v55 = vld [vmem:[%s1798_s22 + $0x1f4] sm:$0xf0]  ;;  %v1595_v56 = vld [vmem:[%s1798_s22 + $0xf4] sm:$0xf] }
  0xf5   : > { %v1366_v57 = vld [vmem:[%s1798_s22 + $0xf8] sm:$0xf0]  ;;  %v1493_v0 = vor.u32 %v1628_v55, %v1492_v54 }
  0xf6   : > { %1090 = vst [vmem:[%s1892_s7 + $0x48] sm:$0xff] %v944_v59  ;;  %v1494_v59 = vld [vmem:[%s1798_s22 + $0x1f8] sm:$0xf0]  ;;  %v1369_v2 = vor.u32 %v1595_v56, %v1366_v57 }
  0xf7   : > { %v854_v3 = vpop.f32.mrf.mxu2 }
  0xf8   : > { %v855_v4 = vadd.f32 %v1876_v48, %v854_v3  ;;  %v1023_v5 = vpop.f32.mrf.mxu3  ;;  %v1497_v3 = vor.u32 %v1627_v58, %v1494_v59 }
  0xf9   : > { %v777_v8 = vpop.f32.mrf.mxu0 }
  0xfa   : > { %v1024_v11 = vadd.f32 %v1023_v5, %v855_v4  ;;  %v778_v12 = vadd.f32 %v1876_v48, %v777_v8  ;;  %v946_v13 = vpop.f32.mrf.mxu1 }
  0xfc   : > { %1122 = vst [vmem:[%s1892_s7 + $0x148] sm:$0xff] %v1024_v11  ;;  %v947_v14 = vadd.f32 %v946_v13, %v778_v12  ;;  %816 = vmatmul.bf16.gmra.mxu0 %v1349_v6  ;;  %896 = vmatmul.bf16.gmra.mxu2 %v1477_v7 }
  0xfd   : > { %985 = vmatmul.bf16.gmra.mxu1 %v1353_v9  ;;  %1065 = vmatmul.bf16.gmra.mxu3 %v1481_v10 }
  0xfe   : > { %1091 = vst [vmem:[%s1892_s7 + $0x50] sm:$0xff] %v947_v14 }
  0xff   : > { %v857_v15 = vpop.f32.mrf.mxu2 }
 0x100   : > { %v858_v16 = vadd.f32 %v1876_v48, %v857_v15  ;;  %v1026_v17 = vpop.f32.mrf.mxu3 }
 0x101   : > { %v779_v18 = vpop.f32.mrf.mxu0 }
 0x102   : > { %v1027_v19 = vadd.f32 %v1026_v17, %v858_v16  ;;  %v780_v20 = vadd.f32 %v1876_v48, %v779_v18  ;;  %v948_v21 = vpop.f32.mrf.mxu1 }
 0x104   : > { %1123 = vst [vmem:[%s1892_s7 + $0x150] sm:$0xff] %v1027_v19  ;;  %v949_v23 = vadd.f32 %v948_v21, %v780_v20 }
 0x106   : > { %1092 = vst [vmem:[%s1892_s7 + $0x58] sm:$0xff] %v949_v23 }
 0x107   : > { %v859_v31 = vpop.f32.mrf.mxu2 }
 0x108   : > { %v860_v32 = vadd.f32 %v1876_v48, %v859_v31  ;;  %v1028_v33 = vpop.f32.mrf.mxu3 }
 0x109   : > { %v782_v36 = vpop.f32.mrf.mxu0 }
 0x10a   : > { %v1029_v39 = vadd.f32 %v1028_v33, %v860_v32  ;;  %v783_v40 = vadd.f32 %v1876_v48, %v782_v36  ;;  %v951_v41 = vpop.f32.mrf.mxu1 }
 0x10c   : > { %1124 = vst [vmem:[%s1892_s7 + $0x158] sm:$0xff] %v1029_v39  ;;  %v952_v42 = vadd.f32 %v951_v41, %v783_v40  ;;  %821 = vmatmul.bf16.gmra.mxu0 %v1357_v34  ;;  %901 = vmatmul.bf16.gmra.mxu2 %v1485_v35 }
 0x10d   : > { %990 = vmatmul.bf16.gmra.mxu1 %v1361_v37  ;;  %1070 = vmatmul.bf16.gmra.mxu3 %v1489_v38 }
 0x10e   : > { %1093 = vst [vmem:[%s1892_s7 + $0x60] sm:$0xff] %v952_v42 }
 0x10f   : > { %v862_v43 = vpop.f32.mrf.mxu2 }
 0x110   : > { %v863_v44 = vadd.f32 %v1876_v48, %v862_v43  ;;  %v1031_v45 = vpop.f32.mrf.mxu3 }
 0x111   : > { %v784_v46 = vpop.f32.mrf.mxu0 }
 0x112   : > { %v1032_v47 = vadd.f32 %v1031_v45, %v863_v44  ;;  %v785_v49 = vadd.f32 %v1876_v48, %v784_v46  ;;  %v953_v50 = vpop.f32.mrf.mxu1 }
 0x114   : > { %1125 = vst [vmem:[%s1892_s7 + $0x160] sm:$0xff] %v1032_v47  ;;  %v954_v52 = vadd.f32 %v953_v50, %v785_v49 }
 0x116   : > { %1094 = vst [vmem:[%s1892_s7 + $0x68] sm:$0xff] %v954_v52 }
 0x117   : > { %v864_v60 = vpop.f32.mrf.mxu2 }
 0x118   : > { %v865_v61 = vadd.f32 %v1876_v48, %v864_v60  ;;  %v1033_v62 = vpop.f32.mrf.mxu3 }
 0x119   : > { %v787_v1 = vpop.f32.mrf.mxu0 }
 0x11a   : > { %v1034_v4 = vadd.f32 %v1033_v62, %v865_v61  ;;  %v788_v5 = vadd.f32 %v1876_v48, %v787_v1  ;;  %v956_v6 = vpop.f32.mrf.mxu1 }
 0x11c   : > { %1126 = vst [vmem:[%s1892_s7 + $0x168] sm:$0xff] %v1034_v4  ;;  %v957_v7 = vadd.f32 %v956_v6, %v788_v5  ;;  %826 = vmatmul.bf16.gmra.mxu0 %v1365_v63  ;;  %906 = vmatmul.bf16.gmra.mxu2 %v1493_v0 }
 0x11d   : > { %995 = vmatmul.bf16.gmra.mxu1 %v1369_v2  ;;  %1075 = vmatmul.bf16.gmra.mxu3 %v1497_v3 }
 0x11e   : > { %1095 = vst [vmem:[%s1892_s7 + $0x70] sm:$0xff] %v957_v7 }
 0x11f   : > { %v867_v8 = vpop.f32.mrf.mxu2 }
 0x120   : > { %v868_v9 = vadd.f32 %v1876_v48, %v867_v8  ;;  %v1036_v10 = vpop.f32.mrf.mxu3 }
 0x121   : > { %v789_v11 = vpop.f32.mrf.mxu0 }
 0x122   : > { %v1037_v12 = vadd.f32 %v1036_v10, %v868_v9  ;;  %v790_v13 = vadd.f32 %v1876_v48, %v789_v11  ;;  %v958_v14 = vpop.f32.mrf.mxu1 }
 0x124   : > { %1127 = vst [vmem:[%s1892_s7 + $0x170] sm:$0xff] %v1037_v12  ;;  %v959_v15 = vadd.f32 %v958_v14, %v790_v13 }
 0x126   : > { %1096 = vst [vmem:[%s1892_s7 + $0x78] sm:$0xff] %v959_v15 }
 0x127   : > { %v869_v16 = vpop.f32.mrf.mxu2 }
 0x128   : > { %v870_v17 = vadd.f32 %v1876_v48, %v869_v16  ;;  %v1038_v18 = vpop.f32.mrf.mxu3 }
 0x129   : > { %v792_v19 = vpop.f32.mrf.mxu0 }
 0x12a   : > { %v1039_v20 = vadd.f32 %v1038_v18, %v870_v17  ;;  %v793_v21 = vadd.f32 %v1876_v48, %v792_v19  ;;  %v961_v22 = vpop.f32.mrf.mxu1 }
 0x12c   : > { %1128 = vst [vmem:[%s1892_s7 + $0x178] sm:$0xff] %v1039_v20  ;;  %v962_v23 = vadd.f32 %v961_v22, %v793_v21 }
 0x12e   : > { %1097 = vst [vmem:[%s1892_s7 + $0x80] sm:$0xff] %v962_v23 }
 0x12f   : > { %v872_v24 = vpop.f32.mrf.mxu2 }
 0x130   : > { %v873_v25 = vadd.f32 %v1876_v48, %v872_v24  ;;  %v1041_v26 = vpop.f32.mrf.mxu3 }
 0x131   : > { %v794_v27 = vpop.f32.mrf.mxu0 }
 0x132   : > { %v1042_v28 = vadd.f32 %v1041_v26, %v873_v25  ;;  %v795_v29 = vadd.f32 %v1876_v48, %v794_v27  ;;  %v963_v30 = vpop.f32.mrf.mxu1 }
 0x134   : > { %1129 = vst [vmem:[%s1892_s7 + $0x180] sm:$0xff] %v1042_v28  ;;  %v964_v31 = vadd.f32 %v963_v30, %v795_v29 }
 0x136   : > { %1098 = vst [vmem:[%s1892_s7 + $0x88] sm:$0xff] %v964_v31 }
 0x137   : > { %v874_v32 = vpop.f32.mrf.mxu2 }
 0x138   : > { %v875_v33 = vadd.f32 %v1876_v48, %v874_v32  ;;  %v1043_v34 = vpop.f32.mrf.mxu3 }
 0x139   : > { %v797_v35 = vpop.f32.mrf.mxu0 }
 0x13a   : > { %v1044_v36 = vadd.f32 %v1043_v34, %v875_v33  ;;  %v798_v37 = vadd.f32 %v1876_v48, %v797_v35  ;;  %v966_v38 = vpop.f32.mrf.mxu1 }
 0x13c   : > { %1130 = vst [vmem:[%s1892_s7 + $0x188] sm:$0xff] %v1044_v36  ;;  %v967_v39 = vadd.f32 %v966_v38, %v798_v37 }
 0x13e   : > { %1099 = vst [vmem:[%s1892_s7 + $0x90] sm:$0xff] %v967_v39 }
 0x13f   : > { %v877_v40 = vpop.f32.mrf.mxu2 }
 0x140   : > { %v878_v41 = vadd.f32 %v1876_v48, %v877_v40  ;;  %v1046_v42 = vpop.f32.mrf.mxu3 }
 0x141   : > { %v799_v43 = vpop.f32.mrf.mxu0 }
 0x142   : > { %v1047_v44 = vadd.f32 %v1046_v42, %v878_v41  ;;  %v800_v45 = vadd.f32 %v1876_v48, %v799_v43  ;;  %v968_v46 = vpop.f32.mrf.mxu1 }
 0x144   : > { %1131 = vst [vmem:[%s1892_s7 + $0x190] sm:$0xff] %v1047_v44  ;;  %v969_v47 = vadd.f32 %v968_v46, %v800_v45 }
 0x146   : > { %1100 = vst [vmem:[%s1892_s7 + $0x98] sm:$0xff] %v969_v47 }
 0x147   : > { %v879_v49 = vpop.f32.mrf.mxu2 }
 0x148   : > { %v880_v50 = vadd.f32 %v1876_v48, %v879_v49  ;;  %v1048_v51 = vpop.f32.mrf.mxu3 }
 0x149   : > { %v802_v52 = vpop.f32.mrf.mxu0 }
 0x14a   : > { %v1049_v53 = vadd.f32 %v1048_v51, %v880_v50  ;;  %v803_v54 = vadd.f32 %v1876_v48, %v802_v52  ;;  %v971_v55 = vpop.f32.mrf.mxu1 }
 0x14c   : > { %1132 = vst [vmem:[%s1892_s7 + $0x198] sm:$0xff] %v1049_v53  ;;  %v972_v56 = vadd.f32 %v971_v55, %v803_v54 }
 0x14e   : > { %1101 = vst [vmem:[%s1892_s7 + $0xa0] sm:$0xff] %v972_v56 }
 0x14f   : > { %v882_v57 = vpop.f32.mrf.mxu2 }
 0x150   : > { %v883_v58 = vadd.f32 %v1876_v48, %v882_v57  ;;  %v1051_v59 = vpop.f32.mrf.mxu3 }
 0x151   : > { %v804_v60 = vpop.f32.mrf.mxu0 }
 0x152   : > { %v1052_v61 = vadd.f32 %v1051_v59, %v883_v58  ;;  %v805_v62 = vadd.f32 %v1876_v48, %v804_v60  ;;  %v973_v63 = vpop.f32.mrf.mxu1 }
 0x154   : > { %1133 = vst [vmem:[%s1892_s7 + $0x1a0] sm:$0xff] %v1052_v61  ;;  %v974_v0 = vadd.f32 %v973_v63, %v805_v62 }
 0x156   : > { %1102 = vst [vmem:[%s1892_s7 + $0xa8] sm:$0xff] %v974_v0 }
 0x157   : > { %v884_v1 = vpop.f32.mrf.mxu2 }
 0x158   : > { %v885_v2 = vadd.f32 %v1876_v48, %v884_v1  ;;  %v1053_v3 = vpop.f32.mrf.mxu3 }
 0x159   : > { %v807_v4 = vpop.f32.mrf.mxu0 }
 0x15a   : > { %v1054_v5 = vadd.f32 %v1053_v3, %v885_v2  ;;  %v808_v6 = vadd.f32 %v1876_v48, %v807_v4  ;;  %v976_v7 = vpop.f32.mrf.mxu1 }
 0x15c   : > { %1134 = vst [vmem:[%s1892_s7 + $0x1a8] sm:$0xff] %v1054_v5  ;;  %v977_v8 = vadd.f32 %v976_v7, %v808_v6 }
 0x15e   : > { %1103 = vst [vmem:[%s1892_s7 + $0xb0] sm:$0xff] %v977_v8 }
 0x15f   : > { %v887_v9 = vpop.f32.mrf.mxu2 }
 0x160   : > { %v888_v10 = vadd.f32 %v1876_v48, %v887_v9  ;;  %v1056_v11 = vpop.f32.mrf.mxu3 }
 0x161   : > { %v809_v12 = vpop.f32.mrf.mxu0 }
 0x162   : > { %v1057_v13 = vadd.f32 %v1056_v11, %v888_v10  ;;  %v810_v14 = vadd.f32 %v1876_v48, %v809_v12  ;;  %v978_v15 = vpop.f32.mrf.mxu1 }
 0x164   : > { %1135 = vst [vmem:[%s1892_s7 + $0x1b0] sm:$0xff] %v1057_v13  ;;  %v979_v16 = vadd.f32 %v978_v15, %v810_v14 }
 0x166   : > { %1104 = vst [vmem:[%s1892_s7 + $0xb8] sm:$0xff] %v979_v16 }
 0x167   : > { %v889_v17 = vpop.f32.mrf.mxu2 }
 0x168   : > { %v890_v18 = vadd.f32 %v1876_v48, %v889_v17  ;;  %v1058_v19 = vpop.f32.mrf.mxu3 }
 0x169   : > { %v812_v20 = vpop.f32.mrf.mxu0 }
 0x16a   : > { %v1059_v21 = vadd.f32 %v1058_v19, %v890_v18  ;;  %v813_v22 = vadd.f32 %v1876_v48, %v812_v20  ;;  %v981_v23 = vpop.f32.mrf.mxu1 }
 0x16c   : > { %1136 = vst [vmem:[%s1892_s7 + $0x1b8] sm:$0xff] %v1059_v21  ;;  %v982_v24 = vadd.f32 %v981_v23, %v813_v22 }
 0x16e   : > { %1105 = vst [vmem:[%s1892_s7 + $0xc0] sm:$0xff] %v982_v24 }
 0x16f   : > { %v892_v25 = vpop.f32.mrf.mxu2 }
 0x170   : > { %v893_v26 = vadd.f32 %v1876_v48, %v892_v25  ;;  %v1061_v27 = vpop.f32.mrf.mxu3 }
 0x171   : > { %v814_v28 = vpop.f32.mrf.mxu0 }
 0x172   : > { %v1062_v29 = vadd.f32 %v1061_v27, %v893_v26  ;;  %v815_v30 = vadd.f32 %v1876_v48, %v814_v28  ;;  %v983_v31 = vpop.f32.mrf.mxu1 }
 0x174   : > { %1137 = vst [vmem:[%s1892_s7 + $0x1c0] sm:$0xff] %v1062_v29  ;;  %v984_v32 = vadd.f32 %v983_v31, %v815_v30 }
 0x176   : > { %1106 = vst [vmem:[%s1892_s7 + $0xc8] sm:$0xff] %v984_v32 }
 0x177   : > { %v894_v33 = vpop.f32.mrf.mxu2 }
 0x178   : > { %v895_v34 = vadd.f32 %v1876_v48, %v894_v33  ;;  %v1063_v35 = vpop.f32.mrf.mxu3 }
 0x179   : > { %v817_v36 = vpop.f32.mrf.mxu0 }
 0x17a   : > { %v1064_v37 = vadd.f32 %v1063_v35, %v895_v34  ;;  %v818_v38 = vadd.f32 %v1876_v48, %v817_v36  ;;  %v986_v39 = vpop.f32.mrf.mxu1 }
 0x17c   : > { %1138 = vst [vmem:[%s1892_s7 + $0x1c8] sm:$0xff] %v1064_v37  ;;  %v987_v40 = vadd.f32 %v986_v39, %v818_v38 }
 0x17e   : > { %1107 = vst [vmem:[%s1892_s7 + $0xd0] sm:$0xff] %v987_v40 }
 0x17f   : > { %v897_v41 = vpop.f32.mrf.mxu2 }
 0x180   : > { %v898_v42 = vadd.f32 %v1876_v48, %v897_v41  ;;  %v1066_v43 = vpop.f32.mrf.mxu3 }
 0x181   : > { %v819_v44 = vpop.f32.mrf.mxu0 }
 0x182   : > { %v1067_v45 = vadd.f32 %v1066_v43, %v898_v42  ;;  %v820_v46 = vadd.f32 %v1876_v48, %v819_v44  ;;  %v988_v47 = vpop.f32.mrf.mxu1 }
 0x184   : > { %1139 = vst [vmem:[%s1892_s7 + $0x1d0] sm:$0xff] %v1067_v45  ;;  %v989_v49 = vadd.f32 %v988_v47, %v820_v46 }
 0x186   : > { %1108 = vst [vmem:[%s1892_s7 + $0xd8] sm:$0xff] %v989_v49 }
 0x187   : > { %v899_v50 = vpop.f32.mrf.mxu2 }
 0x188   : > { %v900_v51 = vadd.f32 %v1876_v48, %v899_v50  ;;  %v1068_v52 = vpop.f32.mrf.mxu3 }
 0x189   : > { %v822_v53 = vpop.f32.mrf.mxu0 }
 0x18a   : > { %v1069_v54 = vadd.f32 %v1068_v52, %v900_v51  ;;  %v823_v55 = vadd.f32 %v1876_v48, %v822_v53  ;;  %v991_v56 = vpop.f32.mrf.mxu1 }
 0x18c   : > { %1140 = vst [vmem:[%s1892_s7 + $0x1d8] sm:$0xff] %v1069_v54  ;;  %v992_v57 = vadd.f32 %v991_v56, %v823_v55 }
 0x18e   : > { %1109 = vst [vmem:[%s1892_s7 + $0xe0] sm:$0xff] %v992_v57 }
 0x18f   : > { %v902_v58 = vpop.f32.mrf.mxu2 }
 0x190   : > { %v903_v59 = vadd.f32 %v1876_v48, %v902_v58  ;;  %v1071_v60 = vpop.f32.mrf.mxu3 }
 0x191   : > { %v824_v61 = vpop.f32.mrf.mxu0 }
 0x192   : > { %v1072_v62 = vadd.f32 %v1071_v60, %v903_v59  ;;  %v825_v63 = vadd.f32 %v1876_v48, %v824_v61  ;;  %v993_v0 = vpop.f32.mrf.mxu1 }
 0x194   : > { %1141 = vst [vmem:[%s1892_s7 + $0x1e0] sm:$0xff] %v1072_v62  ;;  %v994_v1 = vadd.f32 %v993_v0, %v825_v63 }
 0x196   : > { %1110 = vst [vmem:[%s1892_s7 + $0xe8] sm:$0xff] %v994_v1 }
 0x197   : > { %v904_v2 = vpop.f32.mrf.mxu2 }
 0x198   : > { %v905_v3 = vadd.f32 %v1876_v48, %v904_v2  ;;  %v1073_v4 = vpop.f32.mrf.mxu3 }
 0x199   : > { %v827_v5 = vpop.f32.mrf.mxu0 }
 0x19a   : > { %v1074_v6 = vadd.f32 %v1073_v4, %v905_v3  ;;  %v828_v7 = vadd.f32 %v1876_v48, %v827_v5  ;;  %v996_v8 = vpop.f32.mrf.mxu1 }
 0x19c   : > { %1142 = vst [vmem:[%s1892_s7 + $0x1e8] sm:$0xff] %v1074_v6  ;;  %v997_v9 = vadd.f32 %v996_v8, %v828_v7 }
 0x19e   : > { %1111 = vst [vmem:[%s1892_s7 + $0xf0] sm:$0xff] %v997_v9 }
 0x19f   : > { %v907_v10 = vpop.f32.mrf.mxu2 }
 0x1a0   : > { %v908_v11 = vadd.f32 %v1876_v48, %v907_v10  ;;  %v1076_v12 = vpop.f32.mrf.mxu3 }
 0x1a1   : > { %v829_v13 = vpop.f32.mrf.mxu0 }
 0x1a2   : > { %v1077_v14 = vadd.f32 %v1076_v12, %v908_v11  ;;  %v830_v15 = vadd.f32 %v1876_v48, %v829_v13  ;;  %v998_v16 = vpop.f32.mrf.mxu1 }
 0x1a4   : > { %1143 = vst [vmem:[%s1892_s7 + $0x1f0] sm:$0xff] %v1077_v14  ;;  %v999_v17 = vadd.f32 %v998_v16, %v830_v15 }
 0x1a6   : > { %1112 = vst [vmem:[%s1892_s7 + $0xf8] sm:$0xff] %v999_v17 }
 0x1a7   : > { %v909_v18 = vpop.f32.mrf.mxu2 }
 0x1a8   : > { %v910_v19 = vadd.f32 %v1876_v48, %v909_v18  ;;  %v1078_v20 = vpop.f32.mrf.mxu3 }
 0x1aa   : > { %v1079_v21 = vadd.f32 %v1078_v20, %v910_v19 }
 0x1ac   : > { %1144 = vst [vmem:[%s1892_s7 + $0x1f8] sm:$0xff] %v1079_v21 }
 0x1ad PF: > { %s13_s14 = sadd.s32 1, %s1708_s14   ;;  %s2090_s12 = smov %s1704_s13 }
 0x1ae   : > { %p10_p5 = scmp.ge.s32.totalorder %s13_s14, 4   ;;  %s2091_s13 = smov %s2093_s15 }
 0x1b0   :  { %12 = sbr.rel (!%p10_p5) target bundleno = 2 (0x2), region = 65 }

</bundles_post_ra>
